<compile_context>
chip_gen: v5e
topology: v5e:2x2
jax: 0.10.0
libtpu: 0.0.40
codegen_flags: <defaults>
</compile_context>

<pallas_src>
import numpy as np

import jax
import jax.numpy as jnp
from jax.experimental import pallas as pl
from jax.experimental.pallas import tpu as pltpu


# ----------------------------------------------------------------------------
# Wrapper-side weight/constant preparation (layout plumbing, not compute)
# ----------------------------------------------------------------------------
def _conv_kron(w, wo):
    """w: (Co, Ci, KH, KW) -> (KH*KW*Wo*Ci, Wo*Co); rows [t*Wo*Ci:(t+1)*Wo*Ci]
    hold kron(I_Wo, W_tap) with W_tap[ci, co] = w[co, ci, kh, kw], t=kh*KW+kw."""
    _, _, kh, kw = w.shape
    eye = jnp.eye(wo, dtype=jnp.float32)
    taps = []
    for dh in range(kh):
        for dw in range(kw):
            taps.append(jnp.kron(eye, w[:, :, dh, dw].astype(jnp.float32).T))
    return jnp.concatenate(taps, axis=0)


def _pool_row_sel(hi, ho):
    """(2*ho, hi) 0/1 selector: rows 0:ho pick even input rows, ho:2*ho odd."""
    sel = np.zeros((2 * ho, hi), np.float32)
    for i in range(ho):
        sel[i, 2 * i] = 1.0
        sel[ho + i, 2 * i + 1] = 1.0
    return sel


def _pool_col_sel(wi, wo, c):
    """(wi*c, 2*wo*c) 0/1 selector in (W*C) lane layout: left half picks even
    spatial columns, right half odd."""
    sel = np.zeros((wi * c, 2 * wo * c), np.float32)
    for j in range(wo):
        for ch in range(c):
            sel[(2 * j) * c + ch, j * c + ch] = 1.0
            sel[(2 * j + 1) * c + ch, wo * c + j * c + ch] = 1.0
    return sel


# ----------------------------------------------------------------------------
# The fused Pallas kernel (B batch samples per grid step)
# ----------------------------------------------------------------------------
def _convnet_kernel(x_ref, k1_ref, b1_ref, rsel1_ref, csel1_ref,
                    k2_ref, b2_ref, rsel2_ref, csel2_ref,
                    w1p_ref, w23_ref, bfc_ref,
                    out_ref, flat_ref):
    f32, bf16 = jnp.float32, jnp.bfloat16
    B = x_ref.shape[0]

    # ---- per-sample conv/pool stages (static unroll over the B samples) ----
    for s in range(B):
        img = x_ref[s]                                       # (28, 28) bf16

        # conv1 (1->5, 3x3): one K-fused MXU matmul, layout (H, W*C)
        lhs1 = jnp.concatenate(
            [img[kh:kh + 26, kw:kw + 26]
             for kh in range(3) for kw in range(3)], axis=1)  # (26, 234)
        acc1 = jnp.dot(lhs1, k1_ref[...], preferred_element_type=f32)
        r1 = jnp.maximum(acc1 + b1_ref[...], 0.0).astype(bf16)   # (26, 130)

        # maxpool 2x2 -> (13, 65): one row-selection dot + one col-selection
        # dot, elementwise max of the two halves (exact for 0/1 selectors).
        both1 = jnp.dot(rsel1_ref[...], r1, preferred_element_type=f32)
        rowmax1 = jnp.maximum(both1[0:13], both1[13:26]).astype(bf16)
        cols1 = jnp.dot(rowmax1, csel1_ref[...], preferred_element_type=f32)
        p1 = jnp.maximum(cols1[:, 0:65], cols1[:, 65:130]).astype(bf16)

        # conv2 (5->15, 3x3): one K-fused MXU matmul
        lhs2 = jnp.concatenate(
            [p1[kh:kh + 11, 5 * kw:5 * kw + 55]
             for kh in range(3) for kw in range(3)], axis=1)  # (11, 495)
        acc2 = jnp.dot(lhs2, k2_ref[...], preferred_element_type=f32)
        r2 = jnp.maximum(acc2 + b2_ref[...], 0.0).astype(bf16)   # (11, 165)

        # maxpool 2x2 (floor: last row/col dropped by the selectors) -> (5,75)
        both2 = jnp.dot(rsel2_ref[...], r2, preferred_element_type=f32)
        rowmax2 = jnp.maximum(both2[0:5], both2[5:10]).astype(bf16)
        cols2 = jnp.dot(rowmax2, csel2_ref[...], preferred_element_type=f32)
        p2 = jnp.maximum(cols2[:, 0:75], cols2[:, 75:150]).astype(bf16)

        # stash this sample's pooled rows for the batched FC stage
        for h in range(5):
            flat_ref[h, pl.ds(s, 1), :] = p2[h:h + 1, :]

    # ---- batched FC stage (flatten permutation folded into w1p) ------------
    flat = flat_ref[...]                                     # (5, B, 75) bf16

    a1 = jnp.dot(flat[0], w1p_ref[0], preferred_element_type=f32)
    for h in range(1, 5):
        a1 = a1 + jnp.dot(flat[h], w1p_ref[h], preferred_element_type=f32)
    a1 = jnp.maximum(a1 + bfc_ref[0:1, :], 0.0).astype(bf16)   # (B, 128)

    a2 = jnp.maximum(
        jnp.dot(a1, w23_ref[0], preferred_element_type=f32) + bfc_ref[1:2, :],
        0.0).astype(bf16)                                      # (B, 128)

    a3 = jnp.dot(a2, w23_ref[1], preferred_element_type=f32) + bfc_ref[2:3, :]
    out_ref[...] = a3                                          # (B, 128) f32


# ----------------------------------------------------------------------------
# Forward pass: one pallas_call for the whole network
# ----------------------------------------------------------------------------
def convnet_forward(params, x, *, block_batch=8):
    """x: (N, 1, 28, 28) or (N, 28, 28). Returns (N, 10) float32 logits.

    block_batch: samples per grid step; must be a multiple of 8.  Raise it
    (e.g. 64-256) for large-N throughput; 8 keeps the unrolled kernel small
    for this demo while still amortizing per-step overhead.
    """
    f32, bf16 = jnp.float32, jnp.bfloat16
    assert block_batch % 8 == 0
    N = x.shape[0]
    x3 = x.reshape(N, 28, 28).astype(bf16)

    B = N if N <= block_batch else block_batch
    n_pad = (-N) % B
    if n_pad:
        x3 = jnp.concatenate([x3, jnp.zeros((n_pad, 28, 28), bf16)], axis=0)
    Np = N + n_pad

    # Conv weights as row-stacked kron(I_W, tap) slabs; biases tiled to lanes.
    k1 = _conv_kron(params["conv1_w"], 26).astype(bf16)            # (234, 130)
    b1 = jnp.tile(params["conv1_b"].astype(f32), 26)[None, :]      # (1, 130)
    k2 = _conv_kron(params["conv2_w"], 11).astype(bf16)            # (495, 165)
    b2 = jnp.tile(params["conv2_b"].astype(f32), 11)[None, :]      # (1, 165)

    # Packed pooling selectors (0/1, exact in bf16).
    rsel1 = jnp.asarray(_pool_row_sel(26, 13)).astype(bf16)        # (26, 26)
    csel1 = jnp.asarray(_pool_col_sel(26, 13, 5)).astype(bf16)     # (130, 130)
    rsel2 = jnp.asarray(_pool_row_sel(11, 5)).astype(bf16)         # (10, 11)
    csel2 = jnp.asarray(_pool_col_sel(11, 5, 15)).astype(bf16)     # (165, 150)

    # fc1 with torch's NCHW flatten order folded into the weight:
    #   w1p[h, w*15+c, d] = fc1_w[d, c*25 + h*5 + w]; lane dim padded to 128.
    w1p_raw = (params["fc1_w"].astype(f32)
               .reshape(120, 15, 5, 5).transpose(2, 3, 1, 0).reshape(5, 75, 120))
    w1p = jnp.zeros((5, 75, 128), f32).at[:, :, :120].set(w1p_raw).astype(bf16)

    wf2 = jnp.zeros((128, 128), f32).at[:120, :60].set(
        params["fc2_w"].astype(f32).T)
    wf3 = jnp.zeros((128, 128), f32).at[:60, :10].set(
        params["fc3_w"].astype(f32).T)
    w23 = jnp.stack([wf2, wf3], axis=0).astype(bf16)               # (2,128,128)

    bfc = jnp.zeros((3, 128), f32)
    bfc = bfc.at[0, :120].set(params["fc1_b"].astype(f32))
    bfc = bfc.at[1, :60].set(params["fc2_b"].astype(f32))
    bfc = bfc.at[2, :10].set(params["fc3_b"].astype(f32))

    ins = (x3, k1, b1, rsel1, csel1, k2, b2, rsel2, csel2, w1p, w23, bfc)

    in_specs = [pl.BlockSpec((B, 28, 28), lambda n: (n, 0, 0))]
    for a in ins[1:]:
        in_specs.append(
            pl.BlockSpec(a.shape, lambda n, _nd=a.ndim: (0,) * _nd))

    out = pl.pallas_call(
        _convnet_kernel,
        out_shape=jax.ShapeDtypeStruct((Np, 128), f32),
        grid=(Np // B,),
        in_specs=in_specs,
        out_specs=pl.BlockSpec((B, 128), lambda n: (n, 0)),
        scratch_shapes=[pltpu.VMEM((5, B, 75), jnp.bfloat16)],
        compiler_params=pltpu.CompilerParams(
            dimension_semantics=("parallel",)),
    )(*ins)

    return out[:N, :10]                                            # (N, 10)


# ----------------------------------------------------------------------------
# Params + pure-JAX f32 reference (for a sanity check)
# ----------------------------------------------------------------------------
def init_params(key):
    ks = jax.random.split(key, 10)
    s = 0.1
    return {
        "conv1_w": s * jax.random.normal(ks[0], (5, 1, 3, 3), jnp.float32),
        "conv1_b": s * jax.random.normal(ks[1], (5,), jnp.float32),
        "conv2_w": s * jax.random.normal(ks[2], (15, 5, 3, 3), jnp.float32),
        "conv2_b": s * jax.random.normal(ks[3], (15,), jnp.float32),
        "fc1_w": s * jax.random.normal(ks[4], (120, 15 * 5 * 5), jnp.float32),
        "fc1_b": s * jax.random.normal(ks[5], (120,), jnp.float32),
        "fc2_w": s * jax.random.normal(ks[6], (60, 120), jnp.float32),
        "fc2_b": s * jax.random.normal(ks[7], (60,), jnp.float32),
        "fc3_w": s * jax.random.normal(ks[8], (10, 60), jnp.float32),
        "fc3_b": s * jax.random.normal(ks[9], (10,), jnp.float32),
    }


def _reference_forward(params, x):
    def conv_relu(x, w, b):
        N, Ci, H, W = x.shape
        Co, _, KH, KW = w.shape
        Ho, Wo = H - KH + 1, W - KW + 1
        cols = [x[:, :, dh:dh + Ho, dw:dw + Wo]
                for dh in range(KH) for dw in range(KW)]
        p = (jnp.stack(cols, axis=2).transpose(0, 3, 4, 1, 2)
             .reshape(N * Ho * Wo, Ci * KH * KW))
        out = p @ w.reshape(Co, -1).T + b
        return jnp.maximum(out, 0.0).reshape(N, Ho, Wo, Co).transpose(0, 3, 1, 2)

    def pool(x):
        N, C, H, W = x.shape
        Ho, Wo = H // 2, W // 2
        a = x[:, :, 0:2 * Ho:2, 0:2 * Wo:2]
        b = x[:, :, 1:2 * Ho:2, 0:2 * Wo:2]
        c = x[:, :, 0:2 * Ho:2, 1:2 * Wo:2]
        d = x[:, :, 1:2 * Ho:2, 1:2 * Wo:2]
        return jnp.maximum(jnp.maximum(a, b), jnp.maximum(c, d))

    h = pool(conv_relu(x, params["conv1_w"], params["conv1_b"]))
    h = pool(conv_relu(h, params["conv2_w"], params["conv2_b"]))
    h = h.reshape(-1, 15 * 5 * 5)
    h = jnp.maximum(h @ params["fc1_w"].T + params["fc1_b"], 0.0)
    h = jnp.maximum(h @ params["fc2_w"].T + params["fc2_b"], 0.0)
    return h @ params["fc3_w"].T + params["fc3_b"]


if __name__ == "__main__":
    key = jax.random.PRNGKey(0)
    pkey, xkey = jax.random.split(key)
    params = init_params(pkey)

    # Input must be 28x28 so the flatten matches 15*5*5 = 375.
    x = jax.random.normal(xkey, (2, 1, 28, 28), jnp.float32)

    out = jax.jit(convnet_forward)(params, x)
    out = jax.block_until_ready(out)
    assert out.shape == (2, 10), out.shape
    assert out.dtype == jnp.float32

    ref = jax.block_until_ready(jax.jit(_reference_forward)(params, x))
    # bf16 matmul operands (f32 accumulation) => loose tolerance vs f32 ref.
    np.testing.assert_allclose(np.asarray(out), np.asarray(ref),
                               rtol=5e-2, atol=5e-2)
    print("KERNEL_OK")
</pallas_src>

<mosaic_0001>
module attributes {stable_mosaic.version = 11 : i64} {
  func.func @_convnet_kernel(%arg0: i32, %arg1: memref<2x28x28xbf16, #tpu.memory_space<vmem>>, %arg2: memref<234x130xbf16, #tpu.memory_space<vmem>>, %arg3: memref<1x130xf32, #tpu.memory_space<vmem>>, %arg4: memref<26x26xbf16, #tpu.memory_space<vmem>>, %arg5: memref<130x130xbf16, #tpu.memory_space<vmem>>, %arg6: memref<495x165xbf16, #tpu.memory_space<vmem>>, %arg7: memref<1x165xf32, #tpu.memory_space<vmem>>, %arg8: memref<10x11xbf16, #tpu.memory_space<vmem>>, %arg9: memref<165x150xbf16, #tpu.memory_space<vmem>>, %arg10: memref<5x75x128xbf16, #tpu.memory_space<vmem>>, %arg11: memref<2x128x128xbf16, #tpu.memory_space<vmem>>, %arg12: memref<3x128xf32, #tpu.memory_space<vmem>>, %arg13: memref<2x128xf32, #tpu.memory_space<vmem>>, %arg14: memref<5x2x75xbf16, #tpu.memory_space<vmem>>) attributes {dimension_semantics = [#tpu.dimension_semantics<parallel>], iteration_bounds = array<i64: 1>, scalar_prefetch = 0 : i64, scratch_operands = 1 : i64, tpu.core_type = #tpu.core_type<tc>, window_params = [{transform_indices = @transform_0, window_bounds = array<i64: 2, 28, 28>}, {pipeline_mode = #tpu.pipeline_mode<synchronous>, transform_indices = @transform_1, window_bounds = array<i64: 234, 130>}, {pipeline_mode = #tpu.pipeline_mode<synchronous>, transform_indices = @transform_2, window_bounds = array<i64: 1, 130>}, {pipeline_mode = #tpu.pipeline_mode<synchronous>, transform_indices = @transform_3, window_bounds = array<i64: 26, 26>}, {pipeline_mode = #tpu.pipeline_mode<synchronous>, transform_indices = @transform_4, window_bounds = array<i64: 130, 130>}, {pipeline_mode = #tpu.pipeline_mode<synchronous>, transform_indices = @transform_5, window_bounds = array<i64: 495, 165>}, {pipeline_mode = #tpu.pipeline_mode<synchronous>, transform_indices = @transform_6, window_bounds = array<i64: 1, 165>}, {pipeline_mode = #tpu.pipeline_mode<synchronous>, transform_indices = @transform_7, window_bounds = array<i64: 10, 11>}, {pipeline_mode = #tpu.pipeline_mode<synchronous>, transform_indices = @transform_8, window_bounds = array<i64: 165, 150>}, {pipeline_mode = #tpu.pipeline_mode<synchronous>, transform_indices = @transform_9, window_bounds = array<i64: 5, 75, 128>}, {pipeline_mode = #tpu.pipeline_mode<synchronous>, transform_indices = @transform_10, window_bounds = array<i64: 2, 128, 128>}, {pipeline_mode = #tpu.pipeline_mode<synchronous>, transform_indices = @transform_11, window_bounds = array<i64: 3, 128>}, {transform_indices = @transform_12, window_bounds = array<i64: 2, 128>}]} {
    %c0 = arith.constant 0 : index
    %c0_0 = arith.constant 0 : index
    %c0_1 = arith.constant 0 : index
    %0 = vector.load %arg1[%c0, %c0_0, %c0_1] : memref<2x28x28xbf16, #tpu.memory_space<vmem>>, vector<1x28x28xbf16>
    %1 = vector.shape_cast %0 : vector<1x28x28xbf16> to vector<28x28xbf16>
    %2 = vector.extract_strided_slice %1 {offsets = [0, 0], sizes = [26, 26], strides = [1, 1]} : vector<28x28xbf16> to vector<26x26xbf16>
    %3 = vector.extract_strided_slice %1 {offsets = [0, 1], sizes = [26, 26], strides = [1, 1]} : vector<28x28xbf16> to vector<26x26xbf16>
    %4 = vector.extract_strided_slice %1 {offsets = [0, 2], sizes = [26, 26], strides = [1, 1]} : vector<28x28xbf16> to vector<26x26xbf16>
    %5 = vector.extract_strided_slice %1 {offsets = [1, 0], sizes = [26, 26], strides = [1, 1]} : vector<28x28xbf16> to vector<26x26xbf16>
    %6 = vector.extract_strided_slice %1 {offsets = [1, 1], sizes = [26, 26], strides = [1, 1]} : vector<28x28xbf16> to vector<26x26xbf16>
    %7 = vector.extract_strided_slice %1 {offsets = [1, 2], sizes = [26, 26], strides = [1, 1]} : vector<28x28xbf16> to vector<26x26xbf16>
    %8 = vector.extract_strided_slice %1 {offsets = [2, 0], sizes = [26, 26], strides = [1, 1]} : vector<28x28xbf16> to vector<26x26xbf16>
    %9 = vector.extract_strided_slice %1 {offsets = [2, 1], sizes = [26, 26], strides = [1, 1]} : vector<28x28xbf16> to vector<26x26xbf16>
    %10 = vector.extract_strided_slice %1 {offsets = [2, 2], sizes = [26, 26], strides = [1, 1]} : vector<28x28xbf16> to vector<26x26xbf16>
    %11 = tpu.concatenate %2, %3, %4, %5, %6, %7, %8, %9, %10 in 1 : vector<26x26xbf16>, vector<26x26xbf16>, vector<26x26xbf16>, vector<26x26xbf16>, vector<26x26xbf16>, vector<26x26xbf16>, vector<26x26xbf16>, vector<26x26xbf16>, vector<26x26xbf16> -> vector<26x234xbf16>
    %c0_2 = arith.constant 0 : index
    %c0_3 = arith.constant 0 : index
    %12 = vector.load %arg2[%c0_2, %c0_3] : memref<234x130xbf16, #tpu.memory_space<vmem>>, vector<234x130xbf16>
    %cst = arith.constant dense<0.000000e+00> : vector<26x130xf32>
    %13 = tpu.matmul %11, %12, %cst {dimension_numbers = #tpu.dot_dimension_numbers<[1], [0], [0], [1], [0, 0, 1, 1], [], []>} : vector<26x234xbf16>, vector<234x130xbf16>, vector<26x130xf32> -> vector<26x130xf32>
    %c0_4 = arith.constant 0 : index
    %c0_5 = arith.constant 0 : index
    %14 = vector.load %arg3[%c0_4, %c0_5] : memref<1x130xf32, #tpu.memory_space<vmem>>, vector<1x130xf32>
    %15 = vector.broadcast %14 : vector<1x130xf32> to vector<26x130xf32>
    %16 = arith.addf %13, %15 : vector<26x130xf32>
    %cst_6 = arith.constant 0.000000e+00 : f32
    %17 = vector.broadcast %cst_6 : f32 to vector<26x130xf32>
    %18 = arith.maximumf %16, %17 : vector<26x130xf32>
    %19 = arith.truncf %18 : vector<26x130xf32> to vector<26x130xbf16>
    %c0_7 = arith.constant 0 : index
    %c0_8 = arith.constant 0 : index
    %20 = vector.load %arg4[%c0_7, %c0_8] : memref<26x26xbf16, #tpu.memory_space<vmem>>, vector<26x26xbf16>
    %cst_9 = arith.constant dense<0.000000e+00> : vector<26x130xf32>
    %21 = tpu.matmul %20, %19, %cst_9 {dimension_numbers = #tpu.dot_dimension_numbers<[1], [0], [0], [1], [0, 0, 1, 1], [], []>} : vector<26x26xbf16>, vector<26x130xbf16>, vector<26x130xf32> -> vector<26x130xf32>
    %22 = vector.extract_strided_slice %21 {offsets = [0, 0], sizes = [13, 130], strides = [1, 1]} : vector<26x130xf32> to vector<13x130xf32>
    %23 = vector.extract_strided_slice %21 {offsets = [13, 0], sizes = [13, 130], strides = [1, 1]} : vector<26x130xf32> to vector<13x130xf32>
    %24 = arith.maximumf %22, %23 : vector<13x130xf32>
    %25 = arith.truncf %24 : vector<13x130xf32> to vector<13x130xbf16>
    %c0_10 = arith.constant 0 : index
    %c0_11 = arith.constant 0 : index
    %26 = vector.load %arg5[%c0_10, %c0_11] : memref<130x130xbf16, #tpu.memory_space<vmem>>, vector<130x130xbf16>
    %cst_12 = arith.constant dense<0.000000e+00> : vector<13x130xf32>
    %27 = tpu.matmul %25, %26, %cst_12 {dimension_numbers = #tpu.dot_dimension_numbers<[1], [0], [0], [1], [0, 0, 1, 1], [], []>} : vector<13x130xbf16>, vector<130x130xbf16>, vector<13x130xf32> -> vector<13x130xf32>
    %28 = vector.extract_strided_slice %27 {offsets = [0, 0], sizes = [13, 65], strides = [1, 1]} : vector<13x130xf32> to vector<13x65xf32>
    %29 = vector.extract_strided_slice %27 {offsets = [0, 65], sizes = [13, 65], strides = [1, 1]} : vector<13x130xf32> to vector<13x65xf32>
    %30 = arith.maximumf %28, %29 : vector<13x65xf32>
    %31 = arith.truncf %30 : vector<13x65xf32> to vector<13x65xbf16>
    %32 = vector.extract_strided_slice %31 {offsets = [0, 0], sizes = [11, 55], strides = [1, 1]} : vector<13x65xbf16> to vector<11x55xbf16>
    %33 = vector.extract_strided_slice %31 {offsets = [0, 5], sizes = [11, 55], strides = [1, 1]} : vector<13x65xbf16> to vector<11x55xbf16>
    %34 = vector.extract_strided_slice %31 {offsets = [0, 10], sizes = [11, 55], strides = [1, 1]} : vector<13x65xbf16> to vector<11x55xbf16>
    %35 = vector.extract_strided_slice %31 {offsets = [1, 0], sizes = [11, 55], strides = [1, 1]} : vector<13x65xbf16> to vector<11x55xbf16>
    %36 = vector.extract_strided_slice %31 {offsets = [1, 5], sizes = [11, 55], strides = [1, 1]} : vector<13x65xbf16> to vector<11x55xbf16>
    %37 = vector.extract_strided_slice %31 {offsets = [1, 10], sizes = [11, 55], strides = [1, 1]} : vector<13x65xbf16> to vector<11x55xbf16>
    %38 = vector.extract_strided_slice %31 {offsets = [2, 0], sizes = [11, 55], strides = [1, 1]} : vector<13x65xbf16> to vector<11x55xbf16>
    %39 = vector.extract_strided_slice %31 {offsets = [2, 5], sizes = [11, 55], strides = [1, 1]} : vector<13x65xbf16> to vector<11x55xbf16>
    %40 = vector.extract_strided_slice %31 {offsets = [2, 10], sizes = [11, 55], strides = [1, 1]} : vector<13x65xbf16> to vector<11x55xbf16>
    %41 = tpu.concatenate %32, %33, %34, %35, %36, %37, %38, %39, %40 in 1 : vector<11x55xbf16>, vector<11x55xbf16>, vector<11x55xbf16>, vector<11x55xbf16>, vector<11x55xbf16>, vector<11x55xbf16>, vector<11x55xbf16>, vector<11x55xbf16>, vector<11x55xbf16> -> vector<11x495xbf16>
    %c0_13 = arith.constant 0 : index
    %c0_14 = arith.constant 0 : index
    %42 = vector.load %arg6[%c0_13, %c0_14] : memref<495x165xbf16, #tpu.memory_space<vmem>>, vector<495x165xbf16>
    %cst_15 = arith.constant dense<0.000000e+00> : vector<11x165xf32>
    %43 = tpu.matmul %41, %42, %cst_15 {dimension_numbers = #tpu.dot_dimension_numbers<[1], [0], [0], [1], [0, 0, 1, 1], [], []>} : vector<11x495xbf16>, vector<495x165xbf16>, vector<11x165xf32> -> vector<11x165xf32>
    %c0_16 = arith.constant 0 : index
    %c0_17 = arith.constant 0 : index
    %44 = vector.load %arg7[%c0_16, %c0_17] : memref<1x165xf32, #tpu.memory_space<vmem>>, vector<1x165xf32>
    %45 = vector.broadcast %44 : vector<1x165xf32> to vector<11x165xf32>
    %46 = arith.addf %43, %45 : vector<11x165xf32>
    %cst_18 = arith.constant 0.000000e+00 : f32
    %47 = vector.broadcast %cst_18 : f32 to vector<11x165xf32>
    %48 = arith.maximumf %46, %47 : vector<11x165xf32>
    %49 = arith.truncf %48 : vector<11x165xf32> to vector<11x165xbf16>
    %c0_19 = arith.constant 0 : index
    %c0_20 = arith.constant 0 : index
    %50 = vector.load %arg8[%c0_19, %c0_20] : memref<10x11xbf16, #tpu.memory_space<vmem>>, vector<10x11xbf16>
    %cst_21 = arith.constant dense<0.000000e+00> : vector<10x165xf32>
    %51 = tpu.matmul %50, %49, %cst_21 {dimension_numbers = #tpu.dot_dimension_numbers<[1], [0], [0], [1], [0, 0, 1, 1], [], []>} : vector<10x11xbf16>, vector<11x165xbf16>, vector<10x165xf32> -> vector<10x165xf32>
    %52 = vector.extract_strided_slice %51 {offsets = [0, 0], sizes = [5, 165], strides = [1, 1]} : vector<10x165xf32> to vector<5x165xf32>
    %53 = vector.extract_strided_slice %51 {offsets = [5, 0], sizes = [5, 165], strides = [1, 1]} : vector<10x165xf32> to vector<5x165xf32>
    %54 = arith.maximumf %52, %53 : vector<5x165xf32>
    %55 = arith.truncf %54 : vector<5x165xf32> to vector<5x165xbf16>
    %c0_22 = arith.constant 0 : index
    %c0_23 = arith.constant 0 : index
    %56 = vector.load %arg9[%c0_22, %c0_23] : memref<165x150xbf16, #tpu.memory_space<vmem>>, vector<165x150xbf16>
    %cst_24 = arith.constant dense<0.000000e+00> : vector<5x150xf32>
    %57 = tpu.matmul %55, %56, %cst_24 {dimension_numbers = #tpu.dot_dimension_numbers<[1], [0], [0], [1], [0, 0, 1, 1], [], []>} : vector<5x165xbf16>, vector<165x150xbf16>, vector<5x150xf32> -> vector<5x150xf32>
    %58 = vector.extract_strided_slice %57 {offsets = [0, 0], sizes = [5, 75], strides = [1, 1]} : vector<5x150xf32> to vector<5x75xf32>
    %59 = vector.extract_strided_slice %57 {offsets = [0, 75], sizes = [5, 75], strides = [1, 1]} : vector<5x150xf32> to vector<5x75xf32>
    %60 = arith.maximumf %58, %59 : vector<5x75xf32>
    %61 = arith.truncf %60 : vector<5x75xf32> to vector<5x75xbf16>
    %62 = vector.extract_strided_slice %61 {offsets = [0, 0], sizes = [1, 75], strides = [1, 1]} : vector<5x75xbf16> to vector<1x75xbf16>
    %c0_25 = arith.constant 0 : index
    %c0_26 = arith.constant 0 : index
    %c0_27 = arith.constant 0 : index
    %63 = vector.load %arg14[%c0_25, %c0_26, %c0_27] : memref<5x2x75xbf16, #tpu.memory_space<vmem>>, vector<1x1x75xbf16>
    %64 = vector.shape_cast %63 : vector<1x1x75xbf16> to vector<1x75xbf16>
    %65 = vector.shape_cast %62 : vector<1x75xbf16> to vector<1x1x75xbf16>
    tpu.vector_store %arg14[%c0_25, %c0_26, %c0_27], %65 {strides = array<i32>} : memref<5x2x75xbf16, #tpu.memory_space<vmem>>, vector<1x1x75xbf16>,
    %66 = vector.extract_strided_slice %61 {offsets = [1, 0], sizes = [1, 75], strides = [1, 1]} : vector<5x75xbf16> to vector<1x75xbf16>
    %c1 = arith.constant 1 : index
    %c0_28 = arith.constant 0 : index
    %c0_29 = arith.constant 0 : index
    %67 = vector.load %arg14[%c1, %c0_28, %c0_29] : memref<5x2x75xbf16, #tpu.memory_space<vmem>>, vector<1x1x75xbf16>
    %68 = vector.shape_cast %67 : vector<1x1x75xbf16> to vector<1x75xbf16>
    %69 = vector.shape_cast %66 : vector<1x75xbf16> to vector<1x1x75xbf16>
    tpu.vector_store %arg14[%c1, %c0_28, %c0_29], %69 {strides = array<i32>} : memref<5x2x75xbf16, #tpu.memory_space<vmem>>, vector<1x1x75xbf16>,
    %70 = vector.extract_strided_slice %61 {offsets = [2, 0], sizes = [1, 75], strides = [1, 1]} : vector<5x75xbf16> to vector<1x75xbf16>
    %c2 = arith.constant 2 : index
    %c0_30 = arith.constant 0 : index
    %c0_31 = arith.constant 0 : index
    %71 = vector.load %arg14[%c2, %c0_30, %c0_31] : memref<5x2x75xbf16, #tpu.memory_space<vmem>>, vector<1x1x75xbf16>
    %72 = vector.shape_cast %71 : vector<1x1x75xbf16> to vector<1x75xbf16>
    %73 = vector.shape_cast %70 : vector<1x75xbf16> to vector<1x1x75xbf16>
    tpu.vector_store %arg14[%c2, %c0_30, %c0_31], %73 {strides = array<i32>} : memref<5x2x75xbf16, #tpu.memory_space<vmem>>, vector<1x1x75xbf16>,
    %74 = vector.extract_strided_slice %61 {offsets = [3, 0], sizes = [1, 75], strides = [1, 1]} : vector<5x75xbf16> to vector<1x75xbf16>
    %c3 = arith.constant 3 : index
    %c0_32 = arith.constant 0 : index
    %c0_33 = arith.constant 0 : index
    %75 = vector.load %arg14[%c3, %c0_32, %c0_33] : memref<5x2x75xbf16, #tpu.memory_space<vmem>>, vector<1x1x75xbf16>
    %76 = vector.shape_cast %75 : vector<1x1x75xbf16> to vector<1x75xbf16>
    %77 = vector.shape_cast %74 : vector<1x75xbf16> to vector<1x1x75xbf16>
    tpu.vector_store %arg14[%c3, %c0_32, %c0_33], %77 {strides = array<i32>} : memref<5x2x75xbf16, #tpu.memory_space<vmem>>, vector<1x1x75xbf16>,
    %78 = vector.extract_strided_slice %61 {offsets = [4, 0], sizes = [1, 75], strides = [1, 1]} : vector<5x75xbf16> to vector<1x75xbf16>
    %c4 = arith.constant 4 : index
    %c0_34 = arith.constant 0 : index
    %c0_35 = arith.constant 0 : index
    %79 = vector.load %arg14[%c4, %c0_34, %c0_35] : memref<5x2x75xbf16, #tpu.memory_space<vmem>>, vector<1x1x75xbf16>
    %80 = vector.shape_cast %79 : vector<1x1x75xbf16> to vector<1x75xbf16>
    %81 = vector.shape_cast %78 : vector<1x75xbf16> to vector<1x1x75xbf16>
    tpu.vector_store %arg14[%c4, %c0_34, %c0_35], %81 {strides = array<i32>} : memref<5x2x75xbf16, #tpu.memory_space<vmem>>, vector<1x1x75xbf16>,
    %c1_36 = arith.constant 1 : index
    %c0_37 = arith.constant 0 : index
    %c0_38 = arith.constant 0 : index
    %82 = vector.load %arg1[%c1_36, %c0_37, %c0_38] : memref<2x28x28xbf16, #tpu.memory_space<vmem>>, vector<1x28x28xbf16>
    %83 = vector.shape_cast %82 : vector<1x28x28xbf16> to vector<28x28xbf16>
    %84 = vector.extract_strided_slice %83 {offsets = [0, 0], sizes = [26, 26], strides = [1, 1]} : vector<28x28xbf16> to vector<26x26xbf16>
    %85 = vector.extract_strided_slice %83 {offsets = [0, 1], sizes = [26, 26], strides = [1, 1]} : vector<28x28xbf16> to vector<26x26xbf16>
    %86 = vector.extract_strided_slice %83 {offsets = [0, 2], sizes = [26, 26], strides = [1, 1]} : vector<28x28xbf16> to vector<26x26xbf16>
    %87 = vector.extract_strided_slice %83 {offsets = [1, 0], sizes = [26, 26], strides = [1, 1]} : vector<28x28xbf16> to vector<26x26xbf16>
    %88 = vector.extract_strided_slice %83 {offsets = [1, 1], sizes = [26, 26], strides = [1, 1]} : vector<28x28xbf16> to vector<26x26xbf16>
    %89 = vector.extract_strided_slice %83 {offsets = [1, 2], sizes = [26, 26], strides = [1, 1]} : vector<28x28xbf16> to vector<26x26xbf16>
    %90 = vector.extract_strided_slice %83 {offsets = [2, 0], sizes = [26, 26], strides = [1, 1]} : vector<28x28xbf16> to vector<26x26xbf16>
    %91 = vector.extract_strided_slice %83 {offsets = [2, 1], sizes = [26, 26], strides = [1, 1]} : vector<28x28xbf16> to vector<26x26xbf16>
    %92 = vector.extract_strided_slice %83 {offsets = [2, 2], sizes = [26, 26], strides = [1, 1]} : vector<28x28xbf16> to vector<26x26xbf16>
    %93 = tpu.concatenate %84, %85, %86, %87, %88, %89, %90, %91, %92 in 1 : vector<26x26xbf16>, vector<26x26xbf16>, vector<26x26xbf16>, vector<26x26xbf16>, vector<26x26xbf16>, vector<26x26xbf16>, vector<26x26xbf16>, vector<26x26xbf16>, vector<26x26xbf16> -> vector<26x234xbf16>
    %c0_39 = arith.constant 0 : index
    %c0_40 = arith.constant 0 : index
    %94 = vector.load %arg2[%c0_39, %c0_40] : memref<234x130xbf16, #tpu.memory_space<vmem>>, vector<234x130xbf16>
    %cst_41 = arith.constant dense<0.000000e+00> : vector<26x130xf32>
    %95 = tpu.matmul %93, %94, %cst_41 {dimension_numbers = #tpu.dot_dimension_numbers<[1], [0], [0], [1], [0, 0, 1, 1], [], []>} : vector<26x234xbf16>, vector<234x130xbf16>, vector<26x130xf32> -> vector<26x130xf32>
    %c0_42 = arith.constant 0 : index
    %c0_43 = arith.constant 0 : index
    %96 = vector.load %arg3[%c0_42, %c0_43] : memref<1x130xf32, #tpu.memory_space<vmem>>, vector<1x130xf32>
    %97 = vector.broadcast %96 : vector<1x130xf32> to vector<26x130xf32>
    %98 = arith.addf %95, %97 : vector<26x130xf32>
    %cst_44 = arith.constant 0.000000e+00 : f32
    %99 = vector.broadcast %cst_44 : f32 to vector<26x130xf32>
    %100 = arith.maximumf %98, %99 : vector<26x130xf32>
    %101 = arith.truncf %100 : vector<26x130xf32> to vector<26x130xbf16>
    %c0_45 = arith.constant 0 : index
    %c0_46 = arith.constant 0 : index
    %102 = vector.load %arg4[%c0_45, %c0_46] : memref<26x26xbf16, #tpu.memory_space<vmem>>, vector<26x26xbf16>
    %cst_47 = arith.constant dense<0.000000e+00> : vector<26x130xf32>
    %103 = tpu.matmul %102, %101, %cst_47 {dimension_numbers = #tpu.dot_dimension_numbers<[1], [0], [0], [1], [0, 0, 1, 1], [], []>} : vector<26x26xbf16>, vector<26x130xbf16>, vector<26x130xf32> -> vector<26x130xf32>
    %104 = vector.extract_strided_slice %103 {offsets = [0, 0], sizes = [13, 130], strides = [1, 1]} : vector<26x130xf32> to vector<13x130xf32>
    %105 = vector.extract_strided_slice %103 {offsets = [13, 0], sizes = [13, 130], strides = [1, 1]} : vector<26x130xf32> to vector<13x130xf32>
    %106 = arith.maximumf %104, %105 : vector<13x130xf32>
    %107 = arith.truncf %106 : vector<13x130xf32> to vector<13x130xbf16>
    %c0_48 = arith.constant 0 : index
    %c0_49 = arith.constant 0 : index
    %108 = vector.load %arg5[%c0_48, %c0_49] : memref<130x130xbf16, #tpu.memory_space<vmem>>, vector<130x130xbf16>
    %cst_50 = arith.constant dense<0.000000e+00> : vector<13x130xf32>
    %109 = tpu.matmul %107, %108, %cst_50 {dimension_numbers = #tpu.dot_dimension_numbers<[1], [0], [0], [1], [0, 0, 1, 1], [], []>} : vector<13x130xbf16>, vector<130x130xbf16>, vector<13x130xf32> -> vector<13x130xf32>
    %110 = vector.extract_strided_slice %109 {offsets = [0, 0], sizes = [13, 65], strides = [1, 1]} : vector<13x130xf32> to vector<13x65xf32>
    %111 = vector.extract_strided_slice %109 {offsets = [0, 65], sizes = [13, 65], strides = [1, 1]} : vector<13x130xf32> to vector<13x65xf32>
    %112 = arith.maximumf %110, %111 : vector<13x65xf32>
    %113 = arith.truncf %112 : vector<13x65xf32> to vector<13x65xbf16>
    %114 = vector.extract_strided_slice %113 {offsets = [0, 0], sizes = [11, 55], strides = [1, 1]} : vector<13x65xbf16> to vector<11x55xbf16>
    %115 = vector.extract_strided_slice %113 {offsets = [0, 5], sizes = [11, 55], strides = [1, 1]} : vector<13x65xbf16> to vector<11x55xbf16>
    %116 = vector.extract_strided_slice %113 {offsets = [0, 10], sizes = [11, 55], strides = [1, 1]} : vector<13x65xbf16> to vector<11x55xbf16>
    %117 = vector.extract_strided_slice %113 {offsets = [1, 0], sizes = [11, 55], strides = [1, 1]} : vector<13x65xbf16> to vector<11x55xbf16>
    %118 = vector.extract_strided_slice %113 {offsets = [1, 5], sizes = [11, 55], strides = [1, 1]} : vector<13x65xbf16> to vector<11x55xbf16>
    %119 = vector.extract_strided_slice %113 {offsets = [1, 10], sizes = [11, 55], strides = [1, 1]} : vector<13x65xbf16> to vector<11x55xbf16>
    %120 = vector.extract_strided_slice %113 {offsets = [2, 0], sizes = [11, 55], strides = [1, 1]} : vector<13x65xbf16> to vector<11x55xbf16>
    %121 = vector.extract_strided_slice %113 {offsets = [2, 5], sizes = [11, 55], strides = [1, 1]} : vector<13x65xbf16> to vector<11x55xbf16>
    %122 = vector.extract_strided_slice %113 {offsets = [2, 10], sizes = [11, 55], strides = [1, 1]} : vector<13x65xbf16> to vector<11x55xbf16>
    %123 = tpu.concatenate %114, %115, %116, %117, %118, %119, %120, %121, %122 in 1 : vector<11x55xbf16>, vector<11x55xbf16>, vector<11x55xbf16>, vector<11x55xbf16>, vector<11x55xbf16>, vector<11x55xbf16>, vector<11x55xbf16>, vector<11x55xbf16>, vector<11x55xbf16> -> vector<11x495xbf16>
    %c0_51 = arith.constant 0 : index
    %c0_52 = arith.constant 0 : index
    %124 = vector.load %arg6[%c0_51, %c0_52] : memref<495x165xbf16, #tpu.memory_space<vmem>>, vector<495x165xbf16>
    %cst_53 = arith.constant dense<0.000000e+00> : vector<11x165xf32>
    %125 = tpu.matmul %123, %124, %cst_53 {dimension_numbers = #tpu.dot_dimension_numbers<[1], [0], [0], [1], [0, 0, 1, 1], [], []>} : vector<11x495xbf16>, vector<495x165xbf16>, vector<11x165xf32> -> vector<11x165xf32>
    %c0_54 = arith.constant 0 : index
    %c0_55 = arith.constant 0 : index
    %126 = vector.load %arg7[%c0_54, %c0_55] : memref<1x165xf32, #tpu.memory_space<vmem>>, vector<1x165xf32>
    %127 = vector.broadcast %126 : vector<1x165xf32> to vector<11x165xf32>
    %128 = arith.addf %125, %127 : vector<11x165xf32>
    %cst_56 = arith.constant 0.000000e+00 : f32
    %129 = vector.broadcast %cst_56 : f32 to vector<11x165xf32>
    %130 = arith.maximumf %128, %129 : vector<11x165xf32>
    %131 = arith.truncf %130 : vector<11x165xf32> to vector<11x165xbf16>
    %c0_57 = arith.constant 0 : index
    %c0_58 = arith.constant 0 : index
    %132 = vector.load %arg8[%c0_57, %c0_58] : memref<10x11xbf16, #tpu.memory_space<vmem>>, vector<10x11xbf16>
    %cst_59 = arith.constant dense<0.000000e+00> : vector<10x165xf32>
    %133 = tpu.matmul %132, %131, %cst_59 {dimension_numbers = #tpu.dot_dimension_numbers<[1], [0], [0], [1], [0, 0, 1, 1], [], []>} : vector<10x11xbf16>, vector<11x165xbf16>, vector<10x165xf32> -> vector<10x165xf32>
    %134 = vector.extract_strided_slice %133 {offsets = [0, 0], sizes = [5, 165], strides = [1, 1]} : vector<10x165xf32> to vector<5x165xf32>
    %135 = vector.extract_strided_slice %133 {offsets = [5, 0], sizes = [5, 165], strides = [1, 1]} : vector<10x165xf32> to vector<5x165xf32>
    %136 = arith.maximumf %134, %135 : vector<5x165xf32>
    %137 = arith.truncf %136 : vector<5x165xf32> to vector<5x165xbf16>
    %c0_60 = arith.constant 0 : index
    %c0_61 = arith.constant 0 : index
    %138 = vector.load %arg9[%c0_60, %c0_61] : memref<165x150xbf16, #tpu.memory_space<vmem>>, vector<165x150xbf16>
    %cst_62 = arith.constant dense<0.000000e+00> : vector<5x150xf32>
    %139 = tpu.matmul %137, %138, %cst_62 {dimension_numbers = #tpu.dot_dimension_numbers<[1], [0], [0], [1], [0, 0, 1, 1], [], []>} : vector<5x165xbf16>, vector<165x150xbf16>, vector<5x150xf32> -> vector<5x150xf32>
    %140 = vector.extract_strided_slice %139 {offsets = [0, 0], sizes = [5, 75], strides = [1, 1]} : vector<5x150xf32> to vector<5x75xf32>
    %141 = vector.extract_strided_slice %139 {offsets = [0, 75], sizes = [5, 75], strides = [1, 1]} : vector<5x150xf32> to vector<5x75xf32>
    %142 = arith.maximumf %140, %141 : vector<5x75xf32>
    %143 = arith.truncf %142 : vector<5x75xf32> to vector<5x75xbf16>
    %144 = vector.extract_strided_slice %143 {offsets = [0, 0], sizes = [1, 75], strides = [1, 1]} : vector<5x75xbf16> to vector<1x75xbf16>
    %c0_63 = arith.constant 0 : index
    %c1_64 = arith.constant 1 : index
    %c0_65 = arith.constant 0 : index
    %145 = vector.load %arg14[%c0_63, %c1_64, %c0_65] : memref<5x2x75xbf16, #tpu.memory_space<vmem>>, vector<1x1x75xbf16>
    %146 = vector.shape_cast %145 : vector<1x1x75xbf16> to vector<1x75xbf16>
    %147 = vector.shape_cast %144 : vector<1x75xbf16> to vector<1x1x75xbf16>
    tpu.vector_store %arg14[%c0_63, %c1_64, %c0_65], %147 {strides = array<i32>} : memref<5x2x75xbf16, #tpu.memory_space<vmem>>, vector<1x1x75xbf16>,
    %148 = vector.extract_strided_slice %143 {offsets = [1, 0], sizes = [1, 75], strides = [1, 1]} : vector<5x75xbf16> to vector<1x75xbf16>
    %c1_66 = arith.constant 1 : index
    %c1_67 = arith.constant 1 : index
    %c0_68 = arith.constant 0 : index
    %149 = vector.load %arg14[%c1_66, %c1_67, %c0_68] : memref<5x2x75xbf16, #tpu.memory_space<vmem>>, vector<1x1x75xbf16>
    %150 = vector.shape_cast %149 : vector<1x1x75xbf16> to vector<1x75xbf16>
    %151 = vector.shape_cast %148 : vector<1x75xbf16> to vector<1x1x75xbf16>
    tpu.vector_store %arg14[%c1_66, %c1_67, %c0_68], %151 {strides = array<i32>} : memref<5x2x75xbf16, #tpu.memory_space<vmem>>, vector<1x1x75xbf16>,
    %152 = vector.extract_strided_slice %143 {offsets = [2, 0], sizes = [1, 75], strides = [1, 1]} : vector<5x75xbf16> to vector<1x75xbf16>
    %c2_69 = arith.constant 2 : index
    %c1_70 = arith.constant 1 : index
    %c0_71 = arith.constant 0 : index
    %153 = vector.load %arg14[%c2_69, %c1_70, %c0_71] : memref<5x2x75xbf16, #tpu.memory_space<vmem>>, vector<1x1x75xbf16>
    %154 = vector.shape_cast %153 : vector<1x1x75xbf16> to vector<1x75xbf16>
    %155 = vector.shape_cast %152 : vector<1x75xbf16> to vector<1x1x75xbf16>
    tpu.vector_store %arg14[%c2_69, %c1_70, %c0_71], %155 {strides = array<i32>} : memref<5x2x75xbf16, #tpu.memory_space<vmem>>, vector<1x1x75xbf16>,
    %156 = vector.extract_strided_slice %143 {offsets = [3, 0], sizes = [1, 75], strides = [1, 1]} : vector<5x75xbf16> to vector<1x75xbf16>
    %c3_72 = arith.constant 3 : index
    %c1_73 = arith.constant 1 : index
    %c0_74 = arith.constant 0 : index
    %157 = vector.load %arg14[%c3_72, %c1_73, %c0_74] : memref<5x2x75xbf16, #tpu.memory_space<vmem>>, vector<1x1x75xbf16>
    %158 = vector.shape_cast %157 : vector<1x1x75xbf16> to vector<1x75xbf16>
    %159 = vector.shape_cast %156 : vector<1x75xbf16> to vector<1x1x75xbf16>
    tpu.vector_store %arg14[%c3_72, %c1_73, %c0_74], %159 {strides = array<i32>} : memref<5x2x75xbf16, #tpu.memory_space<vmem>>, vector<1x1x75xbf16>,
    %160 = vector.extract_strided_slice %143 {offsets = [4, 0], sizes = [1, 75], strides = [1, 1]} : vector<5x75xbf16> to vector<1x75xbf16>
    %c4_75 = arith.constant 4 : index
    %c1_76 = arith.constant 1 : index
    %c0_77 = arith.constant 0 : index
    %161 = vector.load %arg14[%c4_75, %c1_76, %c0_77] : memref<5x2x75xbf16, #tpu.memory_space<vmem>>, vector<1x1x75xbf16>
    %162 = vector.shape_cast %161 : vector<1x1x75xbf16> to vector<1x75xbf16>
    %163 = vector.shape_cast %160 : vector<1x75xbf16> to vector<1x1x75xbf16>
    tpu.vector_store %arg14[%c4_75, %c1_76, %c0_77], %163 {strides = array<i32>} : memref<5x2x75xbf16, #tpu.memory_space<vmem>>, vector<1x1x75xbf16>,
    %c0_78 = arith.constant 0 : index
    %c0_79 = arith.constant 0 : index
    %c0_80 = arith.constant 0 : index
    %164 = vector.load %arg14[%c0_78, %c0_79, %c0_80] : memref<5x2x75xbf16, #tpu.memory_space<vmem>>, vector<5x2x75xbf16>
    %165 = vector.extract_strided_slice %164 {offsets = [0, 0, 0], sizes = [1, 2, 75], strides = [1, 1, 1]} : vector<5x2x75xbf16> to vector<1x2x75xbf16>
    %166 = vector.shape_cast %165 : vector<1x2x75xbf16> to vector<2x75xbf16>
    %c0_81 = arith.constant 0 : index
    %c0_82 = arith.constant 0 : index
    %c0_83 = arith.constant 0 : index
    %167 = vector.load %arg10[%c0_81, %c0_82, %c0_83] : memref<5x75x128xbf16, #tpu.memory_space<vmem>>, vector<1x75x128xbf16>
    %168 = vector.shape_cast %167 : vector<1x75x128xbf16> to vector<75x128xbf16>
    %cst_84 = arith.constant dense<0.000000e+00> : vector<2x128xf32>
    %169 = tpu.matmul %166, %168, %cst_84 {dimension_numbers = #tpu.dot_dimension_numbers<[1], [0], [0], [1], [0, 0, 1, 1], [], []>} : vector<2x75xbf16>, vector<75x128xbf16>, vector<2x128xf32> -> vector<2x128xf32>
    %170 = vector.extract_strided_slice %164 {offsets = [1, 0, 0], sizes = [1, 2, 75], strides = [1, 1, 1]} : vector<5x2x75xbf16> to vector<1x2x75xbf16>
    %171 = vector.shape_cast %170 : vector<1x2x75xbf16> to vector<2x75xbf16>
    %c1_85 = arith.constant 1 : index
    %c0_86 = arith.constant 0 : index
    %c0_87 = arith.constant 0 : index
    %172 = vector.load %arg10[%c1_85, %c0_86, %c0_87] : memref<5x75x128xbf16, #tpu.memory_space<vmem>>, vector<1x75x128xbf16>
    %173 = vector.shape_cast %172 : vector<1x75x128xbf16> to vector<75x128xbf16>
    %cst_88 = arith.constant dense<0.000000e+00> : vector<2x128xf32>
    %174 = tpu.matmul %171, %173, %cst_88 {dimension_numbers = #tpu.dot_dimension_numbers<[1], [0], [0], [1], [0, 0, 1, 1], [], []>} : vector<2x75xbf16>, vector<75x128xbf16>, vector<2x128xf32> -> vector<2x128xf32>
    %175 = arith.addf %169, %174 : vector<2x128xf32>
    %176 = vector.extract_strided_slice %164 {offsets = [2, 0, 0], sizes = [1, 2, 75], strides = [1, 1, 1]} : vector<5x2x75xbf16> to vector<1x2x75xbf16>
    %177 = vector.shape_cast %176 : vector<1x2x75xbf16> to vector<2x75xbf16>
    %c2_89 = arith.constant 2 : index
    %c0_90 = arith.constant 0 : index
    %c0_91 = arith.constant 0 : index
    %178 = vector.load %arg10[%c2_89, %c0_90, %c0_91] : memref<5x75x128xbf16, #tpu.memory_space<vmem>>, vector<1x75x128xbf16>
    %179 = vector.shape_cast %178 : vector<1x75x128xbf16> to vector<75x128xbf16>
    %cst_92 = arith.constant dense<0.000000e+00> : vector<2x128xf32>
    %180 = tpu.matmul %177, %179, %cst_92 {dimension_numbers = #tpu.dot_dimension_numbers<[1], [0], [0], [1], [0, 0, 1, 1], [], []>} : vector<2x75xbf16>, vector<75x128xbf16>, vector<2x128xf32> -> vector<2x128xf32>
    %181 = arith.addf %175, %180 : vector<2x128xf32>
    %182 = vector.extract_strided_slice %164 {offsets = [3, 0, 0], sizes = [1, 2, 75], strides = [1, 1, 1]} : vector<5x2x75xbf16> to vector<1x2x75xbf16>
    %183 = vector.shape_cast %182 : vector<1x2x75xbf16> to vector<2x75xbf16>
    %c3_93 = arith.constant 3 : index
    %c0_94 = arith.constant 0 : index
    %c0_95 = arith.constant 0 : index
    %184 = vector.load %arg10[%c3_93, %c0_94, %c0_95] : memref<5x75x128xbf16, #tpu.memory_space<vmem>>, vector<1x75x128xbf16>
    %185 = vector.shape_cast %184 : vector<1x75x128xbf16> to vector<75x128xbf16>
    %cst_96 = arith.constant dense<0.000000e+00> : vector<2x128xf32>
    %186 = tpu.matmul %183, %185, %cst_96 {dimension_numbers = #tpu.dot_dimension_numbers<[1], [0], [0], [1], [0, 0, 1, 1], [], []>} : vector<2x75xbf16>, vector<75x128xbf16>, vector<2x128xf32> -> vector<2x128xf32>
    %187 = arith.addf %181, %186 : vector<2x128xf32>
    %188 = vector.extract_strided_slice %164 {offsets = [4, 0, 0], sizes = [1, 2, 75], strides = [1, 1, 1]} : vector<5x2x75xbf16> to vector<1x2x75xbf16>
    %189 = vector.shape_cast %188 : vector<1x2x75xbf16> to vector<2x75xbf16>
    %c4_97 = arith.constant 4 : index
    %c0_98 = arith.constant 0 : index
    %c0_99 = arith.constant 0 : index
    %190 = vector.load %arg10[%c4_97, %c0_98, %c0_99] : memref<5x75x128xbf16, #tpu.memory_space<vmem>>, vector<1x75x128xbf16>
    %191 = vector.shape_cast %190 : vector<1x75x128xbf16> to vector<75x128xbf16>
    %cst_100 = arith.constant dense<0.000000e+00> : vector<2x128xf32>
    %192 = tpu.matmul %189, %191, %cst_100 {dimension_numbers = #tpu.dot_dimension_numbers<[1], [0], [0], [1], [0, 0, 1, 1], [], []>} : vector<2x75xbf16>, vector<75x128xbf16>, vector<2x128xf32> -> vector<2x128xf32>
    %193 = arith.addf %187, %192 : vector<2x128xf32>
    %c0_101 = arith.constant 0 : index
    %c0_102 = arith.constant 0 : index
    %194 = vector.load %arg12[%c0_101, %c0_102] : memref<3x128xf32, #tpu.memory_space<vmem>>, vector<1x128xf32>
    %195 = vector.broadcast %194 : vector<1x128xf32> to vector<2x128xf32>
    %196 = arith.addf %193, %195 : vector<2x128xf32>
    %cst_103 = arith.constant 0.000000e+00 : f32
    %197 = vector.broadcast %cst_103 : f32 to vector<2x128xf32>
    %198 = arith.maximumf %196, %197 : vector<2x128xf32>
    %199 = arith.truncf %198 : vector<2x128xf32> to vector<2x128xbf16>
    %c0_104 = arith.constant 0 : index
    %c0_105 = arith.constant 0 : index
    %c0_106 = arith.constant 0 : index
    %200 = vector.load %arg11[%c0_104, %c0_105, %c0_106] : memref<2x128x128xbf16, #tpu.memory_space<vmem>>, vector<1x128x128xbf16>
    %201 = vector.shape_cast %200 : vector<1x128x128xbf16> to vector<128x128xbf16>
    %cst_107 = arith.constant dense<0.000000e+00> : vector<2x128xf32>
    %202 = tpu.matmul %199, %201, %cst_107 {dimension_numbers = #tpu.dot_dimension_numbers<[1], [0], [0], [1], [0, 0, 1, 1], [], []>} : vector<2x128xbf16>, vector<128x128xbf16>, vector<2x128xf32> -> vector<2x128xf32>
    %c1_108 = arith.constant 1 : index
    %c0_109 = arith.constant 0 : index
    %203 = vector.load %arg12[%c1_108, %c0_109] : memref<3x128xf32, #tpu.memory_space<vmem>>, vector<1x128xf32>
    %204 = vector.broadcast %203 : vector<1x128xf32> to vector<2x128xf32>
    %205 = arith.addf %202, %204 : vector<2x128xf32>
    %cst_110 = arith.constant 0.000000e+00 : f32
    %206 = vector.broadcast %cst_110 : f32 to vector<2x128xf32>
    %207 = arith.maximumf %205, %206 : vector<2x128xf32>
    %208 = arith.truncf %207 : vector<2x128xf32> to vector<2x128xbf16>
    %c1_111 = arith.constant 1 : index
    %c0_112 = arith.constant 0 : index
    %c0_113 = arith.constant 0 : index
    %209 = vector.load %arg11[%c1_111, %c0_112, %c0_113] : memref<2x128x128xbf16, #tpu.memory_space<vmem>>, vector<1x128x128xbf16>
    %210 = vector.shape_cast %209 : vector<1x128x128xbf16> to vector<128x128xbf16>
    %cst_114 = arith.constant dense<0.000000e+00> : vector<2x128xf32>
    %211 = tpu.matmul %208, %210, %cst_114 {dimension_numbers = #tpu.dot_dimension_numbers<[1], [0], [0], [1], [0, 0, 1, 1], [], []>} : vector<2x128xbf16>, vector<128x128xbf16>, vector<2x128xf32> -> vector<2x128xf32>
    %c2_115 = arith.constant 2 : index
    %c0_116 = arith.constant 0 : index
    %212 = vector.load %arg12[%c2_115, %c0_116] : memref<3x128xf32, #tpu.memory_space<vmem>>, vector<1x128xf32>
    %213 = vector.broadcast %212 : vector<1x128xf32> to vector<2x128xf32>
    %214 = arith.addf %211, %213 : vector<2x128xf32>
    %c0_117 = arith.constant 0 : index
    %c0_118 = arith.constant 0 : index
    %215 = vector.load %arg13[%c0_117, %c0_118] : memref<2x128xf32, #tpu.memory_space<vmem>>, vector<2x128xf32>
    tpu.vector_store %arg13[%c0_117, %c0_118], %214 {strides = array<i32>} : memref<2x128xf32, #tpu.memory_space<vmem>>, vector<2x128xf32>,
    return
  }
  func.func @transform_0(%arg0: i32) -> (i32, i32, i32) {
    %c0_i32 = arith.constant 0 : i32
    %c0_i32_0 = arith.constant 0 : i32
    %c0_i32_1 = arith.constant 0 : i32
    return %arg0, %c0_i32, %c0_i32_0 : i32, i32, i32
  }
  func.func @transform_1(%arg0: i32) -> (i32, i32) {
    %c0_i32 = arith.constant 0 : i32
    %c0_i32_0 = arith.constant 0 : i32
    %c0_i32_1 = arith.constant 0 : i32
    return %c0_i32, %c0_i32_0 : i32, i32
  }
  func.func @transform_2(%arg0: i32) -> (i32, i32) {
    %c0_i32 = arith.constant 0 : i32
    %c0_i32_0 = arith.constant 0 : i32
    %c0_i32_1 = arith.constant 0 : i32
    return %c0_i32, %c0_i32_0 : i32, i32
  }
  func.func @transform_3(%arg0: i32) -> (i32, i32) {
    %c0_i32 = arith.constant 0 : i32
    %c0_i32_0 = arith.constant 0 : i32
    %c0_i32_1 = arith.constant 0 : i32
    return %c0_i32, %c0_i32_0 : i32, i32
  }
  func.func @transform_4(%arg0: i32) -> (i32, i32) {
    %c0_i32 = arith.constant 0 : i32
    %c0_i32_0 = arith.constant 0 : i32
    %c0_i32_1 = arith.constant 0 : i32
    return %c0_i32, %c0_i32_0 : i32, i32
  }
  func.func @transform_5(%arg0: i32) -> (i32, i32) {
    %c0_i32 = arith.constant 0 : i32
    %c0_i32_0 = arith.constant 0 : i32
    %c0_i32_1 = arith.constant 0 : i32
    return %c0_i32, %c0_i32_0 : i32, i32
  }
  func.func @transform_6(%arg0: i32) -> (i32, i32) {
    %c0_i32 = arith.constant 0 : i32
    %c0_i32_0 = arith.constant 0 : i32
    %c0_i32_1 = arith.constant 0 : i32
    return %c0_i32, %c0_i32_0 : i32, i32
  }
  func.func @transform_7(%arg0: i32) -> (i32, i32) {
    %c0_i32 = arith.constant 0 : i32
    %c0_i32_0 = arith.constant 0 : i32
    %c0_i32_1 = arith.constant 0 : i32
    return %c0_i32, %c0_i32_0 : i32, i32
  }
  func.func @transform_8(%arg0: i32) -> (i32, i32) {
    %c0_i32 = arith.constant 0 : i32
    %c0_i32_0 = arith.constant 0 : i32
    %c0_i32_1 = arith.constant 0 : i32
    return %c0_i32, %c0_i32_0 : i32, i32
  }
  func.func @transform_9(%arg0: i32) -> (i32, i32, i32) {
    %c0_i32 = arith.constant 0 : i32
    %c0_i32_0 = arith.constant 0 : i32
    %c0_i32_1 = arith.constant 0 : i32
    %c0_i32_2 = arith.constant 0 : i32
    return %c0_i32, %c0_i32_0, %c0_i32_1 : i32, i32, i32
  }
  func.func @transform_10(%arg0: i32) -> (i32, i32, i32) {
    %c0_i32 = arith.constant 0 : i32
    %c0_i32_0 = arith.constant 0 : i32
    %c0_i32_1 = arith.constant 0 : i32
    %c0_i32_2 = arith.constant 0 : i32
    return %c0_i32, %c0_i32_0, %c0_i32_1 : i32, i32, i32
  }
  func.func @transform_11(%arg0: i32) -> (i32, i32) {
    %c0_i32 = arith.constant 0 : i32
    %c0_i32_0 = arith.constant 0 : i32
    %c0_i32_1 = arith.constant 0 : i32
    return %c0_i32, %c0_i32_0 : i32, i32
  }
  func.func @transform_12(%arg0: i32) -> (i32, i32) {
    %c0_i32 = arith.constant 0 : i32
    %c0_i32_0 = arith.constant 0 : i32
    return %arg0, %c0_i32 : i32, i32
  }
}

</mosaic_0001>

<bundles_post_ra>
// kernel: tile.14
= control target key start
LH: loop header
LB: loop body
LE: loop exit
PB: predicated region body
PF: predicated region fallthrough
CT: control target
= control target key end

     0   :  { %vm9_vm0 = vcmask 23552   ;;  %s226_s12 = smov 125   ;;  %s227_s13 = smov 115   ;;  %vm3_vm1 = vcmask 39936   ;;  %vm13_vm2 = vcmask 15360   ;;  %vm16_vm3 = vcmask 1048552   ;;  %s348_s0 = inlined_call_operand.vmem [shape: f32[26,5], index: 0, kind: input, shape index: {}]   ;;  %s349_s1 = inlined_call_operand.vmem [shape: f32[1,130], index: 1, kind: output, shape index: {}]  }
   0x1   :  { %v174_v0 = vld [vmem:[%s348_s0 + $0x19] sm:$0x1]   ;;  %v177_v3 = vld [vmem:[%s348_s0 + $0x17] sm:$0x1]   ;;  %v179_v4 = vld [vmem:[%s348_s0 + $0x15] sm:$0x1]  }
   0x2   :  { %v175_v1 = vld [vmem:[%s348_s0 + $0x19] sm:$0x1]   ;;  %26 = vrot.lane.b32.xlu1 %v177_v3, %s227_s13  ;;  %s228_s16 = smov 105   ;;  %v176_v5 = vld [vmem:[%s348_s0 + $0x18] sm:$0x1]   ;;  %s229_s21 = smov 120  }
   0x3   :  { %v10_v2 = vsel %vm9_vm0, %v175_v1, %v174_v0  ;;  %38 = vrot.lane.b32.xlu2 %v179_v4, %s228_s16  ;;  %v178_v6 = vld [vmem:[%s348_s0 + $0x16] sm:$0x1]   ;;  %s230_s22 = smov 110   ;;  %v180_v7 = vld [vmem:[%s348_s0 + $0x14] sm:$0x1]   ;;  %s231_s25 = smov 100  }
   0x4   :  { %11 = vrot.lane.b32.xlu0 %v10_v2, %s226_s12  ;;  %v181_v8 = vld [vmem:[%s348_s0 + $0x13] sm:$0x1]   ;;  %v182_v9 = vld [vmem:[%s348_s0 + $0x12] sm:$0x1]   ;;  %s232_s30 = smov 95   ;;  %s233_s2 = smov 90  }
   0x5   :  { %v183_v10 = vld [vmem:[%s348_s0 + $0x11] sm:$0x1]   ;;  %s234_s5 = smov 85   ;;  %v184_v11 = vld [vmem:[%s348_s0 + $0x10] sm:$0x1]   ;;  %s235_s10 = smov 80  }
   0x6   :  { %v185_v12 = vld [vmem:[%s348_s0 + $0xf] sm:$0x1]   ;;  %s236_s11 = smov 75   ;;  %v186_v13 = vld [vmem:[%s348_s0 + $0xe] sm:$0x1]   ;;  %s237_s14 = smov 70  }
   0x7   :  { %v187_v14 = vld [vmem:[%s348_s0 + $0xd] sm:$0x1]   ;;  %v188_v15 = vld [vmem:[%s348_s0 + $0xc] sm:$0x1]   ;;  %s238_s19 = smov 65   ;;  %s239_s20 = smov 60  }
   0x8   :  { %v189_v16 = vld [vmem:[%s348_s0 + $0xb] sm:$0x1]   ;;  %s240_s23 = smov 55   ;;  %v190_v17 = vld [vmem:[%s348_s0 + $0xa] sm:$0x1]   ;;  %s241_s28 = smov 50  }
   0x9   :  { %v191_v18 = vld [vmem:[%s348_s0 + $0x9] sm:$0x1]   ;;  %s242_s29 = smov 45   ;;  %v192_v19 = vld [vmem:[%s348_s0 + $0x8] sm:$0x1]   ;;  %s243_s3 = smov 40  }
   0xa   :  { %32 = vrot.lane.b32.xlu1 %v178_v6, %s230_s22  ;;  %v193_v20 = vld [vmem:[%s348_s0 + $0x7] sm:$0x1]   ;;  %v194_v21 = vld [vmem:[%s348_s0 + $0x6] sm:$0x1]   ;;  %s244_s8 = smov 35   ;;  %s245_s9 = smov 30  }
   0xb   :  { %44 = vrot.lane.b32.xlu2 %v180_v7, %s231_s25  ;;  %v195_v22 = vld [vmem:[%s348_s0 + $0x5] sm:$0x1]   ;;  %s246_s12 = smov 25   ;;  %v196_v23 = vld [vmem:[%s348_s0 + $0x4] sm:$0x1]   ;;  %s247_s17 = smov 20  }
   0xc   :  { %20 = vrot.lane.b32.xlu0 %v176_v5, %s229_s21  ;;  %v197_v24 = vld [vmem:[%s348_s0 + $0x3] sm:$0x1]   ;;  %s248_s18 = smov 15   ;;  %v198_v25 = vld [vmem:[%s348_s0 + $0x2] sm:$0x1]   ;;  %s249_s21 = smov 10  }
   0xd   :  { %v199_v26 = vld [vmem:[%s348_s0 + $0x1] sm:$0x1]   ;;  %s250_s24 = smov 5   ;;  %v2_v27 = vld [vmem:[%s348_s0] sm:$0x1]   ;;  %vm22_vm4 = vcmask 1023936  }
   0xe   :  { %4 = vst.msk [vmem:[#allocation0] sm:$0x1] %vm3_vm1, %v2_v27   ;;  %vm28_vm5 = vcmask 982936   ;;  %vm34_vm6 = vcmask 941936   ;;  %vm40_vm7 = vcmask 900936   ;;  %vm46_vm8 = vcmask 859936  }
   0xf   :  { %vm52_vm9 = vcmask 818936   ;;  %vm58_vm10 = vcmask 777936   ;;  %vm64_vm11 = vcmask 736936   ;;  %vm70_vm12 = vcmask 695936  }
  0x10   :  { %vm76_vm13 = vcmask 654936   ;;  %vm82_vm14 = vcmask 613936   ;;  %vm88_vm15 = vcmask 572936   ;;  %vm94_vm0 = vcmask 531936  }
  0x11   :  { %vm100_vm1 = vcmask 490936  }
  0x12   :  { %56 = vrot.lane.b32.xlu1 %v182_v9, %s233_s2 }
  0x13   :  { %62 = vrot.lane.b32.xlu2 %v183_v10, %s234_s5 }
  0x14   :  { %50 = vrot.lane.b32.xlu0 %v181_v8, %s232_s30 }
  0x1a   :  { %74 = vrot.lane.b32.xlu1 %v185_v12, %s236_s11 }
  0x1b   :  { %80 = vrot.lane.b32.xlu2 %v186_v13, %s237_s14 }
  0x1c   :  { %68 = vrot.lane.b32.xlu0 %v184_v11, %s235_s10 }
  0x22   :  { %92 = vrot.lane.b32.xlu1 %v188_v15, %s239_s20 }
  0x23   :  { %98 = vrot.lane.b32.xlu2 %v189_v16, %s240_s23 }
  0x24   :  { %86 = vrot.lane.b32.xlu0 %v187_v14, %s238_s19 }
  0x2a   :  { %110 = vrot.lane.b32.xlu1 %v191_v18, %s242_s29 }
  0x2b   :  { %116 = vrot.lane.b32.xlu2 %v192_v19, %s243_s3 }
  0x2c   :  { %104 = vrot.lane.b32.xlu0 %v190_v17, %s241_s28 }
  0x32   :  { %128 = vrot.lane.b32.xlu1 %v194_v21, %s245_s9 }
  0x33   :  { %134 = vrot.lane.b32.xlu2 %v195_v22, %s246_s12 }
  0x34   :  { %122 = vrot.lane.b32.xlu0 %v193_v20, %s244_s8 }
  0x3a   :  { %146 = vrot.lane.b32.xlu1 %v197_v24, %s248_s18 }
  0x3b   :  { %152 = vrot.lane.b32.xlu2 %v198_v25, %s249_s21 }
  0x3c   :  { %140 = vrot.lane.b32.xlu0 %v196_v23, %s247_s17 }
  0x44   :  { %158 = vrot.lane.b32.xlu0 %v199_v26, %s250_s24 }
  0x5d   :  { %v39_v28 = vpop.permute.xlu2 %38  }
  0x65   :  { %v45_v29 = vpop.permute.xlu2 %44  }
  0x6d   :  { %v63_v30 = vpop.permute.xlu2 %62  }
  0x74   :  { %v27_v32 = vpop.permute.xlu1 %26  }
  0x75   :  { %v81_v33 = vpop.permute.xlu2 %80  }
  0x76   :  { %v12_v31 = vpop.permute.xlu0 %11  }
  0x77   :  { %15 = vst.msk [vmem:[#allocation0 + $0x8] sm:$0x1] %vm13_vm2, %v12_v31   ;;  %vm106_vm2 = vcmask 449936  }
  0x78   :  { %17 = vst.msk [vmem:[#allocation0] sm:$0x1] %vm16_vm3, %v12_v31   ;;  %vm112_vm3 = vcmask 408936  }
  0x7c   :  { %v33_v36 = vpop.permute.xlu1 %32  }
  0x7d   :  { %v99_v37 = vpop.permute.xlu2 %98  }
  0x7e   :  { %v169_v34 = vld [vmem:[#allocation0 + $0x8] sm:$0x1]  ;;  %v21_v35 = vpop.permute.xlu0 %20  }
  0x7f   :  { %200 = vst [vmem:[%s349_s1 + $0x1] sm:$0x1] %v169_v34 }
  0x80   :  { %23 = vst.msk [vmem:[#allocation0] sm:$0x1] %vm22_vm4, %v21_v35   ;;  %vm118_vm4 = vcmask 367936  }
  0x81   :  { %29 = vst.msk [vmem:[#allocation0] sm:$0x1] %vm28_vm5, %v27_v32   ;;  %vm124_vm5 = vcmask 326936  }
  0x82   :  { %35 = vst.msk [vmem:[#allocation0] sm:$0x1] %vm34_vm6, %v33_v36   ;;  %vm130_vm6 = vcmask 285936  }
  0x83   :  { %41 = vst.msk [vmem:[#allocation0] sm:$0x1] %vm40_vm7, %v39_v28   ;;  %vm136_vm7 = vcmask 244936  }
  0x84   :  { %47 = vst.msk [vmem:[#allocation0] sm:$0x1] %vm46_vm8, %v45_v29   ;;  %v57_v39 = vpop.permute.xlu1 %56   ;;  %vm142_vm8 = vcmask 203936  }
  0x85   :  { %v117_v40 = vpop.permute.xlu2 %116  }
  0x86   :  { %v51_v38 = vpop.permute.xlu0 %50  }
  0x87   :  { %53 = vst.msk [vmem:[#allocation0] sm:$0x1] %vm52_vm9, %v51_v38   ;;  %vm148_vm9 = vcmask 162936  }
  0x88   :  { %59 = vst.msk [vmem:[#allocation0] sm:$0x1] %vm58_vm10, %v57_v39   ;;  %vm154_vm10 = vcmask 121936  }
  0x89   :  { %65 = vst.msk [vmem:[#allocation0] sm:$0x1] %vm64_vm11, %v63_v30   ;;  %vm160_vm11 = vcmask 80936  }
  0x8c   :  { %v75_v42 = vpop.permute.xlu1 %74  }
  0x8d   :  { %v135_v43 = vpop.permute.xlu2 %134  }
  0x8e   :  { %v69_v41 = vpop.permute.xlu0 %68  }
  0x8f   :  { %71 = vst.msk [vmem:[#allocation0] sm:$0x1] %vm70_vm12, %v69_v41  }
  0x90   :  { %77 = vst.msk [vmem:[#allocation0] sm:$0x1] %vm76_vm13, %v75_v42  }
  0x91   :  { %83 = vst.msk [vmem:[#allocation0] sm:$0x1] %vm82_vm14, %v81_v33  }
  0x94   :  { %v93_v45 = vpop.permute.xlu1 %92  }
  0x95   :  { %v153_v46 = vpop.permute.xlu2 %152  }
  0x96   :  { %v87_v44 = vpop.permute.xlu0 %86  }
  0x97   :  { %89 = vst.msk [vmem:[#allocation0] sm:$0x1] %vm88_vm15, %v87_v44  }
  0x98   :  { %95 = vst.msk [vmem:[#allocation0] sm:$0x1] %vm94_vm0, %v93_v45  }
  0x99   :  { %101 = vst.msk [vmem:[#allocation0] sm:$0x1] %vm100_vm1, %v99_v37  }
  0x9c   :  { %v111_v48 = vpop.permute.xlu1 %110  }
  0x9e   :  { %v105_v47 = vpop.permute.xlu0 %104  }
  0x9f   :  { %107 = vst.msk [vmem:[#allocation0] sm:$0x1] %vm106_vm2, %v105_v47  }
  0xa0   :  { %113 = vst.msk [vmem:[#allocation0] sm:$0x1] %vm112_vm3, %v111_v48  }
  0xa1   :  { %119 = vst.msk [vmem:[#allocation0] sm:$0x1] %vm118_vm4, %v117_v40  }
  0xa4   :  { %v129_v50 = vpop.permute.xlu1 %128  }
  0xa6   :  { %v123_v49 = vpop.permute.xlu0 %122  }
  0xa7   :  { %125 = vst.msk [vmem:[#allocation0] sm:$0x1] %vm124_vm5, %v123_v49  }
  0xa8   :  { %131 = vst.msk [vmem:[#allocation0] sm:$0x1] %vm130_vm6, %v129_v50  }
  0xa9   :  { %137 = vst.msk [vmem:[#allocation0] sm:$0x1] %vm136_vm7, %v135_v43  }
  0xac   :  { %v147_v52 = vpop.permute.xlu1 %146  }
  0xae   :  { %v141_v51 = vpop.permute.xlu0 %140  }
  0xaf   :  { %143 = vst.msk [vmem:[#allocation0] sm:$0x1] %vm142_vm8, %v141_v51  }
  0xb0   :  { %149 = vst.msk [vmem:[#allocation0] sm:$0x1] %vm148_vm9, %v147_v52  }
  0xb1   :  { %155 = vst.msk [vmem:[#allocation0] sm:$0x1] %vm154_vm10, %v153_v46  }
  0xb6   :  { %v159_v53 = vpop.permute.xlu0 %158  }
  0xb7   :  { %161 = vst.msk [vmem:[#allocation0] sm:$0x1] %vm160_vm11, %v159_v53  }
  0xbe   :  { %v164_v54 = vld [vmem:[#allocation0] sm:$0x1] }
  0xbf   :  { %167 = vst [vmem:[%s349_s1] sm:$0x1] %v164_v54 }

// kernel: tile.18
= control target key start
LH: loop header
LB: loop body
LE: loop exit
PB: predicated region body
PF: predicated region fallthrough
CT: control target
= control target key end

     0   :  { %s28_s0 = inlined_call_operand.vmem [shape: f32[15], index: 0, kind: input, shape index: {}]   ;;  %s29_s1 = inlined_call_operand.vmem [shape: f32[11,15], index: 1, kind: output, shape index: {}]  }
   0x1   :  { %v4_v0 = vld [vmem:[%s28_s0] ss:$0 sm:$0xff] }
   0x2   :  { %5 = vst [vmem:[%s29_s1] sm:$0xff] %v4_v0 }
   0x3   :  { %8 = vst [vmem:[%s29_s1 + $0x8] sm:$0xff] %v4_v0 }

// kernel: tile.19
= control target key start
LH: loop header
LB: loop body
LE: loop exit
PB: predicated region body
PF: predicated region fallthrough
CT: control target
= control target key end

     0   :  { %vm9_vm0 = vcmask 64512   ;;  %s108_s12 = smov 120   ;;  %s109_s13 = smov 90   ;;  %vm3_vm1 = vcmask 121856   ;;  %vm13_vm2 = vcmask 56320   ;;  %vm16_vm3 = vcmask 1048512   ;;  %s170_s0 = inlined_call_operand.vmem [shape: f32[11,15], index: 0, kind: input, shape index: {}]   ;;  %s171_s1 = inlined_call_operand.vmem [shape: f32[1,165], index: 1, kind: output, shape index: {}]  }
   0x1   :  { %v86_v0 = vld [vmem:[%s170_s0 + $0x8] sm:$0x1]   ;;  %v89_v3 = vld [vmem:[%s170_s0 + $0x6] sm:$0x1]   ;;  %v91_v4 = vld [vmem:[%s170_s0 + $0x4] sm:$0x1]  }
   0x2   :  { %v87_v1 = vld [vmem:[%s170_s0 + $0x8] sm:$0x1]   ;;  %26 = vrot.lane.b32.xlu1 %v89_v3, %s109_s13  ;;  %s110_s16 = smov 60   ;;  %v88_v5 = vld [vmem:[%s170_s0 + $0x7] sm:$0x1]   ;;  %s111_s21 = smov 105  }
   0x3   :  { %v10_v2 = vsel %vm9_vm0, %v87_v1, %v86_v0  ;;  %38 = vrot.lane.b32.xlu2 %v91_v4, %s110_s16  ;;  %v90_v6 = vld [vmem:[%s170_s0 + $0x5] sm:$0x1]   ;;  %s112_s22 = smov 75   ;;  %v92_v7 = vld [vmem:[%s170_s0 + $0x3] sm:$0x1]   ;;  %s113_s25 = smov 45  }
   0x4   :  { %11 = vrot.lane.b32.xlu0 %v10_v2, %s108_s12  ;;  %v93_v8 = vld [vmem:[%s170_s0 + $0x2] sm:$0x1]   ;;  %v94_v9 = vld [vmem:[%s170_s0 + $0xa] sm:$0x1]   ;;  %s114_s30 = smov 30   ;;  %s115_s2 = smov 22  }
   0x5   :  { %v95_v10 = vld [vmem:[%s170_s0 + $0x1] sm:$0x1]   ;;  %s116_s5 = smov 15   ;;  %v96_v11 = vld [vmem:[%s170_s0 + $0x9] sm:$0x1]   ;;  %s117_s8 = smov 7  }
   0x6   :  { %v2_v12 = vld [vmem:[%s170_s0] sm:$0x1]   ;;  %vm22_vm4 = vcmask 982856   ;;  %vm28_vm5 = vcmask 859856   ;;  %vm34_vm6 = vcmask 736856   ;;  %vm40_vm7 = vcmask 613856  }
   0x7   :  { %4 = vst.msk [vmem:[#allocation0] sm:$0x1] %vm3_vm1, %v2_v12   ;;  %vm46_vm8 = vcmask 490856   ;;  %vm52_vm9 = vcmask 367856   ;;  %vm58_vm10 = vcmask 302256   ;;  %vm65_vm11 = vcmask 244856  }
   0x8   :  { %vm71_vm12 = vcmask 179256  }
   0xa   :  { %32 = vrot.lane.b32.xlu1 %v90_v6, %s112_s22 }
   0xb   :  { %44 = vrot.lane.b32.xlu2 %v92_v7, %s113_s25 }
   0xc   :  { %20 = vrot.lane.b32.xlu0 %v88_v5, %s111_s21 }
  0x12   :  { %56 = vrot.lane.b32.xlu1 %v94_v9, %s115_s2 }
  0x13   :  { %63 = vrot.lane.b32.xlu2 %v95_v10, %s116_s5 }
  0x14   :  { %50 = vrot.lane.b32.xlu0 %v93_v8, %s114_s30 }
  0x1c   :  { %69 = vrot.lane.b32.xlu0 %v96_v11, %s117_s8 }
  0x5d   :  { %v39_v13 = vpop.permute.xlu2 %38  }
  0x65   :  { %v45_v14 = vpop.permute.xlu2 %44  }
  0x6d   :  { %v64_v15 = vpop.permute.xlu2 %63  }
  0x74   :  { %v27_v17 = vpop.permute.xlu1 %26  }
  0x76   :  { %v12_v16 = vpop.permute.xlu0 %11  }
  0x77   :  { %15 = vst.msk [vmem:[#allocation0 + $0x8] sm:$0x1] %vm13_vm2, %v12_v16  }
  0x78   :  { %17 = vst.msk [vmem:[#allocation0] sm:$0x1] %vm16_vm3, %v12_v16  }
  0x7c   :  { %v33_v19 = vpop.permute.xlu1 %32  }
  0x7e   :  { %v21_v18 = vpop.permute.xlu0 %20  }
  0x7f   :  { %23 = vst.msk [vmem:[#allocation0] sm:$0x1] %vm22_vm4, %v21_v18  }
  0x80   :  { %29 = vst.msk [vmem:[#allocation0] sm:$0x1] %vm28_vm5, %v27_v17  }
  0x81   :  { %35 = vst.msk [vmem:[#allocation0] sm:$0x1] %vm34_vm6, %v33_v19  }
  0x82   :  { %41 = vst.msk [vmem:[#allocation0] sm:$0x1] %vm40_vm7, %v39_v13  }
  0x83   :  { %47 = vst.msk [vmem:[#allocation0] sm:$0x1] %vm46_vm8, %v45_v14  }
  0x84   :  { %v57_v21 = vpop.permute.xlu1 %56  }
  0x85   :  { %60 = vst.msk [vmem:[#allocation0 + $0x8] sm:$0x1] %vm58_vm10, %v57_v21  }
  0x86   :  { %v51_v20 = vpop.permute.xlu0 %50  }
  0x87   :  { %53 = vst.msk [vmem:[#allocation0] sm:$0x1] %vm52_vm9, %v51_v20  }
  0x88   :  { %66 = vst.msk [vmem:[#allocation0] sm:$0x1] %vm65_vm11, %v64_v15  }
  0x8e   :  { %v70_v22 = vpop.permute.xlu0 %69  }
  0x8f   :  { %73 = vst.msk [vmem:[#allocation0 + $0x8] sm:$0x1] %vm71_vm12, %v70_v22   ;;  %v76_v23 = vld [vmem:[#allocation0] sm:$0x1] }
  0x90   :  { %79 = vst [vmem:[%s171_s1] sm:$0x1] %v76_v23 }
  0x96   :  { %v81_v24 = vld [vmem:[#allocation0 + $0x8] sm:$0x1] }
  0x97   :  { %97 = vst [vmem:[%s171_s1 + $0x1] sm:$0x1] %v81_v24 }

// kernel: convnet_forward.1
= control target key start
LH: loop header
LB: loop body
LE: loop exit
PB: predicated region body
PF: predicated region fallthrough
CT: control target
= control target key end

     0   :  { %s5284_s27 = smov 25   ;;  %vm89_vm0 = vcmask 1046528   ;;  %vm65_vm1 = vsmask.f32 7424  ;;  %s5285_s28 = smov 28   ;;  %s7465_s0 = inlined_call_operand.vmem [shape: bf16[2,28,28], index: 0, kind: input, shape index: {}]   ;;  %s7466_s1 = inlined_call_operand.vmem [shape: bf16[234,130], index: 1, kind: input, shape index: {}]   ;;  %s7467_s2 = inlined_call_operand.vmem [shape: f32[1,130], index: 2, kind: input, shape index: {}]   ;;  %s7468_s3 = inlined_call_operand.vmem [shape: bf16[26,26], index: 3, kind: input, shape index: {}]   ;;  %s7469_s4 = inlined_call_operand.vmem [shape: bf16[130,130], index: 4, kind: input, shape index: {}]   ;;  %s7470_s5 = inlined_call_operand.vmem [shape: bf16[495,165], index: 5, kind: input, shape index: {}]   ;;  %s7471_s6 = inlined_call_operand.vmem [shape: f32[1,165], index: 6, kind: input, shape index: {}]   ;;  %s7472_s7 = inlined_call_operand.vmem [shape: bf16[10,11], index: 7, kind: input, shape index: {}]   ;;  %s7473_s8 = inlined_call_operand.vmem [shape: bf16[165,150], index: 8, kind: input, shape index: {}]   ;;  %s7474_s9 = inlined_call_operand.vmem [shape: bf16[5,75,128], index: 9, kind: input, shape index: {}]   ;;  %s7475_s10 = inlined_call_operand.vmem [shape: bf16[2,128,128], index: 10, kind: input, shape index: {}]   ;;  %s7476_s11 = inlined_call_operand.vmem [shape: f32[3,128], index: 11, kind: input, shape index: {}]   ;;  %s7477_s12 = inlined_call_operand.hbm [shape: f32[2,128], index: 12, kind: output, shape index: {}]  }
   0x1   :  { %v5368_v0 = vld [vmem:[%s7465_s0] sm:$0xff]  ;;  %v3581_v1 = vld [vmem:[%s7465_s0 + $0x8] sm:$0xf]  ;;  %v4903_v2 = vld [vmem:[%s7465_s0 + $0x8] sm:$0x30] }
   0x2   :  { %v5376_v3 = vor.u32 %v4903_v2, %v3581_v1  ;;  %57 = vrot.lane.b32.xlu0 %v5368_v0, %s5284_s27  ;;  %v67_v4 = vshrl.u32 %v5368_v0, 16  ;;  %v69_v5 = vshll.u32 %v5368_v0, 16  ;;  %v90_v6 = vrot.slane %v5368_v0, 1 }
   0x4   :  { %v74_v7 = vshll.u32 %v5376_v3, 16  ;;  %v5385_v8 = vrot.slane %v5376_v3, 1  ;;  %v71_v9 = vrot.slane %v69_v5, 1 }
   0x6   :  { %v5387_v10 = vrot.slane %v74_v7, 1  ;;  %v92_v11 = vsel %vm89_vm0, %v90_v6, %v5385_v8  ;;  %v72_v12 = vor.u32 %v71_v9, %v67_v4 }
   0x7   :  { %93 = vrot.lane.b32.xlu2 %v92_v11, %s5285_s28 }
   0x8   :  { %17 = vsyncpa [#allocation4], 0  ;;  %v5394_v13 = vsel %vm65_vm1, %v72_v12, %v5387_v10  ;;  %vm336_vm2 = vcmask 1044480   ;;  %s5286_s29 = smov 78   ;;  %v3641_v14 = vld [vmem:[%s7466_s1 + $0x70] sm:$0xf] }
   0x9   :  { %81 = vrot.lane.b32.xlu1 %v5394_v13, %s5286_s29  ;;  %v4919_v15 = vld [vmem:[%s7466_s1 + $0x74] sm:$0xf0]  ;;  %v4918_v16 = vld [vmem:[%s7466_s1 + $0x74] sm:$0xf]  ;;  %s5287_s18 = smov 50   ;;  %s5288_s14 = smov 53  }
   0xa   :  { %61 = vrot.lane.b32.xlu0 %v5368_v0, %s5287_s18  ;;  %v3642_v17 = vor.u32 %v4919_v15, %v3641_v14  ;;  %v3643_v18 = vld [vmem:[%s7466_s1 + $0x78] sm:$0xf0]  ;;  %v3633_v19 = vld [vmem:[%s7466_s1 + $0x60] sm:$0xf]  ;;  %v4917_v20 = vld [vmem:[%s7466_s1 + $0x64] sm:$0xf0] }
   0xb   :  { %v3646_v21 = vor.u32 %v4918_v16, %v3643_v18  ;;  %v4916_v22 = vld [vmem:[%s7466_s1 + $0x64] sm:$0xf]  ;;  %v3635_v23 = vld [vmem:[%s7466_s1 + $0x68] sm:$0xf0]  ;;  %v3697_v24 = vld [vmem:[%s7466_s1 + $0xe0] sm:$0xf]  ;;  %v3634_v25 = vor.u32 %v4917_v20, %v3633_v19 }
   0xc   :  { %343 = vmatpush.bf16.msra.mxu0 %v3642_v17  ;;  %v4933_v26 = vld [vmem:[%s7466_s1 + $0xe4] sm:$0x10]  ;;  %v4932_v27 = vld [vmem:[%s7466_s1 + $0xe4] sm:$0xf]  ;;  %v3699_v28 = vld [vmem:[%s7466_s1 + $0xe8] sm:$0x10]  ;;  %v3638_v29 = vor.u32 %v4916_v22, %v3635_v23 }
   0xd   :  { %381 = vmatpush.bf16.msra.mxu2 %v3646_v21  ;;  %v3698_v30 = vor.u32 %v4933_v26, %v3697_v24  ;;  %v3702_v31 = vor.u32 %v4932_v27, %v3699_v28  ;;  %v3625_v32 = vld [vmem:[%s7466_s1 + $0x50] sm:$0xf]  ;;  %v4915_v33 = vld [vmem:[%s7466_s1 + $0x54] sm:$0xf0]  ;;  %v4914_v34 = vld [vmem:[%s7466_s1 + $0x54] sm:$0xf] }
   0xe   :  { %v3627_v35 = vld [vmem:[%s7466_s1 + $0x58] sm:$0xf0]  ;;  %v3689_v36 = vld [vmem:[%s7466_s1 + $0xd0] sm:$0xf]  ;;  %v4931_v37 = vld [vmem:[%s7466_s1 + $0xd4] sm:$0xf0]  ;;  %v3626_v42 = vor.u32 %v4915_v33, %v3625_v32 }
   0xf   :  { %97 = vrot.lane.b32.xlu2 %v92_v11, %s5288_s14  ;;  %v338_v38 = vsel %vm336_vm2, %v3698_v30, 0  ;;  %v341_v39 = vsel %vm336_vm2, %v3702_v31, 0  ;;  %v4930_v40 = vld [vmem:[%s7466_s1 + $0xd4] sm:$0xf]  ;;  %v3691_v41 = vld [vmem:[%s7466_s1 + $0xd8] sm:$0xf0]  ;;  %v3690_v43 = vor.u32 %v4931_v37, %v3689_v36  ;;  %v3630_v44 = vor.u32 %v4914_v34, %v3627_v35 }
  0x10   :  { %344 = vmatpush.bf16.msra.mxu0 %v3634_v25  ;;  %363 = vmatpush.bf16.msra.mxu1 %v338_v38  ;;  %s5289_s26 = smov 103   ;;  %v3617_v45 = vld [vmem:[%s7466_s1 + $0x40] sm:$0xf]  ;;  %v4913_v46 = vld [vmem:[%s7466_s1 + $0x44] sm:$0xf0]  ;;  %v78_v47 = vshrl.u32 %v5376_v3, 16  ;;  %v3694_v48 = vor.u32 %v4930_v40, %v3691_v41 }
  0x11   :  { %85 = vrot.lane.b32.xlu1 %v5394_v13, %s5289_s26  ;;  %382 = vmatpush.bf16.msra.mxu2 %v3638_v29  ;;  %v4912_v49 = vld [vmem:[%s7466_s1 + $0x44] sm:$0xf]  ;;  %v3619_v50 = vld [vmem:[%s7466_s1 + $0x48] sm:$0xf0]  ;;  %v3618_v51 = vor.u32 %v4913_v46, %v3617_v45  ;;  %v3681_v54 = vld [vmem:[%s7466_s1 + $0xc0] sm:$0xf] }
  0x12   :  { %101 = vrot.lane.b32.xlu0 %v92_v11, %s5286_s29  ;;  %401 = vmatpush.bf16.msra.mxu3 %v341_v39  ;;  %v3622_v52 = vor.u32 %v4912_v49, %v3619_v50  ;;  %v5480_v53 = vor.u32 %v78_v47, %v5387_v10  ;;  %v4929_v55 = vld [vmem:[%s7466_s1 + $0xc4] sm:$0xf0]  ;;  %v4928_v56 = vld [vmem:[%s7466_s1 + $0xc4] sm:$0xf]  ;;  %v3683_v58 = vld [vmem:[%s7466_s1 + $0xc8] sm:$0xf0] }
  0x13   :  { %v3682_v57 = vor.u32 %v4929_v55, %v3681_v54  ;;  %v3609_v59 = vld [vmem:[%s7466_s1 + $0x30] sm:$0xf]  ;;  %v4911_v60 = vld [vmem:[%s7466_s1 + $0x34] sm:$0xf0]  ;;  %v3686_v61 = vor.u32 %v4928_v56, %v3683_v58  ;;  %v4910_v63 = vld [vmem:[%s7466_s1 + $0x34] sm:$0xf] }
  0x14   :  { %345 = vmatpush.bf16.msra.mxu0 %v3626_v42  ;;  %364 = vmatpush.bf16.msra.mxu1 %v3690_v43  ;;  %v3610_v62 = vor.u32 %v4911_v60, %v3609_v59  ;;  %v3611_v1 = vld [vmem:[%s7466_s1 + $0x38] sm:$0xf0]  ;;  %v3673_v4 = vld [vmem:[%s7466_s1 + $0xb0] sm:$0xf]  ;;  %v4927_v5 = vld [vmem:[%s7466_s1 + $0xb4] sm:$0xf0] }
  0x15   :  { %383 = vmatpush.bf16.msra.mxu2 %v3630_v44  ;;  %v3614_v2 = vor.u32 %v4910_v63, %v3611_v1  ;;  %v4926_v6 = vld [vmem:[%s7466_s1 + $0xb4] sm:$0xf]  ;;  %v3674_v7 = vor.u32 %v4927_v5, %v3673_v4  ;;  %v3601_v9 = vld [vmem:[%s7466_s1 + $0x20] sm:$0xf]  ;;  %v4909_v10 = vld [vmem:[%s7466_s1 + $0x24] sm:$0xf0] }
  0x16   :  { %402 = vmatpush.bf16.msra.mxu3 %v3694_v48  ;;  %v3602_v12 = vor.u32 %v4909_v10, %v3601_v9  ;;  %v4908_v14 = vld [vmem:[%s7466_s1 + $0x24] sm:$0xf]  ;;  %v3603_v15 = vld [vmem:[%s7466_s1 + $0x28] sm:$0xf0]  ;;  %v3665_v17 = vld [vmem:[%s7466_s1 + $0xa0] sm:$0xf] }
  0x17   :  { %63 = vrot.lane.b32.xlu2 %v5376_v3, %s5287_s18  ;;  %v3606_v16 = vor.u32 %v4908_v14, %v3603_v15  ;;  %v4925_v18 = vld [vmem:[%s7466_s1 + $0xa4] sm:$0xf0]  ;;  %v4924_v19 = vld [vmem:[%s7466_s1 + $0xa4] sm:$0xf]  ;;  %v3667_v21 = vld [vmem:[%s7466_s1 + $0xa8] sm:$0xf0] }
  0x18   :  { %346 = vmatpush.bf16.msra.mxu0 %v3618_v51  ;;  %365 = vmatpush.bf16.msra.mxu1 %v3682_v57  ;;  %v3666_v20 = vor.u32 %v4925_v18, %v3665_v17  ;;  %v3593_v22 = vld [vmem:[%s7466_s1 + $0x10] sm:$0xf]  ;;  %v3670_v23 = vor.u32 %v4924_v19, %v3667_v21  ;;  %v4907_v24 = vld [vmem:[%s7466_s1 + $0x14] sm:$0xf0]  ;;  %v4906_v25 = vld [vmem:[%s7466_s1 + $0x14] sm:$0xf] }
  0x19   :  { %59 = vrot.lane.b32.xlu1 %v5376_v3, %s5284_s27  ;;  %384 = vmatpush.bf16.msra.mxu2 %v3622_v52  ;;  %v3595_v26 = vld [vmem:[%s7466_s1 + $0x18] sm:$0xf0]  ;;  %v3594_v27 = vor.u32 %v4907_v24, %v3593_v22  ;;  %v3657_v29 = vld [vmem:[%s7466_s1 + $0x90] sm:$0xf]  ;;  %v4923_v30 = vld [vmem:[%s7466_s1 + $0x94] sm:$0xf0] }
  0x1a   :  { %83 = vrot.lane.b32.xlu0 %v5480_v53, %s5286_s29  ;;  %403 = vmatpush.bf16.msra.mxu3 %v3686_v61  ;;  %v3598_v28 = vor.u32 %v4906_v25, %v3595_v26  ;;  %v4922_v31 = vld [vmem:[%s7466_s1 + $0x94] sm:$0xf]  ;;  %v3658_v32 = vor.u32 %v4923_v30, %v3657_v29  ;;  %v3659_v33 = vld [vmem:[%s7466_s1 + $0x98] sm:$0xf0]  ;;  %v3585_v34 = vld [vmem:[%s7466_s1] sm:$0xf] }
  0x1b   :  { %v4905_v35 = vld [vmem:[%s7466_s1 + $0x4] sm:$0xf0]  ;;  %v3662_v36 = vor.u32 %v4922_v31, %v3659_v33  ;;  %v4904_v38 = vld [vmem:[%s7466_s1 + $0x4] sm:$0xf]  ;;  %v3587_v39 = vld [vmem:[%s7466_s1 + $0x8] sm:$0xf0] }
  0x1c   :  { %347 = vmatpush.bf16.msra.mxu0 %v3610_v62  ;;  %366 = vmatpush.bf16.msra.mxu1 %v3674_v7  ;;  %v3586_v37 = vor.u32 %v4905_v35, %v3585_v34  ;;  %v3590_v40 = vor.u32 %v4904_v38, %v3587_v39  ;;  %v3649_v41 = vld [vmem:[%s7466_s1 + $0x80] sm:$0xf]  ;;  %v4921_v42 = vld [vmem:[%s7466_s1 + $0x84] sm:$0xf0]  ;;  %v4920_v43 = vld [vmem:[%s7466_s1 + $0x84] sm:$0xf] }
  0x1d   :  { %385 = vmatpush.bf16.msra.mxu2 %v3614_v2  ;;  %v3650_v44 = vor.u32 %v4921_v42, %v3649_v41  ;;  %v3651_v45 = vld [vmem:[%s7466_s1 + $0x88] sm:$0xf0]  ;;  %vm105_vm3 = vcmask 211968   ;;  %vm7489_vm4 = vcmask 424960   ;;  %vm7488_vm5 = vcmask 637952   ;;  %s5290_s24 = smov 63  }
  0x1e   :  { %v3654_v46 = vor.u32 %v4920_v43, %v3651_v45  ;;  %vm127_vm6 = vcmask 15360   ;;  %vm7487_vm7 = vcmask 850944   ;;  %vm132_vm8 = vcmask 228352   ;;  %v177_v22 = vld [vmem:[%s7467_s2] sm:$0x3]  ;;  %s7484_s20 = smov 100  }
  0x1f   :  { %95 = vrot.lane.b32.xlu2 %v5385_v8, %s5285_s28  ;;  %vm137_vm9 = vcmask 441344   ;;  %vm142_vm10 = vcmask 654336   ;;  %vm7492_vm11 = vcmask 867328   ;;  %v179_v25 = vperm.slane %v177_v22, 0  ;;  %s7482_s21 = smov 37   ;;  %s7479_s22 = smov 9  }
  0x20   :  { %348 = vmatpush.bf16.msra.mxu0 %v3602_v12  ;;  %367 = vmatpush.bf16.msra.mxu1 %v3666_v20  ;;  %v180_v34 = vperm.slane %v177_v22, 1  ;;  %v4944_v22 = vld [vmem:[%s7469_s4 + $0x44] sm:$0xf]  ;;  %vm7486_vm12 = vcmask 1040384   ;;  %vm501_vm13 = vcmask 1042432   ;;  %vm7485_vm14 = vcmask 515072  }
  0x21   :  { %87 = vrot.lane.b32.xlu1 %v5480_v53, %s5289_s26  ;;  %386 = vmatpush.bf16.msra.mxu2 %v3606_v16  ;;  %s7483_s23 = smov 87   ;;  %s7481_s25 = smov 74   ;;  %vm1147_vm15 = vcmask 1047552  }
  0x22   :  { %99 = vrot.lane.b32.xlu0 %v5385_v8, %s5288_s14  ;;  %s7478_s30 = smov 46   ;;  %s7480_s13 = smov 124  }
  0x23   :  { %s7512_s19 = smov 74  }
  0x24   :  { %349 = vmatpush.bf16.msra.mxu0 %v3594_v27  ;;  %368 = vmatpush.bf16.msra.mxu1 %v3658_v32 }
  0x25   :  { %387 = vmatpush.bf16.msra.mxu2 %v3598_v28 }
  0x28   :  { %350 = vmatpush.bf16.msra.mxu0 %v3586_v37  ;;  %369 = vmatpush.bf16.msra.mxu1 %v3650_v44 }
  0x29   :  { %103 = vrot.lane.b32.xlu1 %v5385_v8, %s5286_s29  ;;  %v3675_v8 = vld [vmem:[%s7466_s1 + $0xb8] sm:$0xf0]  ;;  %388 = vmatpush.bf16.msra.mxu2 %v3590_v40 }
  0x2a   :  { %v3678_v11 = vor.u32 %v4926_v6, %v3675_v8 }
  0x2c   :  { %404 = vmatpush.bf16.msra.mxu3 %v3678_v11 }
  0x30   :  { %405 = vmatpush.bf16.msra.mxu3 %v3670_v23 }
  0x34   :  { %406 = vmatpush.bf16.msra.mxu3 %v3662_v36 }
  0x38   :  { %407 = vmatpush.bf16.msra.mxu3 %v3654_v46 }
  0x61   :  { %v94_v48 = vpop.permute.xlu2 %93 }
  0x69   :  { %v98_v54 = vpop.permute.xlu2 %97 }
  0x71   :  { %v64_v63 = vpop.permute.xlu2 %63 }
  0x74   :  { %v58_v47 = vpop.permute.xlu0 %57 }
  0x75   :  { %v107_v51 = vsel %vm105_vm3, %v5368_v0, %v58_v47 }
  0x79   :  { %v96_v8 = vpop.permute.xlu2 %95 }
  0x7b   :  { %v82_v49 = vpop.permute.xlu1 %81 }
  0x7c   :  { %v62_v50 = vpop.permute.xlu0 %61 }
  0x7d   :  { %v112_v52 = vsel %vm7489_vm4, %v107_v51, %v62_v50 }
  0x7e   :  { %v117_v56 = vsel %vm7488_vm5, %v112_v52, %v82_v49 }
  0x83   :  { %v86_v55 = vpop.permute.xlu1 %85 }
  0x84   :  { %v129_v57 = vsel %vm127_vm6, %v86_v55, %v5394_v13  ;;  %v102_v58 = vpop.permute.xlu0 %101  ;;  %v122_v59 = vsel %vm7487_vm7, %v117_v56, %v86_v55 }
  0x85   :  { %v134_v0 = vsel %vm132_vm8, %v129_v57, %v94_v48  ;;  %351 = vmatmul.bf16.vlgmr.msra.gmra.mxu0 %v122_v59  ;;  %389 = vmatmul.bf16.vlgmr.msra.gmra.mxu2 %v122_v59  ;;  %v4934_v59 = vld [vmem:[%s7468_s3] sm:$0xff] }
  0x86   :  { %v139_v60 = vsel %vm137_vm9, %v134_v0, %v98_v54 }
  0x87   :  { %v144_v61 = vsel %vm142_vm10, %v139_v60, %v102_v58 }
  0x88   :  { %3703 = vmatmul.msk.bf16.vlgmr.msra.gmra.mxu1 %vm7492_vm11, %v144_v61  ;;  %3705 = vmatmul.msk.bf16.vlgmr.msra.gmra.mxu3 %vm7492_vm11, %v144_v61 }
  0x8b   :  { %v60_v62 = vpop.permute.xlu1 %59 }
  0x8c   :  { %v109_v13 = vsel %vm105_vm3, %v5376_v3, %v60_v62  ;;  %v84_v1 = vpop.permute.xlu0 %83 }
  0x8d   :  { %v114_v2 = vsel %vm7489_vm4, %v109_v13, %v64_v63  ;;  %v3713_v63 = vld [vmem:[%s7468_s3 + $0x8] sm:$0xf]  ;;  %v4935_v13 = vld [vmem:[%s7468_s3 + $0x8] sm:$0x10]  ;;  %vm757_vm4 = vcmask 605184  }
  0x8e   :  { %v119_v4 = vsel %vm7488_vm5, %v114_v2, %v84_v1  ;;  %v3714_v1 = vor.u32 %v4935_v13, %v3713_v63  ;;  %v3777_v2 = vld [vmem:[%s7469_s4 + $0x70] sm:$0xf]  ;;  %vm754_vm5 = vcmask 154624  }
  0x93   :  { %v88_v5 = vpop.permute.xlu1 %87 }
  0x94   :  { %v125_v6 = vsel %vm7487_vm7, %v119_v4, %v88_v5  ;;  %v131_v7 = vsel %vm127_vm6, %v88_v5, %v5480_v53  ;;  %v100_v10 = vpop.permute.xlu0 %99  ;;  %v4951_v4 = vld [vmem:[%s7469_s4 + $0x74] sm:$0xf0]  ;;  %v4950_v5 = vld [vmem:[%s7469_s4 + $0x74] sm:$0xf]  ;;  %vm750_vm7 = vcmask 752640  }
  0x95   :  { %356 = vmatmul.bf16.gmra.mxu0 %v125_v6  ;;  %394 = vmatmul.bf16.gmra.mxu2 %v125_v6  ;;  %v136_v9 = vsel %vm132_vm8, %v131_v7, %v96_v8  ;;  %v3778_v6 = vor.u32 %v4951_v4, %v3777_v2  ;;  %v3779_v7 = vld [vmem:[%s7469_s4 + $0x78] sm:$0xf0] }
  0x96   :  { %v141_v11 = vsel %vm137_vm9, %v136_v9, %v100_v10  ;;  %v3782_v8 = vor.u32 %v4950_v5, %v3779_v7  ;;  %v3769_v9 = vld [vmem:[%s7469_s4 + $0x60] sm:$0xf]  ;;  %v4949_v10 = vld [vmem:[%s7469_s4 + $0x64] sm:$0xf0] }
  0x97   :  { %634 = vmatpush.bf16.msrb.mxu0 %v3778_v6 }
  0x9b   :  { %v104_v3 = vpop.permute.xlu1 %103 }
  0x9c   :  { %v146_v12 = vsel %vm142_vm10, %v141_v11, %v104_v3  ;;  %v4948_v11 = vld [vmem:[%s7469_s4 + $0x64] sm:$0xf]  ;;  %v3770_v3 = vor.u32 %v4949_v10, %v3769_v9 }
  0x9d   :  { %3704 = vmatmul.msk.bf16.gmra.mxu1 %vm7492_vm11, %v146_v12  ;;  %3706 = vmatmul.msk.bf16.gmra.mxu3 %vm7492_vm11, %v146_v12  ;;  %v3771_v12 = vld [vmem:[%s7469_s4 + $0x68] sm:$0xf0]  ;;  %vm7493_vm11 = vcmask 908288  }
  0x9e   :  { %635 = vmatpush.bf16.msrb.mxu0 %v3770_v3 }
 0x102   :  { %v352_v14 = vpop.f32.mrf.mxu0 }
 0x103   :  { %v353_v32 = vadd.f32 %v352_v14, %v179_v25  ;;  %v3774_v14 = vor.u32 %v4948_v11, %v3771_v12 }
 0x105   :  { %v371_v15 = vpop.f32.mrf.mxu1 }
 0x106   :  { %v372_v41 = vadd.f32 %v371_v15, %v353_v32  ;;  %v3761_v15 = vld [vmem:[%s7469_s4 + $0x50] sm:$0xf]  ;;  %v3737_v32 = vld [vmem:[%s7469_s4 + $0x20] sm:$0xf] }
 0x108   :  { %v390_v16 = vpop.f32.mrf.mxu2  ;;  %v419_v51 = vmax.f32 %v372_v41, 0.0 }
 0x109   :  { %v391_v46 = vadd.f32 %v390_v16, %v180_v34  ;;  %v4947_v16 = vld [vmem:[%s7469_s4 + $0x54] sm:$0xf0] }
 0x10a   :  { %v354_v17 = vpop.f32.mrf.mxu0 }
 0x10b   :  { %v409_v53 = vpop.f32.mrf.mxu3  ;;  %v355_v28 = vadd.f32 %v354_v17, %v179_v25  ;;  %v4946_v17 = vld [vmem:[%s7469_s4 + $0x54] sm:$0xf] }
 0x10c   :  { %v410_v56 = vadd.f32 %v409_v53, %v391_v46  ;;  %v3762_v53 = vor.u32 %v4947_v16, %v3761_v15  ;;  %v4936_v46 = vld [vmem:[%s7469_s4 + $0x4] sm:$0xf] }
 0x10d   :  { %v373_v19 = vpop.f32.mrf.mxu1 }
 0x10e   :  { %v374_v36 = vadd.f32 %v373_v19, %v355_v28  ;;  %v420_v61 = vmax.f32 %v410_v56, 0.0  ;;  %636 = vmatpush.bf16.msrb.mxu0 %v3762_v53  ;;  %v4942_v28 = vld [vmem:[%s7469_s4 + $0x34] sm:$0xf] }
 0x110   :  { %v392_v18 = vpop.f32.mrf.mxu2  ;;  %v421_v47 = vmax.f32 %v374_v36, 0.0  ;;  %v3739_v36 = vld [vmem:[%s7469_s4 + $0x28] sm:$0xf0] }
 0x111   :  { %v393_v42 = vadd.f32 %v392_v18, %v180_v34  ;;  %v3763_v18 = vld [vmem:[%s7469_s4 + $0x58] sm:$0xf0] }
 0x112   :  { %v357_v20 = vpop.f32.mrf.mxu0  ;;  %v427_v57 = vpack.c.bf16 %v421_v47, %v419_v51  ;;  %v3766_v19 = vor.u32 %v4946_v17, %v3763_v18  ;;  %v538_v51 = vld [vmem:[%s7469_s4 + $0x80] sm:$0x11] }
 0x113   :  { %v411_v21 = vpop.f32.mrf.mxu3  ;;  %v358_v27 = vadd.f32 %v357_v20, %v179_v25  ;;  %v3753_v20 = vld [vmem:[%s7469_s4 + $0x40] sm:$0xf]  ;;  %v589_v56 = vunpack.c.h.b16 %v538_v51 }
 0x114   :  { %v412_v52 = vadd.f32 %v411_v21, %v393_v42  ;;  %v4945_v21 = vld [vmem:[%s7469_s4 + $0x44] sm:$0xf0]  ;;  %v3731_v42 = vld [vmem:[%s7469_s4 + $0x18] sm:$0xf0] }
 0x116   :  { %v422_v0 = vmax.f32 %v412_v52, 0.0  ;;  %v588_v52 = vunpack.c.l.b16 %v538_v51  ;;  %v3971_v51 = vld [vmem:[%s7470_s5 + $0x170] sm:$0xf] }
 0x118   :  { %v395_v23 = vpop.f32.mrf.mxu2  ;;  %v428_v62 = vpack.c.bf16 %v422_v0, %v420_v61 }
 0x119   :  { %v396_v38 = vadd.f32 %v395_v23, %v180_v34  ;;  %v3754_v23 = vor.u32 %v4945_v21, %v3753_v20 }
 0x11a   :  { %v376_v24 = vpop.f32.mrf.mxu1  ;;  %v359_v26 = vpop.f32.mrf.mxu0 }
 0x11b   :  { %v360_v30 = vadd.f32 %v359_v26, %v179_v25  ;;  %v377_v31 = vadd.f32 %v376_v24, %v358_v27  ;;  %v3755_v24 = vld [vmem:[%s7469_s4 + $0x48] sm:$0xf0]  ;;  %637 = vmatpush.bf16.msrb.mxu0 %v3754_v23  ;;  %v3745_v26 = vld [vmem:[%s7469_s4 + $0x30] sm:$0xf]  ;;  %v4943_v27 = vld [vmem:[%s7469_s4 + $0x34] sm:$0xf0] }
 0x11c   :  { %v3758_v25 = vor.u32 %v4944_v22, %v3755_v24 }
 0x11d   :  { %v423_v39 = vmax.f32 %v377_v31, 0.0 }
 0x120   :  { %v414_v29 = vpop.f32.mrf.mxu3  ;;  %v397_v37 = vpop.f32.mrf.mxu2 }
 0x121   :  { %v398_v43 = vadd.f32 %v397_v37, %v180_v34  ;;  %v415_v44 = vadd.f32 %v414_v29, %v396_v38  ;;  %v3746_v29 = vor.u32 %v4943_v27, %v3745_v26  ;;  %v4940_v34 = vld [vmem:[%s7469_s4 + $0x24] sm:$0xf]  ;;  %v3729_v38 = vld [vmem:[%s7469_s4 + $0x10] sm:$0xf] }
 0x122   :  { %v378_v33 = vpop.f32.mrf.mxu1  ;;  %v3742_v37 = vor.u32 %v4940_v34, %v3739_v36  ;;  %v3843_v34 = vld [vmem:[%s7470_s5 + $0x70] sm:$0xf]  ;;  %v3835_v36 = vld [vmem:[%s7470_s5 + $0x60] sm:$0xf] }
 0x123   :  { %v379_v35 = vadd.f32 %v378_v33, %v360_v30  ;;  %v424_v54 = vmax.f32 %v415_v44, 0.0  ;;  %v3747_v30 = vld [vmem:[%s7469_s4 + $0x38] sm:$0xf0]  ;;  %638 = vmatpush.bf16.msrb.mxu0 %v3746_v29  ;;  %v4941_v33 = vld [vmem:[%s7469_s4 + $0x24] sm:$0xf0] }
 0x124   :  { %v3750_v31 = vor.u32 %v4942_v28, %v3747_v30  ;;  %v3721_v44 = vld [vmem:[%s7469_s4] sm:$0xf] }
 0x125   :  { %v425_v40 = vmax.f32 %v379_v35, 0.0  ;;  %v3738_v35 = vor.u32 %v4941_v33, %v3737_v32 }
 0x127   :  { %v429_v45 = vpack.c.bf16 %v425_v40, %v423_v39  ;;  %639 = vmatpush.bf16.msrb.mxu0 %v3738_v35  ;;  %v4939_v39 = vld [vmem:[%s7469_s4 + $0x14] sm:$0xf0]  ;;  %v4938_v40 = vld [vmem:[%s7469_s4 + $0x14] sm:$0xf] }
 0x128   :  { %v416_v48 = vpop.f32.mrf.mxu3  ;;  %v3730_v41 = vor.u32 %v4939_v39, %v3729_v38  ;;  %v4967_v35 = vld [vmem:[%s7470_s5 + $0x74] sm:$0xf0]  ;;  %v4965_v39 = vld [vmem:[%s7470_s5 + $0x64] sm:$0xf0] }
 0x129   :  { %v417_v49 = vadd.f32 %v416_v48, %v398_v43  ;;  %v452_v50 = vsel %vm336_vm2, %v429_v45, 0  ;;  %v3734_v43 = vor.u32 %v4938_v40, %v3731_v42  ;;  %v4937_v45 = vld [vmem:[%s7469_s4 + $0x4] sm:$0xf0]  ;;  %v3723_v48 = vld [vmem:[%s7469_s4 + $0x8] sm:$0xf0]  ;;  %v3844_v38 = vor.u32 %v4967_v35, %v3843_v34 }
 0x12a   :  { %463 = vmatpush.bf16.msrb.mxu1 %v452_v50  ;;  %v3722_v47 = vor.u32 %v4937_v45, %v3721_v44  ;;  %v3907_v40 = vld [vmem:[%s7470_s5 + $0xf0] sm:$0xf]  ;;  %v3836_v44 = vor.u32 %v4965_v39, %v3835_v36  ;;  %v4027_v34 = vld [vmem:[%s7470_s5 + $0x1e0] sm:$0xf]  ;;  %v5013_v36 = vld [vmem:[%s7470_s5 + $0x1e4] sm:$0xf0] }
 0x12b   :  { %v426_v55 = vmax.f32 %v417_v49, 0.0  ;;  %640 = vmatpush.bf16.msrb.mxu0 %v3730_v41  ;;  %v3726_v49 = vor.u32 %v4936_v46, %v3723_v48  ;;  %v4983_v41 = vld [vmem:[%s7470_s5 + $0xf4] sm:$0xf0]  ;;  %v3827_v45 = vld [vmem:[%s7470_s5 + $0x50] sm:$0xf]  ;;  %v4028_v39 = vor.u32 %v5013_v36, %v4027_v34 }
 0x12c   :  { %v3908_v42 = vor.u32 %v4983_v41, %v3907_v40  ;;  %v4981_v46 = vld [vmem:[%s7470_s5 + $0xe4] sm:$0xf0]  ;;  %v3973_v36 = vld [vmem:[%s7470_s5 + $0x178] sm:$0xf0] }
 0x12d   :  { %v430_v58 = vpack.c.bf16 %v426_v55, %v424_v54  ;;  %v606_v54 = vpack.c.b16 %v588_v52, %v588_v52  ;;  %v4999_v52 = vld [vmem:[%s7470_s5 + $0x174] sm:$0xf0] }
 0x12e   :  { %464 = vmatpush.bf16.msrb.mxu1 %v427_v57 }
 0x12f   :  { %v455_v60 = vsel %vm336_vm2, %v430_v58, 0  ;;  %641 = vmatpush.bf16.msrb.mxu0 %v3722_v47  ;;  %v629_v57 = vsel %vm7486_vm12, %v606_v54, 0  ;;  %v607_v58 = vpack.c.b16 %v589_v56, %v589_v56  ;;  %v3972_v56 = vor.u32 %v4999_v52, %v3971_v51  ;;  %v4991_v51 = vld [vmem:[%s7470_s5 + $0x134] sm:$0xf0] }
 0x130   :  { %482 = vmatpush.bf16.msrb.mxu3 %v455_v60  ;;  %655 = vmatpush.bf16.msrb.mxu2 %v629_v57  ;;  %v3891_v57 = vld [vmem:[%s7470_s5 + $0xd0] sm:$0xf] }
 0x131   :  { %3715 = vmatmul.msk.bf16.vlgmr.msrb.gmra.mxu1 %vm105_vm3, %v4934_v59  ;;  %v632_v0 = vsel %vm7486_vm12, %v607_v58, 0  ;;  %v4979_v58 = vld [vmem:[%s7470_s5 + $0xd4] sm:$0xf0]  ;;  %vm747_vm12 = vcmask 302080  }
 0x132   :  { %662 = vmatpush.bf16.msra.mxu1 %v3782_v8 }
 0x133   :  { %683 = vmatpush.bf16.msra.mxu0 %v632_v0  ;;  %v4997_v0 = vld [vmem:[%s7470_s5 + $0x164] sm:$0xf0] }
 0x134   :  { %483 = vmatpush.bf16.msrb.mxu3 %v428_v62  ;;  %1170 = vmatpush.bf16.msra.mxu2 %v3908_v42  ;;  %v3867_v42 = vld [vmem:[%s7470_s5 + $0xa0] sm:$0xf] }
 0x136   :  { %663 = vmatpush.bf16.msra.mxu1 %v3774_v14 }
 0x137   :  { %3717 = vmatmul.msk.bf16.vlgmr.msrb.gmra.mxu3 %vm105_vm3, %v4934_v59 }
 0x138   :  { %1156 = vmatpush.bf16.msra.mxu3 %v3844_v38  ;;  %v4993_v38 = vld [vmem:[%s7470_s5 + $0x144] sm:$0xf0] }
 0x13a   :  { %664 = vmatpush.bf16.msra.mxu1 %v3766_v19 }
 0x13c   :  { %1157 = vmatpush.bf16.msra.mxu3 %v3836_v44 }
 0x13e   :  { %665 = vmatpush.bf16.msra.mxu1 %v3758_v25 }
 0x141   :  { %3716 = vmatmul.msk.bf16.gmra.mxu1 %vm105_vm3, %v3714_v1 }
 0x142   :  { %666 = vmatpush.bf16.msra.mxu1 %v3750_v31 }
 0x146   :  { %667 = vmatpush.bf16.msra.mxu1 %v3742_v37 }
 0x147   :  { %3718 = vmatmul.msk.bf16.gmra.mxu3 %vm105_vm3, %v3714_v1 }
 0x14a   :  { %668 = vmatpush.bf16.msra.mxu1 %v3734_v43  ;;  %v3899_v43 = vld [vmem:[%s7470_s5 + $0xe0] sm:$0xf] }
 0x14e   :  { %669 = vmatpush.bf16.msra.mxu1 %v3726_v49  ;;  %v4963_v49 = vld [vmem:[%s7470_s5 + $0x54] sm:$0xf0] }
 0x1ae   :  { %v466_v50 = vpop.f32.mrf.mxu1 }
 0x1b6   :  { %v468_v55 = vpop.f32.mrf.mxu1 }
 0x1b7   :  { %v502_v63 = vrot.slane %v468_v55, 5 }
 0x1ba   :  { %v485_v59 = vpop.f32.mrf.mxu3 }
 0x1be   :  { %v471_v60 = vpop.f32.mrf.mxu1 }
 0x1bf   :  { %v503_v62 = vrot.slane %v471_v60, 5 }
 0x1c1   :  { %v504_v1 = vsel %vm501_vm13, %v502_v63, %v503_v62 }
 0x1c2   :  { %v487_v61 = vpop.f32.mrf.mxu3  ;;  %v516_v6 = vmax.f32 %v466_v50, %v504_v1  ;;  %v3900_v50 = vor.u32 %v4981_v46, %v3899_v43  ;;  %v3819_v1 = vld [vmem:[%s7470_s5 + $0x40] sm:$0xf]  ;;  %v4973_v43 = vld [vmem:[%s7470_s5 + $0xa4] sm:$0xf0] }
 0x1c3   :  { %v505_v10 = vrot.slane %v487_v61, 5  ;;  %v3868_v44 = vor.u32 %v4973_v43, %v3867_v42  ;;  %v4953_v46 = vld [vmem:[%s7470_s5 + $0x4] sm:$0xf0]  ;;  %v3893_v42 = vld [vmem:[%s7470_s5 + $0xd8] sm:$0xf0] }
 0x1c4   :  { %1171 = vmatpush.bf16.msra.mxu2 %v3900_v50  ;;  %v3939_v50 = vld [vmem:[%s7470_s5 + $0x130] sm:$0xf]  ;;  %v4958_v43 = vld [vmem:[%s7470_s5 + $0x34] sm:$0xf] }
 0x1c6   :  { %v473_v13 = vpop.f32.mrf.mxu1 }
 0x1c7   :  { %v508_v2 = vrot.slane %v473_v13, 5 }
 0x1c9   :  { %v509_v4 = vsel %vm501_vm13, %v503_v62, %v508_v2  ;;  %v4961_v2 = vld [vmem:[%s7470_s5 + $0x44] sm:$0xf0] }
 0x1ca   :  { %v490_v5 = vpop.f32.mrf.mxu3  ;;  %v518_v7 = vmax.f32 %v468_v55, %v509_v4  ;;  %v3892_v4 = vor.u32 %v4979_v58, %v3891_v57  ;;  %v3859_v57 = vld [vmem:[%s7470_s5 + $0x90] sm:$0xf] }
 0x1cb   :  { %v506_v9 = vrot.slane %v490_v5, 5 }
 0x1cc   :  { %v520_v8 = vpack.c.bf16 %v518_v7, %v516_v6  ;;  %v3820_v6 = vor.u32 %v4961_v2, %v3819_v1  ;;  %1172 = vmatpush.bf16.msra.mxu2 %v3892_v4  ;;  %v4964_v1 = vld [vmem:[%s7470_s5 + $0x64] sm:$0xf]  ;;  %v3837_v4 = vld [vmem:[%s7470_s5 + $0x68] sm:$0xf0] }
 0x1cd   :  { %v507_v3 = vsel %vm501_vm13, %v505_v10, %v506_v9  ;;  %v4959_v10 = vld [vmem:[%s7470_s5 + $0x34] sm:$0xf0] }
 0x1ce   :  { %642 = vmatmul.bf16.vlgmr.msrb.gmra.mxu0 %v520_v8  ;;  %670 = vmatmul.bf16.vlgmr.msra.gmra.mxu1 %v520_v8  ;;  %v517_v15 = vmax.f32 %v485_v59, %v507_v3  ;;  %v3963_v59 = vld [vmem:[%s7470_s5 + $0x160] sm:$0xf] }
 0x1cf   :  { %1184 = vmatpush.bf16.msrb.mxu0 %v3972_v56  ;;  %v3964_v62 = vor.u32 %v4997_v0, %v3963_v59  ;;  %v3845_v56 = vld [vmem:[%s7470_s5 + $0x78] sm:$0xf0]  ;;  %v4971_v59 = vld [vmem:[%s7470_s5 + $0x94] sm:$0xf0]  ;;  %v4011_v0 = vld [vmem:[%s7470_s5 + $0x1c0] sm:$0xf] }
 0x1d2   :  { %v492_v11 = vpop.f32.mrf.mxu3 }
 0x1d3   :  { %v510_v12 = vrot.slane %v492_v11, 5  ;;  %1185 = vmatpush.bf16.msrb.mxu0 %v3964_v62 }
 0x1d5   :  { %v511_v14 = vsel %vm501_vm13, %v506_v9, %v510_v12  ;;  %v3811_v9 = vld [vmem:[%s7470_s5 + $0x30] sm:$0xf] }
 0x1d6   :  { %v519_v16 = vmax.f32 %v487_v61, %v511_v14  ;;  %v3828_v61 = vor.u32 %v4963_v49, %v3827_v45  ;;  %v3812_v3 = vor.u32 %v4959_v10, %v3811_v9  ;;  %v3787_v45 = vld [vmem:[%s7470_s5] sm:$0xf]  ;;  %v5011_v49 = vld [vmem:[%s7470_s5 + $0x1d4] sm:$0xf0]  ;;  %v4003_v9 = vld [vmem:[%s7470_s5 + $0x1b0] sm:$0xf] }
 0x1d7   :  { %v5007_v10 = vld [vmem:[%s7470_s5 + $0x1b4] sm:$0xf0] }
 0x1d8   :  { %v521_v17 = vpack.c.bf16 %v519_v16, %v517_v15  ;;  %1158 = vmatpush.bf16.msra.mxu3 %v3828_v61  ;;  %v3860_v61 = vor.u32 %v4971_v59, %v3859_v57  ;;  %v4956_v59 = vld [vmem:[%s7470_s5 + $0x24] sm:$0xf] }
 0x1da   :  { %3783 = vmatmul.msk.bf16.vlgmr.msrb.gmra.mxu2 %vm127_vm6, %v521_v17 }
 0x1dc   :  { %1159 = vmatpush.bf16.msra.mxu3 %v3820_v6  ;;  %v3851_v6 = vld [vmem:[%s7470_s5 + $0x80] sm:$0xf] }
 0x1de   :  { %3784 = vmatmul.msk.bf16.vlgmr.msra.gmra.mxu0 %vm127_vm6, %v521_v17 }
 0x1e0   :  { %1160 = vmatpush.bf16.msra.mxu3 %v3812_v3  ;;  %v4982_v3 = vld [vmem:[%s7470_s5 + $0xf4] sm:$0xf] }
 0x24b   :  { %v643_v53 = vpop.f32.mrf.mxu0  ;;  %v671_v19 = vpop.f32.mrf.mxu1 }
 0x253   :  { %v645_v18 = vpop.f32.mrf.mxu0  ;;  %v673_v26 = vpop.f32.mrf.mxu1 }
 0x25b   :  { %v685_v20 = vpop.f32.mrf.mxu0 }
 0x25c   :  { %v686_v22 = vadd.f32 %v685_v20, %v671_v19  ;;  %v3883_v20 = vld [vmem:[%s7470_s5 + $0xc0] sm:$0xf] }
 0x25d   :  { %v657_v21 = vpop.f32.mrf.mxu2 }
 0x25e   :  { %v658_v23 = vadd.f32 %v657_v21, %v643_v53  ;;  %v5298_v53 = vmov 65535   ;;  %v4977_v21 = vld [vmem:[%s7470_s5 + $0xc4] sm:$0xf0] }
 0x260   :  { %v5225_v24 = vpack.i.bf16 %v686_v22, %v658_v23  ;;  %v3884_v22 = vor.u32 %v4977_v21, %v3883_v20  ;;  %v4962_v20 = vld [vmem:[%s7470_s5 + $0x54] sm:$0xf]  ;;  %v3829_v21 = vld [vmem:[%s7470_s5 + $0x58] sm:$0xf0] }
 0x262   :  { %5226 = vrot.lane.b32.xlu2 %v5225_v24, %s5290_s24  ;;  %v4957_v24 = vld [vmem:[%s7470_s5 + $0x24] sm:$0xf0]  ;;  %1173 = vmatpush.bf16.msra.mxu2 %v3884_v22  ;;  %v3995_v22 = vld [vmem:[%s7470_s5 + $0x1a0] sm:$0xf] }
 0x263   :  { %v687_v25 = vpop.f32.mrf.mxu0 }
 0x264   :  { %v688_v28 = vadd.f32 %v687_v25, %v673_v26  ;;  %v3955_v25 = vld [vmem:[%s7470_s5 + $0x150] sm:$0xf] }
 0x265   :  { %v659_v27 = vpop.f32.mrf.mxu2 }
 0x266   :  { %v660_v29 = vadd.f32 %v659_v27, %v645_v18  ;;  %v1148_v18 = vsel %vm89_vm0, 4294967295, %v5298_v53  ;;  %v4995_v27 = vld [vmem:[%s7470_s5 + $0x154] sm:$0xf0] }
 0x267   :  { %v5834_v19 = vsel %vm1147_vm15, %v1148_v18, 0  ;;  %vm7490_vm15 = vcmask 449536  }
 0x268   :  { %v5230_v30 = vpack.i.bf16 %v688_v28, %v660_v29  ;;  %v3875_v28 = vld [vmem:[%s7470_s5 + $0xb0] sm:$0xf]  ;;  %v1151_v41 = vand.u32 %v4028_v39, %v5834_v19  ;;  %v5003_v39 = vld [vmem:[%s7470_s5 + $0x194] sm:$0xf0] }
 0x26a   :  { %5231 = vrot.lane.b32.xlu0 %v5230_v30, %s5290_s24  ;;  %v3956_v30 = vor.u32 %v4995_v27, %v3955_v25  ;;  %1199 = vmatpush.bf16.msrb.mxu1 %v1151_v41  ;;  %v4980_v25 = vld [vmem:[%s7470_s5 + $0xe4] sm:$0xf] }
 0x26c   :  { %1186 = vmatpush.bf16.msrb.mxu0 %v3956_v30  ;;  %v4985_v30 = vld [vmem:[%s7470_s5 + $0x104] sm:$0xf0] }
 0x2bc   :  { %v5227_v31 = vpop.permute.xlu2 %5226 }
 0x2bd   :  { %v5229_v32 = vunpack.i.h.bf16 %v5227_v31  ;;  %v5228_v33 = vunpack.i.l.bf16 %v5227_v31 }
 0x2bf   :  { %v703_v37 = vsel %vm7485_vm14, %v5228_v33, %v5229_v32  ;;  %v3795_v32 = vld [vmem:[%s7470_s5 + $0x10] sm:$0xf]  ;;  %v4955_v33 = vld [vmem:[%s7470_s5 + $0x14] sm:$0xf0] }
 0x2c0   :  { %v707_v47 = vmax.f32 %v658_v23, %v703_v37  ;;  %v3803_v23 = vld [vmem:[%s7470_s5 + $0x20] sm:$0xf]  ;;  %v3796_v35 = vor.u32 %v4955_v33, %v3795_v32  ;;  %v3821_v33 = vld [vmem:[%s7470_s5 + $0x48] sm:$0xf0] }
 0x2c1   :  { %v3804_v26 = vor.u32 %v4957_v24, %v3803_v23  ;;  %v3947_v37 = vld [vmem:[%s7470_s5 + $0x140] sm:$0xf]  ;;  %v3832_v23 = vor.u32 %v4962_v20, %v3829_v21  ;;  %v5005_v24 = vld [vmem:[%s7470_s5 + $0x1a4] sm:$0xf0]  ;;  %v4952_v20 = vld [vmem:[%s7470_s5 + $0x4] sm:$0xf] }
 0x2c2   :  { %v709_v63 = vpack.c.bf16 %v707_v47, %v707_v47  ;;  %v3948_v40 = vor.u32 %v4993_v38, %v3947_v37  ;;  %v4019_v47 = vld [vmem:[%s7470_s5 + $0x1d0] sm:$0xf]  ;;  %v3996_v27 = vor.u32 %v5005_v24, %v3995_v22  ;;  %v3789_v21 = vld [vmem:[%s7470_s5 + $0x8] sm:$0xf0]  ;;  %v5008_v22 = vld [vmem:[%s7470_s5 + $0x1c4] sm:$0xf] }
 0x2c3   :  { %1161 = vmatpush.bf16.msra.mxu3 %v3804_v26  ;;  %v4020_v52 = vor.u32 %v5011_v49, %v4019_v47  ;;  %v3901_v26 = vld [vmem:[%s7470_s5 + $0xe8] sm:$0xf0]  ;;  %v3987_v38 = vld [vmem:[%s7470_s5 + $0x190] sm:$0xf] }
 0x2c4   :  { %v713_v7 = vunpack.c.l.b16 %v709_v63  ;;  %1187 = vmatpush.bf16.msrb.mxu0 %v3948_v40  ;;  %v3931_v63 = vld [vmem:[%s7470_s5 + $0x120] sm:$0xf]  ;;  %v4978_v40 = vld [vmem:[%s7470_s5 + $0xd4] sm:$0xf]  ;;  %v3988_v41 = vor.u32 %v5003_v39, %v3987_v38  ;;  %v3965_v47 = vld [vmem:[%s7470_s5 + $0x168] sm:$0xf0] }
 0x2c5   :  { %1200 = vmatpush.bf16.msrb.mxu1 %v4020_v52  ;;  %v3979_v52 = vld [vmem:[%s7470_s5 + $0x180] sm:$0xf]  ;;  %v4013_v24 = vld [vmem:[%s7470_s5 + $0x1c8] sm:$0xf0]  ;;  %v4968_v38 = vld [vmem:[%s7470_s5 + $0x84] sm:$0xf] }
 0x2c6   :  { %v3853_v39 = vld [vmem:[%s7470_s5 + $0x88] sm:$0xf0] }
 0x2c7   :  { %1162 = vmatpush.bf16.msra.mxu3 %v3796_v35  ;;  %v4998_v35 = vld [vmem:[%s7470_s5 + $0x174] sm:$0xf] }
 0x2c8   :  { %v3976_v37 = vor.u32 %v4998_v35, %v3973_v36  ;;  %v4988_v35 = vld [vmem:[%s7470_s5 + $0x124] sm:$0xf]  ;;  %v3933_v36 = vld [vmem:[%s7470_s5 + $0x128] sm:$0xf0] }
 0x2dc   :  { %v5232_v48 = vpop.permute.xlu0 %5231 }
 0x2dd   :  { %v5234_v54 = vunpack.i.h.bf16 %v5232_v48  ;;  %v5233_v55 = vunpack.i.l.bf16 %v5232_v48  ;;  %v3788_v48 = vor.u32 %v4953_v46, %v3787_v45  ;;  %v3813_v45 = vld [vmem:[%s7470_s5 + $0x38] sm:$0xf0]  ;;  %v4996_v46 = vld [vmem:[%s7470_s5 + $0x164] sm:$0xf] }
 0x2de   :  { %v3968_v49 = vor.u32 %v4996_v46, %v3965_v47  ;;  %v5002_v47 = vld [vmem:[%s7470_s5 + $0x194] sm:$0xf] }
 0x2df   :  { %v704_v60 = vsel %vm7485_vm14, %v5233_v55, %v5234_v54  ;;  %v3940_v54 = vor.u32 %v4991_v51, %v3939_v50  ;;  %v4966_v55 = vld [vmem:[%s7470_s5 + $0x74] sm:$0xf]  ;;  %1163 = vmatpush.bf16.msra.mxu3 %v3788_v48  ;;  %v3816_v48 = vor.u32 %v4958_v43, %v3813_v45  ;;  %v5012_v50 = vld [vmem:[%s7470_s5 + $0x1e4] sm:$0xf]  ;;  %v4029_v51 = vld [vmem:[%s7470_s5 + $0x1e8] sm:$0xf0] }
 0x2e0   :  { %v708_v13 = vmax.f32 %v660_v29, %v704_v60  ;;  %v4975_v29 = vld [vmem:[%s7470_s5 + $0xb4] sm:$0xf0]  ;;  %v3848_v58 = vor.u32 %v4966_v55, %v3845_v56  ;;  %v5009_v60 = vld [vmem:[%s7470_s5 + $0x1c4] sm:$0xf0]  ;;  %v4976_v55 = vld [vmem:[%s7470_s5 + $0xc4] sm:$0xf]  ;;  %v4032_v56 = vor.u32 %v5012_v50, %v4029_v51 }
 0x2e1   :  { %v3876_v31 = vor.u32 %v4975_v29, %v3875_v28  ;;  %1188 = vmatpush.bf16.msrb.mxu0 %v3940_v54  ;;  %v4012_v62 = vor.u32 %v5009_v60, %v4011_v0  ;;  %v3904_v28 = vor.u32 %v4980_v25, %v3901_v26  ;;  %v3915_v29 = vld [vmem:[%s7470_s5 + $0x100] sm:$0xf]  ;;  %v5001_v54 = vld [vmem:[%s7470_s5 + $0x184] sm:$0xf0]  ;;  %v3805_v0 = vld [vmem:[%s7470_s5 + $0x28] sm:$0xf0] }
 0x2e2   :  { %v710_v5 = vpack.c.bf16 %v708_v13, %v708_v13  ;;  %v4989_v13 = vld [vmem:[%s7470_s5 + $0x124] sm:$0xf0]  ;;  %v3916_v32 = vor.u32 %v4985_v30, %v3915_v29  ;;  %v3980_v57 = vor.u32 %v5001_v54, %v3979_v52  ;;  %v4990_v25 = vld [vmem:[%s7470_s5 + $0x134] sm:$0xf]  ;;  %v3941_v26 = vld [vmem:[%s7470_s5 + $0x138] sm:$0xf0] }
 0x2e3   :  { %1174 = vmatpush.bf16.msra.mxu2 %v3876_v31  ;;  %1212 = vmatpush.bf16.msrb.mxu3 %v3848_v58  ;;  %v3932_v2 = vor.u32 %v4989_v13, %v3931_v63  ;;  %v4960_v31 = vld [vmem:[%s7470_s5 + $0x44] sm:$0xf]  ;;  %v3885_v58 = vld [vmem:[%s7470_s5 + $0xc8] sm:$0xf0]  ;;  %v4994_v63 = vld [vmem:[%s7470_s5 + $0x154] sm:$0xf] }
 0x2e4   :  { %v714_v8 = vunpack.c.l.b16 %v710_v5  ;;  %v3840_v5 = vor.u32 %v4964_v1, %v3837_v4  ;;  %1201 = vmatpush.bf16.msrb.mxu1 %v4012_v62  ;;  %v3824_v34 = vor.u32 %v4960_v31, %v3821_v33  ;;  %v3888_v60 = vor.u32 %v4976_v55, %v3885_v58  ;;  %v3957_v13 = vld [vmem:[%s7470_s5 + $0x158] sm:$0xf0]  ;;  %v4970_v29 = vld [vmem:[%s7470_s5 + $0x94] sm:$0xf]  ;;  %v4984_v50 = vld [vmem:[%s7470_s5 + $0x104] sm:$0xf] }
 0x2e5   :  { %1189 = vmatpush.bf16.msrb.mxu0 %v3932_v2  ;;  %v1154_v62 = vand.u32 %v4032_v56, %v5834_v19  ;;  %v3960_v1 = vor.u32 %v4994_v63, %v3957_v13  ;;  %v4974_v2 = vld [vmem:[%s7470_s5 + $0xb4] sm:$0xf]  ;;  %v3877_v4 = vld [vmem:[%s7470_s5 + $0xb8] sm:$0xf0]  ;;  %v3917_v51 = vld [vmem:[%s7470_s5 + $0x108] sm:$0xf0] }
 0x2e6   :  { %v5817_v11 = vpack.c.b16 %v714_v8, %v713_v7  ;;  %v4969_v7 = vld [vmem:[%s7470_s5 + $0x84] sm:$0xf0]  ;;  %v3861_v30 = vld [vmem:[%s7470_s5 + $0x98] sm:$0xf0]  ;;  %v4986_v43 = vld [vmem:[%s7470_s5 + $0x114] sm:$0xf]  ;;  %v3920_v52 = vor.u32 %v4984_v50, %v3917_v51 }
 0x2e7   :  { %1175 = vmatpush.bf16.msra.mxu2 %v3868_v44  ;;  %v3852_v8 = vor.u32 %v4969_v7, %v3851_v6  ;;  %1213 = vmatpush.bf16.msrb.mxu3 %v3840_v5  ;;  %v3896_v44 = vor.u32 %v4978_v40, %v3893_v42  ;;  %v3880_v5 = vor.u32 %v4974_v2, %v3877_v4  ;;  %v4954_v6 = vld [vmem:[%s7470_s5 + $0x14] sm:$0xf]  ;;  %v3797_v7 = vld [vmem:[%s7470_s5 + $0x18] sm:$0xf0]  ;;  %v5004_v40 = vld [vmem:[%s7470_s5 + $0x1a4] sm:$0xf] }
 0x2e8   :  { %718 = vrot.lane.b32.xlu2 %v5817_v11, %s7484_s20  ;;  %716 = vrot.lane.b32.xlu1 %v5817_v11, %s5287_s18  ;;  %v723_v12 = vshll.u32 %v5817_v11, 16  ;;  %v721_v14 = vshrl.u32 %v5817_v11, 16  ;;  %v733_v17 = vrot.slane %v5817_v11, 1  ;;  %v3864_v31 = vor.u32 %v4970_v29, %v3861_v30  ;;  %v4005_v33 = vld [vmem:[%s7470_s5 + $0x1b8] sm:$0xf0] }
 0x2e9   :  { %v3997_v42 = vld [vmem:[%s7470_s5 + $0x1a8] sm:$0xf0]  ;;  %v5000_v55 = vld [vmem:[%s7470_s5 + $0x184] sm:$0xf]  ;;  %vm7491_vm14 = vcmask 900096  }
 0x2ea   :  { %v725_v15 = vrot.slane %v723_v12, 1  ;;  %v4004_v12 = vor.u32 %v5007_v10, %v4003_v9  ;;  %v3800_v9 = vor.u32 %v4954_v6, %v3797_v7  ;;  %v4021_v10 = vld [vmem:[%s7470_s5 + $0x1d8] sm:$0xf0]  ;;  %v4000_v45 = vor.u32 %v5004_v40, %v3997_v42  ;;  %v3981_v56 = vld [vmem:[%s7470_s5 + $0x188] sm:$0xf0] }
 0x2eb   :  { %1176 = vmatpush.bf16.msra.mxu2 %v3860_v61  ;;  %1214 = vmatpush.bf16.msrb.mxu3 %v3832_v23  ;;  %v3808_v61 = vor.u32 %v4956_v59, %v3805_v0  ;;  %v3792_v23 = vor.u32 %v4952_v20, %v3789_v21 }
 0x2ec   :  { %v726_v16 = vor.u32 %v725_v15, %v721_v14  ;;  %v3909_v14 = vld [vmem:[%s7470_s5 + $0xf8] sm:$0xf0]  ;;  %v3923_v15 = vld [vmem:[%s7470_s5 + $0x110] sm:$0xf]  ;;  %1202 = vmatpush.bf16.msrb.mxu1 %v4004_v12  ;;  %v3949_v12 = vld [vmem:[%s7470_s5 + $0x148] sm:$0xf0] }
 0x2ee   :  { %727 = vrot.lane.b32.xlu0 %v726_v16, %s7482_s21 }
 0x2ef   :  { %1177 = vmatpush.bf16.msra.mxu2 %v3852_v8  ;;  %1215 = vmatpush.bf16.msrb.mxu3 %v3824_v34  ;;  %v5010_v8 = vld [vmem:[%s7470_s5 + $0x1d4] sm:$0xf] }
 0x2f0   :  { %731 = vrot.lane.b32.xlu2 %v726_v16, %s7479_s22  ;;  %729 = vrot.lane.b32.xlu1 %v726_v16, %s7483_s23  ;;  %v4987_v16 = vld [vmem:[%s7470_s5 + $0x114] sm:$0xf0]  ;;  %s7514_s22 = smov 124  }
 0x2f1   :  { %v3924_v18 = vor.u32 %v4987_v16, %v3923_v15  ;;  %1203 = vmatpush.bf16.msrb.mxu1 %v3996_v27  ;;  %v4972_v16 = vld [vmem:[%s7470_s5 + $0xa4] sm:$0xf]  ;;  %v4016_v27 = vor.u32 %v5008_v22, %v4013_v24  ;;  %v4135_v24 = vld [vmem:[%s7465_s0 + $0x18] sm:$0xf] }
 0x2f3   :  { %1190 = vmatpush.bf16.msrb.mxu0 %v3924_v18  ;;  %1216 = vmatpush.bf16.msrb.mxu3 %v3816_v48  ;;  %v3989_v48 = vld [vmem:[%s7470_s5 + $0x198] sm:$0xf0] }
 0x2f5   :  { %1204 = vmatpush.bf16.msrb.mxu1 %v3988_v41  ;;  %v3856_v41 = vor.u32 %v4968_v38, %v3853_v39  ;;  %v1286_v38 = vsel %vm336_vm2, 4294967295, %v5298_v53 }
 0x2f6   :  { %734 = vrot.lane.b32.xlu0 %v733_v17, %s7481_s25 }
 0x2f7   :  { %1191 = vmatpush.bf16.msrb.mxu0 %v3916_v32  ;;  %1217 = vmatpush.bf16.msrb.mxu3 %v3808_v61  ;;  %v5006_v32 = vld [vmem:[%s7470_s5 + $0x1b4] sm:$0xf] }
 0x2f8   :  { %738 = vrot.lane.b32.xlu2 %v733_v17, %s7478_s30  ;;  %736 = vrot.lane.b32.xlu1 %v733_v17, %s7480_s13  ;;  %v3912_v17 = vor.u32 %v4982_v3, %v3909_v14  ;;  %v4992_v3 = vld [vmem:[%s7470_s5 + $0x144] sm:$0xf]  ;;  %v4024_v14 = vor.u32 %v5010_v8, %v4021_v10  ;;  %v4008_v34 = vor.u32 %v5006_v32, %v4005_v33  ;;  %v6164_v8 = vld [vmem:[%s7471_s6] sm:$0x3]  ;;  %s7509_s13 = smov 100  }
 0x2f9   :  { %1205 = vmatpush.bf16.msrb.mxu1 %v3980_v57  ;;  %v3952_v15 = vor.u32 %v4992_v3, %v3949_v12  ;;  %v3984_v57 = vor.u32 %v5000_v55, %v3981_v56  ;;  %v831_v10 = vperm.slane %v6164_v8, 0  ;;  %v832_v39 = vperm.slane %v6164_v8, 1  ;;  %v4037_v55 = vld [vmem:[%s7472_s7] sm:$0xf]  ;;  %v5014_v56 = vld [vmem:[%s7472_s7] sm:$0x10] }
 0x2fa   :  { %1226 = vmatpush.bf16.msrb.mxu2 %v3912_v17  ;;  %v3869_v17 = vld [vmem:[%s7470_s5 + $0xa8] sm:$0xf0] }
 0x2fb   :  { %1240 = vmatpush.bf16.msra.mxu0 %v3976_v37  ;;  %1218 = vmatpush.bf16.msrb.mxu3 %v3800_v9  ;;  %v3872_v18 = vor.u32 %v4972_v16, %v3869_v17  ;;  %v3936_v37 = vor.u32 %v4988_v35, %v3933_v36 }
 0x2fd   :  { %1255 = vmatpush.bf16.msra.mxu1 %v1154_v62 }
 0x2fe   :  { %1227 = vmatpush.bf16.msrb.mxu2 %v3904_v28  ;;  %v3944_v28 = vor.u32 %v4990_v25, %v3941_v26  ;;  %v5036_v25 = vld [vmem:[%s7465_s0 + $0x18] sm:$0x30] }
 0x2ff   :  { %1241 = vmatpush.bf16.msra.mxu0 %v3968_v49  ;;  %1219 = vmatpush.bf16.msrb.mxu3 %v3792_v23  ;;  %v3992_v49 = vor.u32 %v5002_v47, %v3989_v48  ;;  %v6170_v23 = vld [vmem:[%s7465_s0 + $0x10] sm:$0xff]  ;;  %v5030_v47 = vld [vmem:[%s7473_s8 + $0x74] sm:$0xf0] }
 0x300   :  { %1602 = vrot.lane.b32.xlu0 %v6170_v23, %s5284_s27  ;;  %1606 = vrot.lane.b32.xlu1 %v6170_v23, %s5287_s18  ;;  %v1611_v30 = vshrl.u32 %v6170_v23, 16  ;;  %v1633_v35 = vrot.slane %v6170_v23, 1 }
 0x301   :  { %1256 = vmatpush.bf16.msra.mxu1 %v4024_v14 }
 0x302   :  { %1228 = vmatpush.bf16.msrb.mxu2 %v3896_v44  ;;  %v3925_v44 = vld [vmem:[%s7470_s5 + $0x118] sm:$0xf0] }
 0x303   :  { %1242 = vmatpush.bf16.msra.mxu0 %v3960_v1  ;;  %v3928_v46 = vor.u32 %v4986_v43, %v3925_v44 }
 0x305   :  { %1257 = vmatpush.bf16.msra.mxu1 %v4016_v27  ;;  %v6178_v27 = vor.u32 %v5036_v25, %v4135_v24  ;;  %v4067_v25 = vld [vmem:[%s7473_s8 + $0x30] sm:$0xf] }
 0x306   :  { %1229 = vmatpush.bf16.msrb.mxu2 %v3888_v60 }
 0x307   :  { %1243 = vmatpush.bf16.msra.mxu0 %v3952_v15  ;;  %v6189_v36 = vrot.slane %v6178_v27, 1  ;;  %v1622_v8 = vshrl.u32 %v6178_v27, 16 }
 0x309   :  { %1258 = vmatpush.bf16.msra.mxu1 %v4008_v34  ;;  %v1618_v34 = vshll.u32 %v6178_v27, 16 }
 0x30a   :  { %1230 = vmatpush.bf16.msrb.mxu2 %v3880_v5 }
 0x30b   :  { %1244 = vmatpush.bf16.msra.mxu0 %v3944_v28 }
 0x30d   :  { %1259 = vmatpush.bf16.msra.mxu1 %v4000_v45  ;;  %v1635_v45 = vsel %vm89_vm0, %v1633_v35, %v6189_v36  ;;  %vm7494_vm0 = vcmask 89088   ;;  %v5020_v35 = vld [vmem:[%s7473_s8 + $0x24] sm:$0xf0] }
 0x30e   :  { %1231 = vmatpush.bf16.msrb.mxu2 %v3872_v18  ;;  %1636 = vrot.lane.b32.xlu1 %v1635_v45, %s5285_s28 }
 0x30f   :  { %1245 = vmatpush.bf16.msra.mxu0 %v3936_v37 }
 0x311   :  { %1260 = vmatpush.bf16.msra.mxu1 %v3992_v49 }
 0x312   :  { %1232 = vmatpush.bf16.msrb.mxu2 %v3864_v31  ;;  %v1613_v31 = vshll.u32 %v6170_v23, 16 }
 0x313   :  { %1246 = vmatpush.bf16.msra.mxu0 %v3928_v46  ;;  %v4099_v46 = vld [vmem:[%s7473_s8 + $0x70] sm:$0xf] }
 0x314   :  { %v1615_v37 = vrot.slane %v1613_v31, 1  ;;  %v5027_v31 = vld [vmem:[%s7473_s8 + $0x64] sm:$0xf] }
 0x315   :  { %1261 = vmatpush.bf16.msra.mxu1 %v3984_v57  ;;  %v4100_v57 = vor.u32 %v5030_v47, %v4099_v46  ;;  %v4077_v46 = vld [vmem:[%s7473_s8 + $0x48] sm:$0xf0] }
 0x316   :  { %1233 = vmatpush.bf16.msrb.mxu2 %v3856_v41  ;;  %v1620_v41 = vrot.slane %v1618_v34, 1  ;;  %v1616_v42 = vor.u32 %v1615_v37, %v1611_v30  ;;  %1604 = vrot.lane.b32.xlu1 %v6178_v27, %s5284_s27  ;;  %v4059_v34 = vld [vmem:[%s7473_s8 + $0x20] sm:$0xf]  ;;  %s7510_s27 = smov 87  }
 0x317   :  { %1247 = vmatpush.bf16.msra.mxu0 %v3920_v52 }
 0x318   :  { %v6205_v51 = vsel %vm65_vm1, %v1616_v42, %v1620_v41  ;;  %v5018_v42 = vld [vmem:[%s7473_s8 + $0x14] sm:$0xf0]  ;;  %vm1467_vm1 = vcmask 1041408  }
 0x319   :  { %1625 = vrot.lane.b32.xlu2 %v6205_v51, %s5286_s29  ;;  %1629 = vrot.lane.b32.xlu0 %v6205_v51, %s5289_s26 }
 0x321   :  { %1640 = vrot.lane.b32.xlu2 %v1635_v45, %s5288_s14  ;;  %1644 = vrot.lane.b32.xlu0 %v1635_v45, %s5286_s29  ;;  %v5023_v45 = vld [vmem:[%s7473_s8 + $0x44] sm:$0xf] }
 0x322   :  { %v4080_v47 = vor.u32 %v5023_v45, %v4077_v46  ;;  %v4107_v45 = vld [vmem:[%s7473_s8 + $0x80] sm:$0xf]  ;;  %v5032_v46 = vld [vmem:[%s7473_s8 + $0x84] sm:$0xf0] }
 0x329   :  { %1608 = vrot.lane.b32.xlu2 %v6178_v27, %s5287_s18 }
 0x331   :  { %1638 = vrot.lane.b32.xlu2 %v6189_v36, %s5285_s28  ;;  %s7511_s28 = smov 37  }
 0x342   :  { %v719_v54 = vpop.permute.xlu2 %718 }
 0x34a   :  { %v732_v61 = vpop.permute.xlu2 %731 }
 0x352   :  { %v739_v5 = vpop.permute.xlu2 %738 }
 0x35a   :  { %v717_v58 = vpop.permute.xlu1 %716 }
 0x35b   :  { %v742_v59 = vsel %vm7490_vm15, %v5817_v11, %v717_v58  ;;  %vm761_vm15 = vcmask 7168  }
 0x35c   :  { %v745_v0 = vsel %vm7491_vm14, %v742_v59, %v719_v54  ;;  %vm764_vm14 = vcmask 457728  }
 0x35d   :  { %1164 = vmatmul.bf16.vlgmr.msra.gmra.mxu3 %v745_v0 }
 0x360   :  { %v728_v60 = vpop.permute.xlu0 %727 }
 0x361   :  { %v749_v62 = vsel %vm747_vm12, %v719_v54, %v728_v60 }
 0x362   :  { %v730_v63 = vpop.permute.xlu1 %729 }
 0x363   :  { %v752_v13 = vsel %vm750_vm7, %v749_v62, %v730_v63  ;;  %v756_v1 = vsel %vm754_vm5, %v730_v63, %v732_v61  ;;  %v4038_v61 = vor.u32 %v5014_v56, %v4037_v55  ;;  %v4091_v62 = vld [vmem:[%s7473_s8 + $0x60] sm:$0xf]  ;;  %v5028_v63 = vld [vmem:[%s7473_s8 + $0x64] sm:$0xf0] }
 0x364   :  { %1178 = vmatmul.bf16.vlgmr.msra.gmra.mxu2 %v752_v13  ;;  %v4043_v56 = vld [vmem:[%s7473_s8] sm:$0xf] }
 0x368   :  { %v735_v2 = vpop.permute.xlu0 %734 }
 0x369   :  { %v759_v11 = vsel %vm757_vm4, %v756_v1, %v735_v2 }
 0x36a   :  { %v737_v4 = vpop.permute.xlu1 %736  ;;  %1192 = vmatmul.bf16.vlgmr.msrb.gmra.mxu0 %v759_v11 }
 0x36b   :  { %v763_v6 = vsel %vm761_vm15, %v735_v2, %v737_v4  ;;  %v4092_v2 = vor.u32 %v5028_v63, %v4091_v62  ;;  %v4083_v4 = vld [vmem:[%s7473_s8 + $0x50] sm:$0xf]  ;;  %v4053_v62 = vld [vmem:[%s7473_s8 + $0x18] sm:$0xf0] }
 0x36c   :  { %v766_v7 = vsel %vm764_vm14, %v763_v6, %v739_v5  ;;  %v5026_v5 = vld [vmem:[%s7473_s8 + $0x54] sm:$0xf0] }
 0x36d   :  { %4033 = vmatmul.msk.bf16.vlgmr.msrb.gmra.mxu1 %vm7493_vm11, %v766_v7  ;;  %1220 = vmatmul.bf16.vlgmr.msrb.gmra.mxu3 %v745_v0 }
 0x374   :  { %1234 = vmatmul.bf16.vlgmr.msrb.gmra.mxu2 %v752_v13 }
 0x37a   :  { %1248 = vmatmul.bf16.vlgmr.msra.gmra.mxu0 %v759_v11 }
 0x37d   :  { %4034 = vmatmul.msk.bf16.vlgmr.msra.gmra.mxu1 %vm7493_vm11, %v766_v7  ;;  %vm1285_vm11 = vcmask 1045504  }
 0x37e   :  { %v6202_v48 = vsel %vm1285_vm11, %v1286_v38, 0  ;;  %v5025_v38 = vld [vmem:[%s7473_s8 + $0x54] sm:$0xf]  ;;  %vm7495_vm11 = vcmask 867328  }
 0x3e0   :  { %v1165_v9 = vpop.f32.mrf.mxu3 }
 0x3e1   :  { %v1166_v3 = vadd.f32 %v1165_v9, %v831_v10 }
 0x3e7   :  { %v1179_v12 = vpop.f32.mrf.mxu2  ;;  %v1193_v14 = vpop.f32.mrf.mxu0 }
 0x3e8   :  { %v1167_v15 = vpop.f32.mrf.mxu3  ;;  %v1180_v16 = vadd.f32 %v1179_v12, %v1166_v3  ;;  %v4084_v12 = vor.u32 %v5026_v5, %v4083_v4  ;;  %v4045_v4 = vld [vmem:[%s7473_s8 + $0x8] sm:$0xf0]  ;;  %v5065_v5 = vld [vmem:[%s7466_s1 + $0xe4] sm:$0xf] }
 0x3e9   :  { %v1168_v20 = vadd.f32 %v1167_v15, %v831_v10  ;;  %v5024_v15 = vld [vmem:[%s7473_s8 + $0x44] sm:$0xf0] }
 0x3ea   :  { %v1207_v17 = vpop.f32.mrf.mxu1  ;;  %v1194_v18 = vadd.f32 %v1193_v14, %v1180_v16  ;;  %v4075_v14 = vld [vmem:[%s7473_s8 + $0x40] sm:$0xf] }
 0x3eb   :  { %v4076_v24 = vor.u32 %v5024_v15, %v4075_v14  ;;  %v5063_v14 = vld [vmem:[%s7466_s1 + $0xd4] sm:$0xf]  ;;  %v4245_v15 = vld [vmem:[%s7466_s1 + $0xd8] sm:$0xf0] }
 0x3ec   :  { %v1208_v28 = vadd.f32 %v1207_v17, %v1194_v18  ;;  %v6243_v17 = vor.u32 %v1622_v8, %v1620_v41  ;;  %v4051_v41 = vld [vmem:[%s7473_s8 + $0x10] sm:$0xf] }
 0x3ee   :  { %v1268_v43 = vmax.f32 %v1208_v28, 0.0  ;;  %1627 = vrot.lane.b32.xlu0 %v6243_v17, %s5286_s29  ;;  %1631 = vrot.lane.b32.xlu1 %v6243_v17, %s5289_s26 }
 0x3ef   :  { %v1181_v21 = vpop.f32.mrf.mxu2  ;;  %v1195_v22 = vpop.f32.mrf.mxu0 }
 0x3f0   :  { %v1182_v26 = vadd.f32 %v1181_v21, %v1168_v20  ;;  %v1221_v29 = vpop.f32.mrf.mxu3  ;;  %v5029_v21 = vld [vmem:[%s7473_s8 + $0x74] sm:$0xf] }
 0x3f1   :  { %v1222_v52 = vadd.f32 %v1221_v29, %v832_v39 }
 0x3f2   :  { %v1196_v32 = vadd.f32 %v1195_v22, %v1182_v26  ;;  %v1209_v33 = vpop.f32.mrf.mxu1  ;;  %v4101_v22 = vld [vmem:[%s7473_s8 + $0x78] sm:$0xf0]  ;;  %v5022_v26 = vld [vmem:[%s7473_s8 + $0x34] sm:$0xf0] }
 0x3f3   :  { %v4104_v29 = vor.u32 %v5029_v21, %v4101_v22  ;;  %v5045_v22 = vld [vmem:[%s7466_s1 + $0x44] sm:$0xf] }
 0x3f4   :  { %v1210_v40 = vadd.f32 %v1209_v33, %v1196_v32  ;;  %v4068_v32 = vor.u32 %v5022_v26, %v4067_v25  ;;  %v4093_v33 = vld [vmem:[%s7473_s8 + $0x68] sm:$0xf0] }
 0x3f5   :  { %v4096_v37 = vor.u32 %v5027_v31, %v4093_v33  ;;  %v4165_v33 = vld [vmem:[%s7466_s1 + $0x38] sm:$0xf0] }
 0x3f6   :  { %v1270_v44 = vmax.f32 %v1210_v40, 0.0  ;;  %v4085_v40 = vld [vmem:[%s7473_s8 + $0x58] sm:$0xf0]  ;;  %1642 = vrot.lane.b32.xlu0 %v6189_v36, %s5288_s14  ;;  %1646 = vrot.lane.b32.xlu1 %v6189_v36, %s5286_s29  ;;  %s7513_s29 = smov 9  }
 0x3f7   :  { %v1235_v49 = vpop.f32.mrf.mxu2  ;;  %v1249_v50 = vpop.f32.mrf.mxu0  ;;  %v4069_v36 = vld [vmem:[%s7473_s8 + $0x38] sm:$0xf0] }
 0x3f8   :  { %v1272_v54 = vpack.c.bf16 %v1270_v44, %v1268_v43  ;;  %v1236_v59 = vadd.f32 %v1235_v49, %v1222_v52  ;;  %v1223_v60 = vpop.f32.mrf.mxu3  ;;  %v4088_v43 = vor.u32 %v5025_v38, %v4085_v40  ;;  %v4052_v44 = vor.u32 %v5018_v42, %v4051_v41  ;;  %v5021_v49 = vld [vmem:[%s7473_s8 + $0x34] sm:$0xf]  ;;  %v5019_v52 = vld [vmem:[%s7473_s8 + $0x24] sm:$0xf]  ;;  %v4229_v40 = vld [vmem:[%s7466_s1 + $0xb8] sm:$0xf0] }
 0x3f9   :  { %v1224_v1 = vadd.f32 %v1223_v60, %v832_v39  ;;  %v4060_v39 = vor.u32 %v5020_v35, %v4059_v34  ;;  %v4115_v35 = vld [vmem:[%s7473_s8 + $0x90] sm:$0xf]  ;;  %v5059_v38 = vld [vmem:[%s7466_s1 + $0xb4] sm:$0xf]  ;;  %v5041_v41 = vld [vmem:[%s7466_s1 + $0x24] sm:$0xf] }
 0x3fa   :  { %v1289_v58 = vand.u32 %v6202_v48, %v1272_v54  ;;  %v1263_v0 = vpop.f32.mrf.mxu1  ;;  %v1250_v13 = vadd.f32 %v1249_v50, %v1236_v59  ;;  %v4072_v50 = vor.u32 %v5021_v49, %v4069_v36  ;;  %v4061_v54 = vld [vmem:[%s7473_s8 + $0x28] sm:$0xf0]  ;;  %v5051_v59 = vld [vmem:[%s7466_s1 + $0x74] sm:$0xf]  ;;  %v4108_v36 = vor.u32 %v5032_v46, %v4107_v45 }
 0x3fb   :  { %v4064_v55 = vor.u32 %v5019_v52, %v4061_v54  ;;  %v4157_v42 = vld [vmem:[%s7466_s1 + $0x28] sm:$0xf0] }
 0x3fc   :  { %1301 = vmatpush.bf16.msra.mxu3 %v1289_v58  ;;  %v1264_v9 = vadd.f32 %v1263_v0, %v1250_v13  ;;  %v4197_v0 = vld [vmem:[%s7466_s1 + $0x78] sm:$0xf0]  ;;  %v5049_v13 = vld [vmem:[%s7466_s1 + $0x64] sm:$0xf] }
 0x3fd   :  { %v4200_v60 = vor.u32 %v5051_v59, %v4197_v0  ;;  %v5039_v0 = vld [vmem:[%s7466_s1 + $0x14] sm:$0xf] }
 0x3fe   :  { %v1269_v18 = vmax.f32 %v1264_v9, 0.0 }
 0x3ff   :  { %v1237_v11 = vpop.f32.mrf.mxu2  ;;  %4039 = vmatmul.msk.bf16.vlgmr.msra.gmra.mxu3 %vm7494_vm0, %v4038_v61  ;;  %v1251_v7 = vpop.f32.mrf.mxu0 }
 0x400   :  { %1476 = vmatpush.bf16.msrb.mxu3 %v4100_v57  ;;  %v1238_v6 = vadd.f32 %v1237_v11, %v1224_v1  ;;  %v5016_v57 = vld [vmem:[%s7473_s8 + $0x4] sm:$0xf0]  ;;  %v4189_v1 = vld [vmem:[%s7466_s1 + $0x68] sm:$0xf0] }
 0x401   :  { %v4044_v58 = vor.u32 %v5016_v57, %v4043_v56  ;;  %v4192_v11 = vor.u32 %v5049_v13, %v4189_v1  ;;  %v5066_v56 = vld [vmem:[%s7466_s1 + $0xe4] sm:$0x10]  ;;  %v6424_v57 = vpop.permute.xlu0 %1602  ;;  %v4213_v13 = vld [vmem:[%s7466_s1 + $0x98] sm:$0xf0]  ;;  %v6440_v1 = vpop.permute.xlu1 %1606 }
 0x402   :  { %v1252_v10 = vadd.f32 %v1251_v7, %v1238_v6  ;;  %v1265_v3 = vpop.f32.mrf.mxu1  ;;  %v4253_v6 = vld [vmem:[%s7466_s1 + $0xe8] sm:$0x10] }
 0x403   :  { %v4256_v8 = vor.u32 %v5065_v5, %v4253_v6  ;;  %v4243_v6 = vld [vmem:[%s7466_s1 + $0xd0] sm:$0xf] }
 0x404   :  { %1477 = vmatpush.bf16.msrb.mxu3 %v4092_v2  ;;  %v1266_v16 = vadd.f32 %v1265_v3, %v1252_v10  ;;  %v5015_v2 = vld [vmem:[%s7473_s8 + $0x4] sm:$0xf]  ;;  %v5047_v10 = vld [vmem:[%s7466_s1 + $0x54] sm:$0xf]  ;;  %v4181_v3 = vld [vmem:[%s7466_s1 + $0x58] sm:$0xf0] }
 0x405   :  { %v4048_v7 = vor.u32 %v5015_v2, %v4045_v4  ;;  %v1874_v9 = vsel %vm336_vm2, %v4256_v8, 0  ;;  %v4117_v4 = vld [vmem:[%s7473_s8 + $0x98] sm:$0xf0]  ;;  %v5037_v8 = vld [vmem:[%s7466_s1 + $0x4] sm:$0xf] }
 0x406   :  { %v1271_v20 = vmax.f32 %v1266_v16, 0.0  ;;  %v1358_v16 = vld [vmem:[%s7473_s8 + $0xa0] sm:$0x77] }
 0x407   :  { %v1420_v21 = vunpack.c.l.b16 %v1358_v16  ;;  %v1421_v49 = vunpack.c.h.b16 %v1358_v16 }
 0x408   :  { %1478 = vmatpush.bf16.msrb.mxu3 %v4084_v12  ;;  %v1273_v28 = vpack.c.bf16 %v1271_v20, %v1269_v18  ;;  %v4184_v12 = vor.u32 %v5047_v10, %v4181_v3  ;;  %v1468_v18 = vsel %vm1467_vm1, 4294967295, %v5298_v53  ;;  %v4248_v20 = vor.u32 %v5063_v14, %v4245_v15  ;;  %v5061_v53 = vld [vmem:[%s7466_s1 + $0xc4] sm:$0xf]  ;;  %v4141_v10 = vld [vmem:[%s7466_s1 + $0x8] sm:$0xf0]  ;;  %v1626_v15 = vpop.permute.xlu2 %1625 }
 0x409   :  { %v1442_v26 = vpack.c.b16 %v1420_v21, %v1420_v21  ;;  %v1443_v54 = vpack.c.b16 %v1421_v49, %v1421_v49  ;;  %v4144_v3 = vor.u32 %v5037_v8, %v4141_v10  ;;  %v4205_v14 = vld [vmem:[%s7466_s1 + $0x88] sm:$0xf0]  ;;  %vm7496_vm1 = vcmask 424960   ;;  %v4187_v10 = vld [vmem:[%s7466_s1 + $0x60] sm:$0xf] }
 0x40a   :  { %v1292_v30 = vand.u32 %v6202_v48, %v1273_v28  ;;  %v6373_v28 = vsel %vm501_vm13, %v1468_v18, 0  ;;  %v5031_v18 = vld [vmem:[%s7473_s8 + $0x84] sm:$0xf] }
 0x40c   :  { %1479 = vmatpush.bf16.msrb.mxu3 %v4076_v24  ;;  %1315 = vmatpush.bf16.msra.mxu2 %v1292_v30  ;;  %v4173_v24 = vld [vmem:[%s7466_s1 + $0x48] sm:$0xf0]  ;;  %v1471_v30 = vand.u32 %v6373_v28, %v1442_v26  ;;  %v1630_v26 = vpop.permute.xlu0 %1629 }
 0x40d   :  { %v4176_v25 = vor.u32 %v5045_v22, %v4173_v24  ;;  %v4235_v22 = vld [vmem:[%s7466_s1 + $0xc0] sm:$0xf]  ;;  %v5062_v24 = vld [vmem:[%s7466_s1 + $0xc4] sm:$0xf0]  ;;  %v1667_v45 = vsel %vm127_vm6, %v1630_v26, %v6205_v51 }
 0x40e   :  { %1494 = vmatpush.bf16.msrb.mxu0 %v1471_v30  ;;  %v5060_v30 = vld [vmem:[%s7466_s1 + $0xb4] sm:$0xf0] }
 0x40f   :  { %4040 = vmatmul.msk.bf16.vlgmr.msra.gmra.mxu2 %vm7494_vm0, %v4038_v61  ;;  %v5017_v61 = vld [vmem:[%s7473_s8 + $0x14] sm:$0xf]  ;;  %vm7497_vm0 = vcmask 637952  }
 0x410   :  { %1502 = vmatpush.bf16.msrb.mxu2 %v4104_v29  ;;  %1480 = vmatpush.bf16.msrb.mxu3 %v4068_v32  ;;  %v4056_v63 = vor.u32 %v5017_v61, %v4053_v62  ;;  %v4237_v29 = vld [vmem:[%s7466_s1 + $0xc8] sm:$0xf0]  ;;  %v5043_v32 = vld [vmem:[%s7466_s1 + $0x34] sm:$0xf] }
 0x411   :  { %v4240_v31 = vor.u32 %v5061_v53, %v4237_v29  ;;  %v4168_v34 = vor.u32 %v5043_v32, %v4165_v33  ;;  %v4236_v53 = vor.u32 %v5062_v24, %v4235_v22  ;;  %v4227_v29 = vld [vmem:[%s7466_s1 + $0xb0] sm:$0xf]  ;;  %v4219_v33 = vld [vmem:[%s7466_s1 + $0xa0] sm:$0xf] }
 0x412   :  { %v4228_v32 = vor.u32 %v5060_v30, %v4227_v29  ;;  %v4163_v30 = vld [vmem:[%s7466_s1 + $0x30] sm:$0xf] }
 0x414   :  { %1503 = vmatpush.bf16.msrb.mxu2 %v4096_v37  ;;  %1481 = vmatpush.bf16.msrb.mxu3 %v4060_v39  ;;  %v5034_v37 = vld [vmem:[%s7473_s8 + $0x94] sm:$0xf0] }
 0x415   :  { %v4116_v39 = vor.u32 %v5034_v37, %v4115_v35  ;;  %v1641_v37 = vpop.permute.xlu2 %1640 }
 0x417   :  { %1495 = vmatpush.bf16.msrb.mxu0 %v4116_v39 }
 0x418   :  { %1504 = vmatpush.bf16.msrb.mxu2 %v4088_v43  ;;  %1482 = vmatpush.bf16.msrb.mxu3 %v4052_v44  ;;  %v4232_v43 = vor.u32 %v5059_v38, %v4229_v40  ;;  %v4160_v44 = vor.u32 %v5041_v41, %v4157_v42  ;;  %v1645_v41 = vpop.permute.xlu0 %1644  ;;  %v4211_v42 = vld [vmem:[%s7466_s1 + $0x90] sm:$0xf] }
 0x41b   :  { %1496 = vmatpush.bf16.msrb.mxu0 %v4108_v36 }
 0x41c   :  { %1505 = vmatpush.bf16.msrb.mxu2 %v4080_v47  ;;  %1483 = vmatpush.bf16.msrb.mxu3 %v4044_v58  ;;  %v5057_v47 = vld [vmem:[%s7466_s1 + $0xa4] sm:$0xf]  ;;  %v1474_v58 = vand.u32 %v6373_v28, %v1443_v54  ;;  %v5054_v54 = vld [vmem:[%s7466_s1 + $0x84] sm:$0xf0] }
 0x41f   :  { %1520 = vmatpush.bf16.msra.mxu0 %v1474_v58  ;;  %v1609_v58 = vpop.permute.xlu2 %1608 }
 0x420   :  { %1506 = vmatpush.bf16.msrb.mxu2 %v4072_v50  ;;  %1914 = vmatpush.bf16.msra.mxu3 %v4200_v60  ;;  %v4221_v50 = vld [vmem:[%s7466_s1 + $0xa8] sm:$0xf0]  ;;  %v4149_v60 = vld [vmem:[%s7466_s1 + $0x18] sm:$0xf0] }
 0x421   :  { %v4224_v52 = vor.u32 %v5057_v47, %v4221_v50  ;;  %v4152_v61 = vor.u32 %v5039_v0, %v4149_v60 }
 0x424   :  { %1507 = vmatpush.bf16.msrb.mxu2 %v4064_v55  ;;  %1915 = vmatpush.bf16.msra.mxu3 %v4192_v11  ;;  %v4251_v55 = vld [vmem:[%s7466_s1 + $0xe0] sm:$0xf]  ;;  %v5033_v11 = vld [vmem:[%s7473_s8 + $0x94] sm:$0xf] }
 0x425   :  { %v4252_v59 = vor.u32 %v5066_v56, %v4251_v55  ;;  %v4120_v5 = vor.u32 %v5033_v11, %v4117_v4  ;;  %v4195_v4 = vld [vmem:[%s7466_s1 + $0x70] sm:$0xf] }
 0x427   :  { %v1871_v62 = vsel %vm336_vm2, %v4252_v59, 0  ;;  %1521 = vmatpush.bf16.msra.mxu0 %v4120_v5  ;;  %v1649_v59 = vsel %vm105_vm3, %v6170_v23, %v6424_v57  ;;  %v5052_v23 = vld [vmem:[%s7466_s1 + $0x74] sm:$0xf0] }
 0x428   :  { %1508 = vmatpush.bf16.msrb.mxu2 %v4056_v63  ;;  %1916 = vmatpush.bf16.msra.mxu3 %v4184_v12  ;;  %v5055_v63 = vld [vmem:[%s7466_s1 + $0x94] sm:$0xf]  ;;  %v5053_v12 = vld [vmem:[%s7466_s1 + $0x84] sm:$0xf]  ;;  %v4196_v8 = vor.u32 %v5052_v23, %v4195_v4 }
 0x429   :  { %1896 = vmatpush.bf16.msrb.mxu1 %v1871_v62  ;;  %v4216_v2 = vor.u32 %v5055_v63, %v4213_v13  ;;  %v4208_v16 = vor.u32 %v5053_v12, %v4205_v14 }
 0x42c   :  { %1509 = vmatpush.bf16.msrb.mxu2 %v4048_v7  ;;  %1917 = vmatpush.bf16.msra.mxu3 %v4176_v25  ;;  %v5064_v7 = vld [vmem:[%s7466_s1 + $0xd4] sm:$0xf0] }
 0x430   :  { %1934 = vmatpush.bf16.msra.mxu2 %v1874_v9  ;;  %1918 = vmatpush.bf16.msra.mxu3 %v4168_v34  ;;  %v4244_v9 = vor.u32 %v5064_v7, %v4243_v6  ;;  %v5058_v34 = vld [vmem:[%s7466_s1 + $0xa4] sm:$0xf0] }
 0x431   :  { %v4220_v38 = vor.u32 %v5058_v34, %v4219_v33  ;;  %v4155_v34 = vld [vmem:[%s7466_s1 + $0x20] sm:$0xf] }
 0x432   :  { %1897 = vmatpush.bf16.msrb.mxu1 %v4244_v9 }
 0x434   :  { %1935 = vmatpush.bf16.msra.mxu2 %v4248_v20  ;;  %1919 = vmatpush.bf16.msra.mxu3 %v4160_v44  ;;  %v4109_v20 = vld [vmem:[%s7473_s8 + $0x88] sm:$0xf0] }
 0x435   :  { %v4112_v21 = vor.u32 %v5031_v18, %v4109_v20  ;;  %v4179_v18 = vld [vmem:[%s7466_s1 + $0x50] sm:$0xf]  ;;  %v5048_v20 = vld [vmem:[%s7466_s1 + $0x54] sm:$0xf0] }
 0x436   :  { %1898 = vmatpush.bf16.msrb.mxu1 %v4236_v53  ;;  %v4180_v24 = vor.u32 %v5048_v20, %v4179_v18  ;;  %v5067_v20 = vld [vmem:[%s7468_s3] sm:$0xff] }
 0x437   :  { %1522 = vmatpush.bf16.msra.mxu0 %v4112_v21 }
 0x438   :  { %1936 = vmatpush.bf16.msra.mxu2 %v4240_v31  ;;  %1920 = vmatpush.bf16.msra.mxu3 %v4152_v61  ;;  %v1637_v31 = vpop.permute.xlu1 %1636  ;;  %v1653_v61 = vsel %vm7496_vm1, %v1649_v59, %v6440_v1  ;;  %v1639_v1 = vpop.permute.xlu2 %1638  ;;  %v1712_v59 = vld [vmem:[%s7467_s2] sm:$0x3] }
 0x439   :  { %v1671_v50 = vsel %vm132_vm8, %v1667_v45, %v1637_v31  ;;  %v1657_v11 = vsel %vm7497_vm0, %v1653_v61, %v1626_v15  ;;  %vm7499_vm0 = vcmask 867328   ;;  %v5044_v31 = vld [vmem:[%s7466_s1 + $0x34] sm:$0xf0] }
 0x43a   :  { %1899 = vmatpush.bf16.msrb.mxu1 %v4228_v32  ;;  %v1675_v51 = vsel %vm137_vm9, %v1671_v50, %v1641_v37  ;;  %v4164_v33 = vor.u32 %v5044_v31, %v4163_v30 }
 0x43b   :  { %v1679_v0 = vsel %vm142_vm10, %v1675_v51, %v1645_v41  ;;  %v4139_v41 = vld [vmem:[%s7466_s1] sm:$0xf] }
 0x43c   :  { %1937 = vmatpush.bf16.msra.mxu2 %v4232_v43  ;;  %1921 = vmatpush.bf16.msra.mxu3 %v4144_v3  ;;  %v5056_v43 = vld [vmem:[%s7466_s1 + $0x94] sm:$0xf0]  ;;  %v5050_v3 = vld [vmem:[%s7466_s1 + $0x64] sm:$0xf0] }
 0x43d   :  { %v4212_v46 = vor.u32 %v5056_v43, %v4211_v42  ;;  %v5038_v42 = vld [vmem:[%s7466_s1 + $0x4] sm:$0xf0] }
 0x43e   :  { %1900 = vmatpush.bf16.msrb.mxu1 %v4220_v38  ;;  %v4147_v38 = vld [vmem:[%s7466_s1 + $0x10] sm:$0xf]  ;;  %v4140_v43 = vor.u32 %v5038_v42, %v4139_v41 }
 0x440   :  { %1938 = vmatpush.bf16.msra.mxu2 %v4224_v52  ;;  %v1605_v49 = vpop.permute.xlu1 %1604  ;;  %v4203_v52 = vld [vmem:[%s7466_s1 + $0x80] sm:$0xf] }
 0x441   :  { %v4204_v56 = vor.u32 %v5054_v54, %v4203_v52  ;;  %v1651_v21 = vsel %vm105_vm3, %v6178_v27, %v1605_v49 }
 0x442   :  { %1901 = vmatpush.bf16.msrb.mxu1 %v4212_v46 }
 0x444   :  { %1939 = vmatpush.bf16.msra.mxu2 %v4216_v2 }
 0x446   :  { %1902 = vmatpush.bf16.msrb.mxu1 %v4204_v56 }
 0x448   :  { %1940 = vmatpush.bf16.msra.mxu2 %v4208_v16 }
 0x449   :  { %4257 = vmatmul.msk.bf16.vlgmr.msrb.gmra.mxu1 %vm7495_vm11, %v1679_v0  ;;  %vm7498_vm11 = vcmask 850944  }
 0x44a   :  { %v1661_v7 = vsel %vm7498_vm11, %v1657_v11, %v1630_v26  ;;  %v5046_v26 = vld [vmem:[%s7466_s1 + $0x44] sm:$0xf0] }
 0x460   :  { %v1628_v60 = vpop.permute.xlu0 %1627  ;;  %v1632_v62 = vpop.permute.xlu1 %1631 }
 0x461   :  { %v1669_v5 = vsel %vm127_vm6, %v1632_v62, %v6243_v17  ;;  %v4188_v17 = vor.u32 %v5050_v3, %v4187_v10 }
 0x462   :  { %v1673_v12 = vsel %vm132_vm8, %v1669_v5, %v1639_v1  ;;  %vm7500_vm8 = vmmov %vm7499_vm0 }
 0x468   :  { %v1643_v14 = vpop.permute.xlu0 %1642  ;;  %v1647_v16 = vpop.permute.xlu1 %1646 }
 0x469   :  { %v1677_v15 = vsel %vm137_vm9, %v1673_v12, %v1643_v14  ;;  %vm7501_vm9 = vmmov %vm7496_vm1  ;;  %vm7502_vm1 = vcmask 637952  }
 0x46a   :  { %v1681_v22 = vsel %vm142_vm10, %v1677_v15, %v1647_v16  ;;  %v1655_v53 = vsel %vm7501_vm9, %v1651_v21, %v1609_v58  ;;  %vm7503_vm10 = vmmov %vm7498_vm11  ;;  %vm7517_vm9 = vcmask 900096  }
 0x46b   :  { %4258 = vmatmul.msk.bf16.gmra.mxu1 %vm7500_vm8, %v1681_v22  ;;  %v1659_v27 = vsel %vm7502_vm1, %v1655_v53, %v1628_v60  ;;  %vm7504_vm11 = vmmov %vm7499_vm0  ;;  %v1715_v60 = vperm.slane %v1712_v59, 1  ;;  %vm7516_vm8 = vcmask 449536   ;;  %vm1534_vm1 = vcmask 433152  }
 0x46c   :  { %v1664_v32 = vsel %vm7503_vm10, %v1659_v27, %v1632_v62  ;;  %v5068_v27 = vld [vmem:[%s7468_s3 + $0x8] sm:$0x10]  ;;  %vm1539_vm10 = vcmask 606208  }
 0x482   :  { %v1303_v25 = vpop.f32.mrf.mxu3 }
 0x483   :  { %v1326_v35 = vrot.slane %v1303_v25, 5 }
 0x48a   :  { %v1305_v39 = vpop.f32.mrf.mxu3 }
 0x48b   :  { %v1327_v40 = vrot.slane %v1305_v39, 5  ;;  %v5040_v39 = vld [vmem:[%s7466_s1 + $0x14] sm:$0xf0] }
 0x48d   :  { %v1328_v44 = vsel %vm501_vm13, %v1326_v35, %v1327_v40  ;;  %v5042_v35 = vld [vmem:[%s7466_s1 + $0x24] sm:$0xf0]  ;;  %v4148_v40 = vor.u32 %v5040_v39, %v4147_v38 }
 0x48e   :  { %v1334_v47 = vmax.f32 %v1303_v25, %v1328_v44  ;;  %v4171_v25 = vld [vmem:[%s7466_s1 + $0x40] sm:$0xf]  ;;  %v4156_v37 = vor.u32 %v5042_v35, %v4155_v34 }
 0x48f   :  { %v4172_v29 = vor.u32 %v5046_v26, %v4171_v25 }
 0x490   :  { %v1336_v36 = vpack.c.bf16 %v1334_v47, %v1334_v47 }
 0x492   :  { %v1317_v55 = vpop.f32.mrf.mxu2  ;;  %1484 = vmatmul.bf16.vlgmr.msrb.gmra.mxu3 %v1336_v36  ;;  %1510 = vmatmul.bf16.vlgmr.msrb.gmra.mxu2 %v1336_v36 }
 0x493   :  { %v1329_v13 = vrot.slane %v1317_v55, 5 }
 0x49a   :  { %v1319_v63 = vpop.f32.mrf.mxu2 }
 0x49b   :  { %v1330_v2 = vrot.slane %v1319_v63, 5 }
 0x49d   :  { %v1331_v57 = vsel %vm501_vm13, %v1329_v13, %v1330_v2 }
 0x49e   :  { %v1335_v6 = vmax.f32 %v1317_v55, %v1331_v57 }
 0x4a0   :  { %v1337_v9 = vpack.c.bf16 %v1335_v6, %v1335_v6 }
 0x4a2   :  { %4121 = vmatmul.msk.bf16.vlgmr.msrb.gmra.mxu0 %vm747_vm12, %v1337_v9  ;;  %1922 = vmatmul.bf16.vlgmr.msra.gmra.mxu3 %v1661_v7 }
 0x4a3   :  { %1876 = vmatpush.bf16.msrb.mxu0 %v4196_v8  ;;  %4259 = vmatmul.msk.bf16.vlgmr.msra.gmra.mxu2 %vm7499_vm0, %v1679_v0 }
 0x4a7   :  { %1877 = vmatpush.bf16.msrb.mxu0 %v4188_v17 }
 0x4ab   :  { %1878 = vmatpush.bf16.msrb.mxu0 %v4180_v24  ;;  %v1714_v24 = vperm.slane %v1712_v59, 0 }
 0x4af   :  { %1879 = vmatpush.bf16.msrb.mxu0 %v4172_v29  ;;  %v4267_v29 = vld [vmem:[%s7468_s3 + $0x8] sm:$0xf]  ;;  %s7515_s3 = smov 46  }
 0x4b0   :  { %v4268_v35 = vor.u32 %v5068_v27, %v4267_v29  ;;  %v4283_v27 = vld [vmem:[%s7469_s4 + $0x10] sm:$0xf] }
 0x4b2   :  { %4122 = vmatmul.msk.bf16.vlgmr.msra.gmra.mxu0 %vm747_vm12, %v1337_v9  ;;  %1927 = vmatmul.bf16.gmra.mxu3 %v1664_v32 }
 0x4b3   :  { %1880 = vmatpush.bf16.msrb.mxu0 %v4164_v33  ;;  %4260 = vmatmul.msk.bf16.gmra.mxu2 %vm7504_vm11, %v1681_v22  ;;  %vm1540_vm11 = vsmask.f32 256 }
 0x4b7   :  { %1881 = vmatpush.bf16.msrb.mxu0 %v4156_v37 }
 0x4bb   :  { %1882 = vmatpush.bf16.msrb.mxu0 %v4148_v40 }
 0x4bf   :  { %1883 = vmatpush.bf16.msrb.mxu0 %v4140_v43 }
 0x4c2   :  { %1884 = vmatmul.bf16.vlgmr.msrb.gmra.mxu0 %v1661_v7 }
 0x4c6   :  { %v1904_v13 = vpop.f32.mrf.mxu1 }
 0x4ce   :  { %v1906_v17 = vpop.f32.mrf.mxu1 }
 0x4d2   :  { %1889 = vmatmul.bf16.gmra.mxu0 %v1664_v32 }
 0x4e8   :  { %v1909_v21 = vpop.f32.mrf.mxu1 }
 0x4f0   :  { %v1911_v33 = vpop.f32.mrf.mxu1 }
 0x515   :  { %v1485_v44 = vpop.f32.mrf.mxu3  ;;  %v1511_v45 = vpop.f32.mrf.mxu2 }
 0x51d   :  { %v1487_v46 = vpop.f32.mrf.mxu3  ;;  %v1513_v47 = vpop.f32.mrf.mxu2 }
 0x51e   :  { %v4331_v46 = vld [vmem:[%s7469_s4 + $0x70] sm:$0xf]  ;;  %v5084_v47 = vld [vmem:[%s7469_s4 + $0x74] sm:$0xf0] }
 0x51f   :  { %v1498_v49 = vpop.f32.mrf.mxu0 }
 0x520   :  { %v6580_v36 = vadd.f32 %v1498_v49, %v1485_v44  ;;  %v5083_v49 = vld [vmem:[%s7469_s4 + $0x74] sm:$0xf] }
 0x525   :  { %v1923_v50 = vpop.f32.mrf.mxu3 }
 0x526   :  { %v1942_v52 = vpop.f32.mrf.mxu2  ;;  %v1924_v11 = vadd.f32 %v1923_v50, %v1715_v60  ;;  %v4332_v50 = vor.u32 %v5084_v47, %v4331_v46 }
 0x527   :  { %v1500_v54 = vpop.f32.mrf.mxu0 }
 0x528   :  { %v1943_v8 = vadd.f32 %v1942_v52, %v1924_v11  ;;  %v4333_v52 = vld [vmem:[%s7469_s4 + $0x78] sm:$0xf0]  ;;  %2165 = vmatpush.bf16.msrb.mxu2 %v4332_v50  ;;  %v5079_v11 = vld [vmem:[%s7469_s4 + $0x54] sm:$0xf] }
 0x529   :  { %v4336_v54 = vor.u32 %v5083_v49, %v4333_v52 }
 0x52a   :  { %v1953_v12 = vmax.f32 %v1943_v8, 0.0 }
 0x52d   :  { %v1925_v55 = vpop.f32.mrf.mxu3 }
 0x52e   :  { %v1944_v56 = vpop.f32.mrf.mxu2  ;;  %v1926_v4 = vadd.f32 %v1925_v55, %v1715_v60  ;;  %v4323_v55 = vld [vmem:[%s7469_s4 + $0x60] sm:$0xf] }
 0x52f   :  { %v1524_v51 = vpop.f32.mrf.mxu0 }
 0x530   :  { %v6582_v58 = vadd.f32 %v1524_v51, %v1511_v45  ;;  %v1945_v9 = vadd.f32 %v1944_v56, %v1926_v4  ;;  %v5082_v56 = vld [vmem:[%s7469_s4 + $0x64] sm:$0xf0]  ;;  %v5081_v51 = vld [vmem:[%s7469_s4 + $0x64] sm:$0xf] }
 0x531   :  { %v4324_v59 = vor.u32 %v5082_v56, %v4323_v55 }
 0x532   :  { %v1955_v14 = vmax.f32 %v1945_v9, 0.0  ;;  %v4309_v9 = vld [vmem:[%s7469_s4 + $0x48] sm:$0xf0] }
 0x533   :  { %2166 = vmatpush.bf16.msrb.mxu2 %v4324_v59 }
 0x534   :  { %v1961_v18 = vpack.c.bf16 %v1955_v14, %v1953_v12  ;;  %v4299_v14 = vld [vmem:[%s7469_s4 + $0x30] sm:$0xf] }
 0x535   :  { %v1928_v0 = vpop.f32.mrf.mxu3 }
 0x536   :  { %v1947_v61 = vpop.f32.mrf.mxu2  ;;  %v1929_v63 = vadd.f32 %v1928_v0, %v1715_v60  ;;  %v4325_v0 = vld [vmem:[%s7469_s4 + $0x68] sm:$0xf0] }
 0x537   :  { %v1526_v62 = vpop.f32.mrf.mxu0 }
 0x538   :  { %v1948_v2 = vadd.f32 %v1947_v61, %v1929_v63  ;;  %v6629_v61 = vld [vmem:[%s7469_s4 + $0x80] sm:$0x11] }
 0x539   :  { %v2120_v62 = vunpack.c.l.b16 %v6629_v61  ;;  %v2121_v50 = vunpack.c.h.b16 %v6629_v61 }
 0x53a   :  { %v1957_v6 = vmax.f32 %v1948_v2, 0.0  ;;  %v5080_v2 = vld [vmem:[%s7469_s4 + $0x54] sm:$0xf0] }
 0x53b   :  { %v2139_v55 = vpack.c.b16 %v2121_v50, %v2121_v50  ;;  %v5096_v50 = vld [vmem:[%s7470_s5 + $0x54] sm:$0xf0] }
 0x53d   :  { %v1930_v23 = vpop.f32.mrf.mxu3 }
 0x53e   :  { %v1931_v57 = vadd.f32 %v1930_v23, %v1715_v60  ;;  %v1949_v5 = vpop.f32.mrf.mxu2  ;;  %v4328_v60 = vor.u32 %v5081_v51, %v4325_v0  ;;  %v4317_v23 = vld [vmem:[%s7469_s4 + $0x58] sm:$0xf0] }
 0x53f   :  { %v1885_v1 = vpop.f32.mrf.mxu0 }
 0x540   :  { %v1950_v7 = vadd.f32 %v1949_v5, %v1931_v57  ;;  %v1886_v32 = vadd.f32 %v1885_v1, %v1714_v24  ;;  %v2138_v57 = vpack.c.b16 %v2120_v62, %v2120_v62  ;;  %v4320_v5 = vor.u32 %v5079_v11, %v4317_v23  ;;  %v4307_v1 = vld [vmem:[%s7469_s4 + $0x40] sm:$0xf] }
 0x542   :  { %v1959_v10 = vmax.f32 %v1950_v7, 0.0  ;;  %v1905_v40 = vadd.f32 %v1904_v13, %v1886_v32  ;;  %v4315_v13 = vld [vmem:[%s7469_s4 + $0x50] sm:$0xf]  ;;  %v5077_v7 = vld [vmem:[%s7469_s4 + $0x44] sm:$0xf] }
 0x543   :  { %v4316_v4 = vor.u32 %v5080_v2, %v4315_v13 }
 0x544   :  { %v1963_v3 = vpack.c.bf16 %v1959_v10, %v1957_v6  ;;  %v1952_v44 = vmax.f32 %v1905_v40, 0.0  ;;  %v5078_v6 = vld [vmem:[%s7469_s4 + $0x44] sm:$0xf0]  ;;  %v5069_v40 = vld [vmem:[%s7469_s4 + $0x4] sm:$0xf] }
 0x545   :  { %2167 = vmatpush.bf16.msrb.mxu2 %v4316_v4  ;;  %v4308_v8 = vor.u32 %v5078_v6, %v4307_v1 }
 0x546   :  { %v1988_v15 = vsel %vm336_vm2, %v1963_v3, 0  ;;  %v4312_v3 = vor.u32 %v5077_v7, %v4309_v9 }
 0x547   :  { %v1887_v16 = vpop.f32.mrf.mxu0  ;;  %2015 = vmatpush.bf16.msra.mxu1 %v1988_v15  ;;  %v5075_v15 = vld [vmem:[%s7469_s4 + $0x34] sm:$0xf] }
 0x548   :  { %v1888_v26 = vadd.f32 %v1887_v16, %v1714_v24 }
 0x549   :  { %2168 = vmatpush.bf16.msrb.mxu2 %v4308_v8 }
 0x54a   :  { %v1907_v37 = vadd.f32 %v1906_v17, %v1888_v26  ;;  %v5076_v17 = vld [vmem:[%s7469_s4 + $0x34] sm:$0xf0]  ;;  %v4293_v26 = vld [vmem:[%s7469_s4 + $0x28] sm:$0xf0] }
 0x54b   :  { %2016 = vmatpush.bf16.msra.mxu1 %v1961_v18  ;;  %v4300_v16 = vor.u32 %v5076_v17, %v4299_v14  ;;  %v4301_v18 = vld [vmem:[%s7469_s4 + $0x38] sm:$0xf0] }
 0x54c   :  { %v1954_v42 = vmax.f32 %v1907_v37, 0.0 }
 0x54d   :  { %2169 = vmatpush.bf16.msrb.mxu2 %v4300_v16 }
 0x54e   :  { %4271 = vmatmul.msk.bf16.vlgmr.msra.gmra.mxu1 %vm105_vm3, %v5067_v20  ;;  %v1960_v45 = vpack.c.bf16 %v1954_v42, %v1952_v44  ;;  %v4277_v42 = vld [vmem:[%s7469_s4 + $0x8] sm:$0xf0] }
 0x54f   :  { %v1890_v22 = vpop.f32.mrf.mxu0 }
 0x550   :  { %v1891_v25 = vadd.f32 %v1890_v22, %v1714_v24  ;;  %v5074_v22 = vld [vmem:[%s7469_s4 + $0x24] sm:$0xf0] }
 0x552   :  { %v1910_v30 = vadd.f32 %v1909_v21, %v1891_v25  ;;  %v4291_v21 = vld [vmem:[%s7469_s4 + $0x20] sm:$0xf] }
 0x553   :  { %v4292_v25 = vor.u32 %v5074_v22, %v4291_v21 }
 0x554   :  { %v1956_v38 = vmax.f32 %v1910_v30, 0.0  ;;  %v5072_v30 = vld [vmem:[%s7469_s4 + $0x14] sm:$0xf0] }
 0x555   :  { %2170 = vmatpush.bf16.msrb.mxu2 %v4292_v25  ;;  %v4284_v32 = vor.u32 %v5072_v30, %v4283_v27  ;;  %v5116_v27 = vld [vmem:[%s7470_s5 + $0xf4] sm:$0xf0]  ;;  %v4397_v30 = vld [vmem:[%s7470_s5 + $0x70] sm:$0xf] }
 0x557   :  { %v1892_v53 = vpop.f32.mrf.mxu0 }
 0x558   :  { %v1893_v31 = vadd.f32 %v1892_v53, %v1714_v24  ;;  %v5073_v24 = vld [vmem:[%s7469_s4 + $0x24] sm:$0xf] }
 0x559   :  { %v4296_v53 = vor.u32 %v5073_v24, %v4293_v26  ;;  %2171 = vmatpush.bf16.msrb.mxu2 %v4284_v32 }
 0x55a   :  { %v1912_v34 = vadd.f32 %v1911_v33, %v1893_v31  ;;  %v5071_v31 = vld [vmem:[%s7469_s4 + $0x14] sm:$0xf]  ;;  %v4285_v33 = vld [vmem:[%s7469_s4 + $0x18] sm:$0xf0] }
 0x55c   :  { %v1958_v39 = vmax.f32 %v1912_v34, 0.0  ;;  %v4288_v34 = vor.u32 %v5071_v31, %v4285_v33  ;;  %v5100_v33 = vld [vmem:[%s7470_s5 + $0x74] sm:$0xf0] }
 0x55e   :  { %v1962_v41 = vpack.c.bf16 %v1958_v39, %v1956_v38  ;;  %4272 = vmatmul.msk.bf16.gmra.mxu1 %vm105_vm3, %v4268_v35  ;;  %v4275_v38 = vld [vmem:[%s7469_s4] sm:$0xf]  ;;  %v5070_v39 = vld [vmem:[%s7469_s4 + $0x4] sm:$0xf0] }
 0x560   :  { %v1985_v43 = vsel %vm336_vm2, %v1962_v41, 0  ;;  %vm7505_vm2 = vcmask 1040384   ;;  %v4276_v41 = vor.u32 %v5070_v39, %v4275_v38  ;;  %v4398_v39 = vor.u32 %v5100_v33, %v4397_v30  ;;  %v5142_v33 = vld [vmem:[%s7470_s5 + $0x1c4] sm:$0xf0] }
 0x561   :  { %1996 = vmatpush.bf16.msra.mxu0 %v1985_v43  ;;  %v2160_v10 = vsel %vm7505_vm2, %v2138_v57, 0  ;;  %v4280_v43 = vor.u32 %v5069_v40, %v4277_v42  ;;  %v4389_v40 = vld [vmem:[%s7470_s5 + $0x60] sm:$0xf] }
 0x562   :  { %2186 = vmatpush.bf16.msrb.mxu3 %v2160_v10  ;;  %2172 = vmatpush.bf16.msrb.mxu2 %v4276_v41  ;;  %v5098_v41 = vld [vmem:[%s7470_s5 + $0x64] sm:$0xf0] }
 0x563   :  { %2673 = vmatpush.bf16.msrb.mxu1 %v4398_v39  ;;  %v4501_v39 = vld [vmem:[%s7470_s5 + $0x140] sm:$0xf] }
 0x565   :  { %1997 = vmatpush.bf16.msra.mxu0 %v1960_v45 }
 0x568   :  { %4269 = vmatmul.msk.bf16.vlgmr.msra.gmra.mxu0 %vm105_vm3, %v5067_v20  ;;  %v4304_v20 = vor.u32 %v5075_v15, %v4301_v18 }
 0x569   :  { %2193 = vmatpush.bf16.msrb.mxu0 %v4336_v54 }
 0x56d   :  { %2194 = vmatpush.bf16.msrb.mxu0 %v4328_v60 }
 0x571   :  { %2195 = vmatpush.bf16.msrb.mxu0 %v4320_v5 }
 0x575   :  { %2196 = vmatpush.bf16.msrb.mxu0 %v4312_v3 }
 0x578   :  { %4270 = vmatmul.msk.bf16.gmra.mxu0 %vm105_vm3, %v4268_v35  ;;  %vm7506_vm3 = vmmov %vm7505_vm2 }
 0x579   :  { %2197 = vmatpush.bf16.msrb.mxu0 %v4304_v20  ;;  %v2163_v51 = vsel %vm7506_vm3, %v2139_v55, 0 }
 0x57a   :  { %2214 = vmatpush.bf16.msra.mxu2 %v2163_v51  ;;  %v4581_v51 = vld [vmem:[%s7470_s5 + $0x1e0] sm:$0xf] }
 0x57d   :  { %2198 = vmatpush.bf16.msrb.mxu0 %v4296_v53 }
 0x581   :  { %2199 = vmatpush.bf16.msrb.mxu0 %v4288_v34  ;;  %v4453_v34 = vld [vmem:[%s7470_s5 + $0xe0] sm:$0xf] }
 0x585   :  { %2200 = vmatpush.bf16.msrb.mxu0 %v4280_v43 }
 0x5cb   :  { %v6632_v63 = vpop.f32.mrf.mxu1 }
 0x5d3   :  { %v2020_v12 = vpop.f32.mrf.mxu1 }
 0x5d4   :  { %v2037_v35 = vrot.slane %v2020_v12, 5 }
 0x5db   :  { %v2023_v29 = vpop.f32.mrf.mxu1 }
 0x5dc   :  { %v2038_v37 = vrot.slane %v2023_v29, 5  ;;  %v4461_v29 = vld [vmem:[%s7470_s5 + $0xf0] sm:$0xf] }
 0x5dd   :  { %v4462_v32 = vor.u32 %v5116_v27, %v4461_v29  ;;  %v5128_v29 = vld [vmem:[%s7470_s5 + $0x154] sm:$0xf0]  ;;  %v4357_v27 = vld [vmem:[%s7470_s5 + $0x20] sm:$0xf] }
 0x5de   :  { %v2039_v44 = vsel %vm501_vm13, %v2037_v35, %v2038_v37  ;;  %v5114_v35 = vld [vmem:[%s7470_s5 + $0xe4] sm:$0xf0] }
 0x5df   :  { %v2049_v49 = vmax.f32 %v6632_v63, %v2039_v44  ;;  %2687 = vmatpush.bf16.msra.mxu3 %v4462_v32  ;;  %v4454_v42 = vor.u32 %v5114_v35, %v4453_v34  ;;  %v4390_v44 = vor.u32 %v5098_v41, %v4389_v40  ;;  %v4565_v32 = vld [vmem:[%s7470_s5 + $0x1c0] sm:$0xf]  ;;  %v5126_v41 = vld [vmem:[%s7470_s5 + $0x144] sm:$0xf0] }
 0x5e0   :  { %v4566_v35 = vor.u32 %v5142_v33, %v4565_v32  ;;  %v4383_v33 = vld [vmem:[%s7470_s5 + $0x58] sm:$0xf0] }
 0x5e1   :  { %2674 = vmatpush.bf16.msrb.mxu1 %v4390_v44  ;;  %v5088_v44 = vld [vmem:[%s7470_s5 + $0x14] sm:$0xf0] }
 0x5e3   :  { %v2025_v45 = vpop.f32.mrf.mxu1  ;;  %2688 = vmatpush.bf16.msra.mxu3 %v4454_v42  ;;  %v4502_v42 = vor.u32 %v5126_v41, %v4501_v39  ;;  %v5109_v39 = vld [vmem:[%s7470_s5 + $0xc4] sm:$0xf]  ;;  %v4583_v41 = vld [vmem:[%s7470_s5 + $0x1e8] sm:$0xf0] }
 0x5e4   :  { %v2042_v46 = vrot.slane %v2025_v45, 5  ;;  %v4445_v45 = vld [vmem:[%s7470_s5 + $0xd0] sm:$0xf] }
 0x5e5   :  { %v1999_v47 = vpop.f32.mrf.mxu0 }
 0x5e6   :  { %v2043_v52 = vsel %vm501_vm13, %v2038_v37, %v2042_v46  ;;  %v5112_v46 = vld [vmem:[%s7470_s5 + $0xd4] sm:$0xf0] }
 0x5e7   :  { %v2051_v54 = vmax.f32 %v2020_v12, %v2043_v52  ;;  %v5132_v52 = vld [vmem:[%s7470_s5 + $0x174] sm:$0xf0] }
 0x5e9   :  { %v2053_v56 = vpack.c.bf16 %v2051_v54, %v2049_v49  ;;  %v4381_v49 = vld [vmem:[%s7470_s5 + $0x50] sm:$0xf] }
 0x5eb   :  { %4337 = vmatmul.msk.bf16.vlgmr.msrb.gmra.mxu3 %vm127_vm6, %v2053_v56 }
 0x5ed   :  { %v2001_v59 = vpop.f32.mrf.mxu0 }
 0x5ee   :  { %v2034_v62 = vrot.slane %v2001_v59, 5 }
 0x5f5   :  { %v2004_v0 = vpop.f32.mrf.mxu0 }
 0x5f6   :  { %v2035_v60 = vrot.slane %v2004_v0, 5  ;;  %v4446_v0 = vor.u32 %v5112_v46, %v4445_v45  ;;  %v4557_v45 = vld [vmem:[%s7470_s5 + $0x1b0] sm:$0xf] }
 0x5f8   :  { %v2036_v2 = vsel %vm501_vm13, %v2034_v62, %v2035_v60  ;;  %v4517_v62 = vld [vmem:[%s7470_s5 + $0x160] sm:$0xf]  ;;  %2689 = vmatpush.bf16.msra.mxu3 %v4446_v0  ;;  %v4463_v0 = vld [vmem:[%s7470_s5 + $0xf8] sm:$0xf0] }
 0x5f9   :  { %v2048_v11 = vmax.f32 %v1999_v47, %v2036_v2  ;;  %v4525_v47 = vld [vmem:[%s7470_s5 + $0x170] sm:$0xf] }
 0x5fd   :  { %v2006_v13 = vpop.f32.mrf.mxu0 }
 0x5fe   :  { %v2040_v63 = vrot.slane %v2006_v13, 5  ;;  %v5130_v13 = vld [vmem:[%s7470_s5 + $0x164] sm:$0xf0] }
 0x600   :  { %v2041_v61 = vsel %vm501_vm13, %v2035_v60, %v2040_v63  ;;  %v4382_v63 = vor.u32 %v5096_v50, %v4381_v49  ;;  %v4405_v49 = vld [vmem:[%s7470_s5 + $0x80] sm:$0xf]  ;;  %v5102_v50 = vld [vmem:[%s7470_s5 + $0x84] sm:$0xf0] }
 0x601   :  { %v2050_v4 = vmax.f32 %v2001_v59, %v2041_v61  ;;  %v5146_v59 = vld [vmem:[%s7470_s5 + $0x1e4] sm:$0xf0]  ;;  %v4437_v61 = vld [vmem:[%s7470_s5 + $0xc0] sm:$0xf] }
 0x602   :  { %v4582_v60 = vor.u32 %v5146_v59, %v4581_v51  ;;  %2675 = vmatpush.bf16.msrb.mxu1 %v4382_v63  ;;  %v5115_v51 = vld [vmem:[%s7470_s5 + $0xf4] sm:$0xf] }
 0x603   :  { %v2052_v23 = vpack.c.bf16 %v2050_v4, %v2048_v11  ;;  %v5110_v11 = vld [vmem:[%s7470_s5 + $0xc4] sm:$0xf0]  ;;  %v4518_v4 = vor.u32 %v5130_v13, %v4517_v62  ;;  %v4466_v13 = vor.u32 %v5115_v51, %v4463_v0  ;;  %v5143_v51 = vld [vmem:[%s7470_s5 + $0x1d4] sm:$0xf] }
 0x604   :  { %v5086_v62 = vld [vmem:[%s7470_s5 + $0x4] sm:$0xf0]  ;;  %v5091_v0 = vld [vmem:[%s7470_s5 + $0x34] sm:$0xf] }
 0x605   :  { %2173 = vmatmul.bf16.vlgmr.msrb.gmra.mxu2 %v2052_v23  ;;  %2201 = vmatmul.bf16.vlgmr.msrb.gmra.mxu0 %v2052_v23  ;;  %v2668_v23 = vand.u32 %v4582_v60, %v5834_v19  ;;  %v4341_v60 = vld [vmem:[%s7470_s5] sm:$0xf] }
 0x606   :  { %v4342_v63 = vor.u32 %v5086_v62, %v4341_v60  ;;  %v4367_v60 = vld [vmem:[%s7470_s5 + $0x38] sm:$0xf0]  ;;  %v5127_v62 = vld [vmem:[%s7470_s5 + $0x154] sm:$0xf] }
 0x607   :  { %2716 = vmatpush.bf16.msra.mxu0 %v2668_v23 }
 0x615   :  { %4338 = vmatmul.msk.bf16.vlgmr.msra.gmra.mxu2 %vm127_vm6, %v2053_v56  ;;  %vm7507_vm6 = vcmask 515072   ;;  %v4526_v56 = vor.u32 %v5132_v52, %v4525_v47  ;;  %v5140_v47 = vld [vmem:[%s7470_s5 + $0x1b4] sm:$0xf0] }
 0x616   :  { %vm7508_vm0 = vmmov %vm7507_vm6  ;;  %v4558_v52 = vor.u32 %v5140_v47, %v4557_v45  ;;  %v4375_v45 = vld [vmem:[%s7470_s5 + $0x48] sm:$0xf0] }
 0x617   :  { %2701 = vmatpush.bf16.msrb.mxu2 %v4526_v56  ;;  %v5124_v56 = vld [vmem:[%s7470_s5 + $0x134] sm:$0xf0] }
 0x61b   :  { %2702 = vmatpush.bf16.msrb.mxu2 %v4518_v4  ;;  %v4485_v4 = vld [vmem:[%s7470_s5 + $0x120] sm:$0xf] }
 0x66e   :  { %v2188_v1 = vpop.f32.mrf.mxu3 }
 0x676   :  { %v2190_v3 = vpop.f32.mrf.mxu3 }
 0x682   :  { %v2202_v6 = vpop.f32.mrf.mxu0 }
 0x688   :  { %v2174_v57 = vpop.f32.mrf.mxu2 }
 0x689   :  { %v2189_v8 = vadd.f32 %v2188_v1, %v2174_v57  ;;  %v5094_v1 = vld [vmem:[%s7470_s5 + $0x44] sm:$0xf0] }
 0x68a   :  { %v2204_v12 = vpop.f32.mrf.mxu0 }
 0x690   :  { %v2176_v5 = vpop.f32.mrf.mxu2 }
 0x691   :  { %v2191_v17 = vadd.f32 %v2190_v3, %v2176_v5  ;;  %v4373_v5 = vld [vmem:[%s7470_s5 + $0x40] sm:$0xf] }
 0x692   :  { %v4374_v3 = vor.u32 %v5094_v1, %v4373_v5  ;;  %v5099_v5 = vld [vmem:[%s7470_s5 + $0x74] sm:$0xf]  ;;  %v4399_v1 = vld [vmem:[%s7470_s5 + $0x78] sm:$0xf0] }
 0x694   :  { %2676 = vmatpush.bf16.msrb.mxu1 %v4374_v3  ;;  %v4541_v3 = vld [vmem:[%s7470_s5 + $0x190] sm:$0xf] }
 0x698   :  { %v2216_v7 = vpop.f32.mrf.mxu2 }
 0x699   :  { %v2217_v9 = vadd.f32 %v2216_v7, %v2202_v6  ;;  %v4438_v6 = vor.u32 %v5110_v11, %v4437_v61  ;;  %v4549_v61 = vld [vmem:[%s7470_s5 + $0x1a0] sm:$0xf]  ;;  %v5138_v11 = vld [vmem:[%s7470_s5 + $0x1a4] sm:$0xf0] }
 0x69a   :  { %v4550_v23 = vor.u32 %v5138_v11, %v4549_v61  ;;  %v5105_v61 = vld [vmem:[%s7470_s5 + $0xa4] sm:$0xf]  ;;  %v4423_v11 = vld [vmem:[%s7470_s5 + $0xa8] sm:$0xf0] }
 0x69b   :  { %v5235_v10 = vpack.i.bf16 %v2217_v9, %v2189_v8  ;;  %v4429_v9 = vld [vmem:[%s7470_s5 + $0xb0] sm:$0xf]  ;;  %2690 = vmatpush.bf16.msra.mxu3 %v4438_v6 }
 0x69d   :  { %5236 = vrot.lane.b32.xlu2 %v5235_v10, %s5290_s24  ;;  %v5108_v10 = vld [vmem:[%s7470_s5 + $0xb4] sm:$0xf0] }
 0x6a0   :  { %v2218_v14 = vpop.f32.mrf.mxu2 }
 0x6a1   :  { %v2219_v15 = vadd.f32 %v2218_v14, %v2204_v12  ;;  %v4430_v14 = vor.u32 %v5108_v10, %v4429_v9  ;;  %v4455_v9 = vld [vmem:[%s7470_s5 + $0xe8] sm:$0xf0] }
 0x6a3   :  { %v5240_v16 = vpack.i.bf16 %v2219_v15, %v2191_v17  ;;  %2691 = vmatpush.bf16.msra.mxu3 %v4430_v14  ;;  %v5245_v15 = vpack.i.bf16 %v6582_v58, %v6580_v36  ;;  %v5144_v58 = vld [vmem:[%s7470_s5 + $0x1d4] sm:$0xf0] }
 0x6a5   :  { %5241 = vrot.lane.b32.xlu0 %v5240_v16, %s5290_s24  ;;  %v4365_v16 = vld [vmem:[%s7470_s5 + $0x30] sm:$0xf] }
 0x6f7   :  { %v5237_v18 = vpop.permute.xlu2 %5236 }
 0x6f8   :  { %v5239_v20 = vunpack.i.h.bf16 %v5237_v18  ;;  %v5238_v21 = vunpack.i.l.bf16 %v5237_v18  ;;  %v5092_v18 = vld [vmem:[%s7470_s5 + $0x34] sm:$0xf0] }
 0x6fa   :  { %v2233_v22 = vsel %vm7507_vm6, %v5238_v21, %v5239_v20  ;;  %v4573_v20 = vld [vmem:[%s7470_s5 + $0x1d0] sm:$0xf]  ;;  %v4366_v21 = vor.u32 %v5092_v18, %v4365_v16  ;;  %v5097_v16 = vld [vmem:[%s7470_s5 + $0x64] sm:$0xf]  ;;  %vm3144_vm6 = vcmask 613376  }
 0x6fb   :  { %v2237_v24 = vmax.f32 %v2189_v8, %v2233_v22  ;;  %v4421_v22 = vld [vmem:[%s7470_s5 + $0xa0] sm:$0xf] }
 0x6fc   :  { %2677 = vmatpush.bf16.msrb.mxu1 %v4366_v21  ;;  %v5111_v21 = vld [vmem:[%s7470_s5 + $0xd4] sm:$0xf] }
 0x6fd   :  { %v2239_v37 = vpack.c.bf16 %v2237_v24, %v2237_v24  ;;  %v5106_v24 = vld [vmem:[%s7470_s5 + $0xa4] sm:$0xf0] }
 0x6ff   :  { %v2243_v54 = vunpack.c.l.b16 %v2239_v37  ;;  %v4413_v37 = vld [vmem:[%s7470_s5 + $0x90] sm:$0xf] }
 0x717   :  { %v5242_v25 = vpop.permute.xlu0 %5241 }
 0x718   :  { %v5244_v26 = vunpack.i.h.bf16 %v5242_v25  ;;  %v5243_v53 = vunpack.i.l.bf16 %v5242_v25  ;;  %v4574_v25 = vor.u32 %v5144_v58, %v4573_v20  ;;  %v4391_v20 = vld [vmem:[%s7470_s5 + $0x68] sm:$0xf0]  ;;  %v4447_v58 = vld [vmem:[%s7470_s5 + $0xd8] sm:$0xf0] }
 0x71a   :  { %v2234_v31 = vsel %vm7508_vm0, %v5243_v53, %v5244_v26  ;;  %v4422_v26 = vor.u32 %v5106_v24, %v4421_v22  ;;  %v4509_v53 = vld [vmem:[%s7470_s5 + $0x150] sm:$0xf]  ;;  %2717 = vmatpush.bf16.msra.mxu0 %v4574_v25  ;;  %v4394_v22 = vor.u32 %v5097_v16, %v4391_v20  ;;  %v4450_v24 = vor.u32 %v5111_v21, %v4447_v58  ;;  %v4533_v25 = vld [vmem:[%s7470_s5 + $0x180] sm:$0xf]  ;;  %v4559_v16 = vld [vmem:[%s7470_s5 + $0x1b8] sm:$0xf0] }
 0x71b   :  { %v2238_v38 = vmax.f32 %v2191_v17, %v2234_v31  ;;  %v4510_v30 = vor.u32 %v5128_v29, %v4509_v53  ;;  %v5090_v31 = vld [vmem:[%s7470_s5 + $0x24] sm:$0xf0]  ;;  %v5145_v53 = vld [vmem:[%s7470_s5 + $0x1e4] sm:$0xf]  ;;  %v5087_v20 = vld [vmem:[%s7470_s5 + $0x14] sm:$0xf] }
 0x71c   :  { %2692 = vmatpush.bf16.msra.mxu3 %v4422_v26  ;;  %v4358_v34 = vor.u32 %v5090_v31, %v4357_v27  ;;  %v5134_v26 = vld [vmem:[%s7470_s5 + $0x184] sm:$0xf0]  ;;  %v4469_v27 = vld [vmem:[%s7470_s5 + $0x100] sm:$0xf]  ;;  %v5095_v31 = vld [vmem:[%s7470_s5 + $0x54] sm:$0xf] }
 0x71d   :  { %v2240_v43 = vpack.c.bf16 %v2238_v38, %v2238_v38  ;;  %v5104_v38 = vld [vmem:[%s7470_s5 + $0x94] sm:$0xf0]  ;;  %2703 = vmatpush.bf16.msrb.mxu2 %v4510_v30  ;;  %v4534_v29 = vor.u32 %v5134_v26, %v4533_v25  ;;  %v5118_v30 = vld [vmem:[%s7470_s5 + $0x104] sm:$0xf0]  ;;  %v4351_v21 = vld [vmem:[%s7470_s5 + $0x18] sm:$0xf0] }
 0x71e   :  { %v4414_v40 = vor.u32 %v5104_v38, %v4413_v37  ;;  %2678 = vmatpush.bf16.msrb.mxu1 %v4358_v34  ;;  %2718 = vmatpush.bf16.msra.mxu0 %v4566_v35  ;;  %v4470_v32 = vor.u32 %v5118_v30, %v4469_v27  ;;  %v5131_v34 = vld [vmem:[%s7470_s5 + $0x174] sm:$0xf]  ;;  %v4527_v35 = vld [vmem:[%s7470_s5 + $0x178] sm:$0xf0]  ;;  %v4386_v37 = vor.u32 %v5095_v31, %v4383_v33  ;;  %v5101_v25 = vld [vmem:[%s7470_s5 + $0x84] sm:$0xf] }
 0x71f   :  { %v2244_v55 = vunpack.c.l.b16 %v2240_v43  ;;  %v4349_v43 = vld [vmem:[%s7470_s5 + $0x10] sm:$0xf]  ;;  %v4530_v38 = vor.u32 %v5131_v34, %v4527_v35  ;;  %v5123_v58 = vld [vmem:[%s7470_s5 + $0x134] sm:$0xf]  ;;  %v4407_v26 = vld [vmem:[%s7470_s5 + $0x88] sm:$0xf0] }
 0x720   :  { %2693 = vmatpush.bf16.msra.mxu3 %v4414_v40  ;;  %v4350_v46 = vor.u32 %v5088_v44, %v4349_v43  ;;  %v4439_v40 = vld [vmem:[%s7470_s5 + $0xc8] sm:$0xf0]  ;;  %v4586_v43 = vor.u32 %v5145_v53, %v4583_v41  ;;  %v5093_v44 = vld [vmem:[%s7470_s5 + $0x44] sm:$0xf] }
 0x721   :  { %v6774_v2 = vpack.c.b16 %v2244_v55, %v2243_v54  ;;  %2704 = vmatpush.bf16.msrb.mxu2 %v4502_v42  ;;  %v4406_v54 = vor.u32 %v5102_v50, %v4405_v49  ;;  %v4493_v55 = vld [vmem:[%s7470_s5 + $0x130] sm:$0xf]  ;;  %v4442_v42 = vor.u32 %v5109_v39, %v4439_v40  ;;  %v4378_v49 = vor.u32 %v5093_v44, %v4375_v45  ;;  %v4519_v50 = vld [vmem:[%s7470_s5 + $0x168] sm:$0xf0]  ;;  %v5137_v27 = vld [vmem:[%s7470_s5 + $0x1a4] sm:$0xf] }
 0x722   :  { %2679 = vmatpush.bf16.msrb.mxu1 %v4350_v46  ;;  %v4494_v59 = vor.u32 %v5124_v56, %v4493_v55  ;;  %2719 = vmatpush.bf16.msra.mxu0 %v4558_v52  ;;  %v5129_v46 = vld [vmem:[%s7470_s5 + $0x164] sm:$0xf]  ;;  %v2671_v47 = vand.u32 %v4586_v43, %v5834_v19  ;;  %v5107_v52 = vld [vmem:[%s7470_s5 + $0xb4] sm:$0xf]  ;;  %v4575_v19 = vld [vmem:[%s7470_s5 + $0x1d8] sm:$0xf0] }
 0x723   :  { %2248 = vrot.lane.b32.xlu1 %v6774_v2, %s7509_s13  ;;  %v2253_v57 = vshll.u32 %v6774_v2, 16  ;;  %v2251_v7 = vshrl.u32 %v6774_v2, 16  ;;  %v2263_v17 = vrot.slane %v6774_v2, 1  ;;  %v4522_v55 = vor.u32 %v5129_v46, %v4519_v50  ;;  %v4551_v30 = vld [vmem:[%s7470_s5 + $0x1a8] sm:$0xf0] }
 0x724   :  { %2694 = vmatpush.bf16.msra.mxu3 %v4406_v54  ;;  %v4431_v54 = vld [vmem:[%s7470_s5 + $0xb8] sm:$0xf0]  ;;  %v4554_v31 = vor.u32 %v5137_v27, %v4551_v30  ;;  %v4343_v33 = vld [vmem:[%s7470_s5 + $0x8] sm:$0xf0]  ;;  %v5121_v34 = vld [vmem:[%s7470_s5 + $0x124] sm:$0xf] }
 0x725   :  { %v2255_v8 = vrot.slane %v2253_v57, 1  ;;  %2705 = vmatpush.bf16.msrb.mxu2 %v4494_v59  ;;  %v5122_v57 = vld [vmem:[%s7470_s5 + $0x124] sm:$0xf0]  ;;  %v4434_v56 = vor.u32 %v5107_v52, %v4431_v54  ;;  %v4578_v59 = vor.u32 %v5143_v51, %v4575_v19  ;;  %v4543_v39 = vld [vmem:[%s7470_s5 + $0x198] sm:$0xf0] }
 0x726   :  { %v4486_v6 = vor.u32 %v5122_v57, %v4485_v4  ;;  %2680 = vmatpush.bf16.msrb.mxu1 %v4342_v63  ;;  %2720 = vmatpush.bf16.msra.mxu0 %v4550_v23  ;;  %v4511_v63 = vld [vmem:[%s7470_s5 + $0x158] sm:$0xf0]  ;;  %v4426_v23 = vor.u32 %v5105_v61, %v4423_v11  ;;  %v5141_v57 = vld [vmem:[%s7470_s5 + $0x1c4] sm:$0xf]  ;;  %v4535_v46 = vld [vmem:[%s7470_s5 + $0x188] sm:$0xf0] }
 0x727   :  { %v2256_v12 = vor.u32 %v2255_v8, %v2251_v7  ;;  %v4402_v7 = vor.u32 %v5099_v5, %v4399_v1  ;;  %v5113_v8 = vld [vmem:[%s7470_s5 + $0xe4] sm:$0xf]  ;;  %v4514_v4 = vor.u32 %v5127_v62, %v4511_v63  ;;  %v4567_v5 = vld [vmem:[%s7470_s5 + $0x1c8] sm:$0xf0]  ;;  %v4479_v43 = vld [vmem:[%s7470_s5 + $0x118] sm:$0xf0] }
 0x728   :  { %2743 = vmatpush.bf16.msrb.mxu3 %v4466_v13  ;;  %v4458_v10 = vor.u32 %v5113_v8, %v4455_v9  ;;  %v4370_v13 = vor.u32 %v5091_v0, %v4367_v60  ;;  %v4570_v1 = vor.u32 %v5141_v57, %v4567_v5  ;;  %v5125_v8 = vld [vmem:[%s7470_s5 + $0x144] sm:$0xf]  ;;  %v4471_v52 = vld [vmem:[%s7470_s5 + $0x108] sm:$0xf0]  ;;  %v2351_v27 = vld [vmem:[%s7471_s6] sm:$0x3] }
 0x729   :  { %2259 = vrot.lane.b32.xlu0 %v2256_v12, %s7510_s27  ;;  %2257 = vrot.lane.b32.xlu2 %v2256_v12, %s7511_s28  ;;  %v5133_v45 = vld [vmem:[%s7470_s5 + $0x184] sm:$0xf] }
 0x72a   :  { %2729 = vmatpush.bf16.msra.mxu1 %v4402_v7  ;;  %2706 = vmatpush.bf16.msrb.mxu2 %v4486_v6  ;;  %v5089_v6 = vld [vmem:[%s7470_s5 + $0x24] sm:$0xf]  ;;  %v4359_v7 = vld [vmem:[%s7470_s5 + $0x28] sm:$0xf0] }
 0x72b   :  { %2246 = vrot.lane.b32.xlu1 %v6774_v2, %s5287_s18  ;;  %v4362_v9 = vor.u32 %v5089_v6, %v4359_v7  ;;  %v5117_v50 = vld [vmem:[%s7470_s5 + $0x104] sm:$0xf] }
 0x72c   :  { %2744 = vmatpush.bf16.msrb.mxu3 %v4458_v10  ;;  %v4503_v10 = vld [vmem:[%s7470_s5 + $0x148] sm:$0xf0]  ;;  %v4474_v54 = vor.u32 %v5117_v50, %v4471_v52 }
 0x72e   :  { %2730 = vmatpush.bf16.msra.mxu1 %v4394_v22  ;;  %v4354_v22 = vor.u32 %v5087_v20, %v4351_v21  ;;  %v1576_v21 = vld [vmem:[#allocation2 + $0x3] sm:$0x1] }
 0x730   :  { %2745 = vmatpush.bf16.msrb.mxu3 %v4450_v24  ;;  %v4495_v24 = vld [vmem:[%s7470_s5 + $0x138] sm:$0xf0] }
 0x731   :  { %2264 = vrot.lane.b32.xlu0 %v2263_v17, %s7512_s19  ;;  %2261 = vrot.lane.b32.xlu2 %v2256_v12, %s7513_s29  ;;  %v5136_v12 = vld [vmem:[%s7470_s5 + $0x194] sm:$0xf0]  ;;  %v4498_v53 = vor.u32 %v5123_v58, %v4495_v24 }
 0x732   :  { %v4542_v14 = vor.u32 %v5136_v12, %v4541_v3  ;;  %2731 = vmatpush.bf16.msra.mxu1 %v4386_v37  ;;  %v5103_v3 = vld [vmem:[%s7470_s5 + $0x94] sm:$0xf]  ;;  %v4415_v12 = vld [vmem:[%s7470_s5 + $0x98] sm:$0xf0]  ;;  %v4487_v37 = vld [vmem:[%s7470_s5 + $0x128] sm:$0xf0] }
 0x733   :  { %2266 = vrot.lane.b32.xlu1 %v2263_v17, %s7514_s22  ;;  %v4490_v40 = vor.u32 %v5121_v34, %v4487_v37 }
 0x734   :  { %2721 = vmatpush.bf16.msra.mxu0 %v4542_v14  ;;  %2746 = vmatpush.bf16.msrb.mxu3 %v4442_v42  ;;  %v4506_v14 = vor.u32 %v5125_v8, %v4503_v10  ;;  %v5119_v42 = vld [vmem:[%s7470_s5 + $0x114] sm:$0xf] }
 0x735   :  { %v4482_v44 = vor.u32 %v5119_v42, %v4479_v43 }
 0x736   :  { %2732 = vmatpush.bf16.msra.mxu1 %v4378_v49 }
 0x738   :  { %2722 = vmatpush.bf16.msra.mxu0 %v4534_v29  ;;  %2747 = vmatpush.bf16.msrb.mxu3 %v4434_v56  ;;  %v4410_v29 = vor.u32 %v5101_v25, %v4407_v26  ;;  %v1584_v25 = vld [vmem:[#allocation2 + $0x4] sm:$0x1] }
 0x739   :  { %5246 = vrot.lane.b32.xlu0 %v5245_v15, %s5288_s14  ;;  %2268 = vrot.lane.b32.xlu2 %v2263_v17, %s7515_s3  ;;  %v4477_v17 = vld [vmem:[%s7470_s5 + $0x110] sm:$0xf]  ;;  %v5120_v15 = vld [vmem:[%s7470_s5 + $0x114] sm:$0xf0] }
 0x73a   :  { %v4478_v18 = vor.u32 %v5120_v15, %v4477_v17  ;;  %2733 = vmatpush.bf16.msra.mxu1 %v4370_v13  ;;  %v4418_v17 = vor.u32 %v5103_v3, %v4415_v12  ;;  %v5139_v15 = vld [vmem:[%s7470_s5 + $0x1b4] sm:$0xf] }
 0x73c   :  { %2707 = vmatpush.bf16.msrb.mxu2 %v4478_v18  ;;  %2757 = vmatpush.bf16.msrb.mxu0 %v4530_v38  ;;  %v4562_v18 = vor.u32 %v5139_v15, %v4559_v16  ;;  %v5135_v38 = vld [vmem:[%s7470_s5 + $0x194] sm:$0xf]  ;;  %v1564_v15 = vld [vmem:[#allocation2 + $0x2] sm:$0x1] }
 0x73d   :  { %2748 = vmatpush.bf16.msrb.mxu3 %v4426_v23  ;;  %v4546_v41 = vor.u32 %v5135_v38, %v4543_v39 }
 0x73e   :  { %2734 = vmatpush.bf16.msra.mxu1 %v4362_v9  ;;  %v1542_v9 = vld [vmem:[#allocation2] sm:$0x1] }
 0x740   :  { %2708 = vmatpush.bf16.msrb.mxu2 %v4470_v32  ;;  %2758 = vmatpush.bf16.msrb.mxu0 %v4522_v55  ;;  %v5085_v32 = vld [vmem:[%s7470_s5 + $0x4] sm:$0xf] }
 0x741   :  { %2749 = vmatpush.bf16.msrb.mxu3 %v4418_v17  ;;  %v4346_v35 = vor.u32 %v5085_v32, %v4343_v33 }
 0x742   :  { %2735 = vmatpush.bf16.msra.mxu1 %v4354_v22 }
 0x744   :  { %2772 = vmatpush.bf16.msra.mxu2 %v2671_v47  ;;  %2759 = vmatpush.bf16.msrb.mxu0 %v4514_v4  ;;  %v4538_v47 = vor.u32 %v5133_v45, %v4535_v46  ;;  %v5160_v46 = vld [vmem:[%s7473_s8 + $0x64] sm:$0xf] }
 0x745   :  { %2750 = vmatpush.bf16.msrb.mxu3 %v4410_v29 }
 0x746   :  { %2736 = vmatpush.bf16.msra.mxu1 %v4346_v35 }
 0x748   :  { %2773 = vmatpush.bf16.msra.mxu2 %v4578_v59  ;;  %2760 = vmatpush.bf16.msrb.mxu0 %v4506_v14  ;;  %v1556_v14 = vld [vmem:[#allocation2 + $0x1] sm:$0x1] }
 0x74c   :  { %2774 = vmatpush.bf16.msra.mxu2 %v4570_v1  ;;  %2761 = vmatpush.bf16.msrb.mxu0 %v4498_v53 }
 0x750   :  { %2775 = vmatpush.bf16.msra.mxu2 %v4562_v18  ;;  %2762 = vmatpush.bf16.msrb.mxu0 %v4490_v40  ;;  %v5162_v40 = vld [vmem:[%s7473_s8 + $0x74] sm:$0xf] }
 0x754   :  { %2776 = vmatpush.bf16.msra.mxu2 %v4554_v31  ;;  %2763 = vmatpush.bf16.msrb.mxu0 %v4482_v44  ;;  %v2353_v31 = vperm.slane %v2351_v27, 0  ;;  %v4655_v44 = vld [vmem:[%s7473_s8 + $0x78] sm:$0xf0] }
 0x755   :  { %v4658_v45 = vor.u32 %v5162_v40, %v4655_v44  ;;  %v5153_v44 = vld [vmem:[%s7473_s8 + $0x24] sm:$0xf0] }
 0x758   :  { %2777 = vmatpush.bf16.msra.mxu2 %v4546_v41  ;;  %2764 = vmatpush.bf16.msrb.mxu0 %v4474_v54 }
 0x75c   :  { %2778 = vmatpush.bf16.msra.mxu2 %v4538_v47  ;;  %v4647_v47 = vld [vmem:[%s7473_s8 + $0x68] sm:$0xf0] }
 0x75d   :  { %v4650_v54 = vor.u32 %v5160_v46, %v4647_v47  ;;  %v4615_v47 = vld [vmem:[%s7473_s8 + $0x28] sm:$0xf0] }
 0x783   :  { %v2258_v49 = vpop.permute.xlu2 %2257 }
 0x78b   :  { %v2262_v19 = vpop.permute.xlu2 %2261 }
 0x793   :  { %v2269_v4 = vpop.permute.xlu2 %2268 }
 0x795   :  { %v2249_v55 = vpop.permute.xlu1 %2248 }
 0x796   :  { %v2276_v56 = vsel %vm747_vm12, %v2249_v55, %v2258_v49 }
 0x79b   :  { %v2260_v51 = vpop.permute.xlu0 %2259 }
 0x79c   :  { %v2278_v59 = vsel %vm750_vm7, %v2276_v56, %v2260_v51  ;;  %v2281_v13 = vsel %vm754_vm5, %v2260_v51, %v2262_v19  ;;  %vm7518_vm7 = vcmask 908288   ;;  %vm7521_vm5 = vmmov %vm7505_vm2  ;;  %v2354_v56 = vperm.slane %v2351_v27, 1  ;;  %v5158_v19 = vld [vmem:[%s7473_s8 + $0x54] sm:$0xf] }
 0x79d   :  { %v2247_v0 = vpop.permute.xlu1 %2246  ;;  %2695 = vmatmul.bf16.vlgmr.msra.gmra.mxu3 %v2278_v59 }
 0x79e   :  { %v2271_v60 = vsel %vm7516_vm8, %v6774_v2, %v2247_v0 }
 0x79f   :  { %v2273_v62 = vsel %vm7517_vm9, %v2271_v60, %v2249_v55 }
 0x7a0   :  { %2681 = vmatmul.bf16.vlgmr.msrb.gmra.mxu1 %v2273_v62 }
 0x7a3   :  { %v2265_v63 = vpop.permute.xlu0 %2264 }
 0x7a4   :  { %v2283_v61 = vsel %vm757_vm4, %v2281_v13, %v2265_v63  ;;  %vm7125_vm4 = vmand %vm1539_vm10, %vm1540_vm11 }
 0x7a5   :  { %v2267_v11 = vpop.permute.xlu1 %2266  ;;  %2709 = vmatmul.bf16.vlgmr.msrb.gmra.mxu2 %v2283_v61 }
 0x7a6   :  { %v2286_v23 = vsel %vm761_vm15, %v2265_v63, %v2267_v11  ;;  %vm7523_vm15 = vcmask 89088  }
 0x7a7   :  { %v2288_v57 = vsel %vm764_vm14, %v2286_v23, %v2269_v4  ;;  %vm7522_vm14 = vmmov %vm7518_vm7  ;;  %v4653_v4 = vld [vmem:[%s7473_s8 + $0x70] sm:$0xf]  ;;  %v5163_v23 = vld [vmem:[%s7473_s8 + $0x74] sm:$0xf0] }
 0x7a8   :  { %4587 = vmatmul.msk.bf16.vlgmr.msra.gmra.mxu0 %vm7518_vm7, %v2288_v57  ;;  %vm7524_vm2 = vmmov %vm7523_vm15 }
 0x7a9   :  { %3012 = vmatpush.bf16.msra.mxu0 %v4658_v45  ;;  %v5152_v45 = vld [vmem:[%s7473_s8 + $0x24] sm:$0xf] }
 0x7ab   :  { %v5247_v5 = vpop.permute.xlu0 %5246 }
 0x7ac   :  { %v5249_v2 = vunpack.i.h.bf16 %v5247_v5  ;;  %v5248_v1 = vunpack.i.l.bf16 %v5247_v5  ;;  %v4591_v5 = vld [vmem:[%s7472_s7] sm:$0xf] }
 0x7ad   :  { %2751 = vmatmul.bf16.vlgmr.msrb.gmra.mxu3 %v2278_v59  ;;  %v4639_v59 = vld [vmem:[%s7473_s8 + $0x58] sm:$0xf0]  ;;  %3013 = vmatpush.bf16.msra.mxu0 %v4650_v54  ;;  %v5150_v54 = vld [vmem:[%s7473_s8 + $0x14] sm:$0xf] }
 0x7ae   :  { %v1535_v6 = vsel %vm1534_vm1, %v5248_v1, %v5249_v2  ;;  %v4642_v60 = vor.u32 %v5158_v19, %v4639_v59  ;;  %v5147_v2 = vld [vmem:[%s7472_s7] sm:$0x10]  ;;  %v4597_v19 = vld [vmem:[%s7473_s8] sm:$0xf]  ;;  %v5149_v59 = vld [vmem:[%s7473_s8 + $0x4] sm:$0xf0] }
 0x7af   :  { %v1537_v7 = vmax.f32 %v6580_v36, %v1535_v6  ;;  %s5299_s7 = smov [#allocation3]  }
 0x7b0   :  { %2737 = vmatmul.bf16.vlgmr.msra.gmra.mxu1 %v2273_v62  ;;  %s3564_s30 = sshll.u32 %s5299_s7, 4  ;;  %s3565_s30 = int_to_ptr.vmem [resolvable:$true] %s3564_s30 }
 0x7b1   :  { %v1538_v10 = vpack.c.bf16 %v1537_v7, %v1537_v7  ;;  %v4654_v7 = vor.u32 %v5163_v23, %v4653_v4  ;;  %3014 = vmatpush.bf16.msra.mxu0 %v4642_v60  ;;  %v2871_v60 = vld [vmem:[%s7473_s8 + $0xa0] sm:$0x77] }
 0x7b3   :  { %v1543_v3 = vsel %vm7125_vm4, %v1538_v10, %v1542_v9  ;;  %v1546_v12 = vrot.slane %v1538_v10, 3  ;;  %1559 = vst [vmem:[#allocation1] sm:$0xff] %v1538_v10 }
 0x7b4   :  { %1544 = vst [vmem:[#allocation2] sm:$0x1] %v1543_v3  ;;  %v4645_v3 = vld [vmem:[%s7473_s8 + $0x60] sm:$0xf] }
 0x7b5   :  { %v1549_v17 = vsel %vm7521_vm5, %v1538_v10, %v1546_v12  ;;  %4588 = vmatmul.msk.bf16.vlgmr.msra.gmra.mxu2 %vm7522_vm14, %v2288_v57  ;;  %v5161_v12 = vld [vmem:[%s7473_s8 + $0x64] sm:$0xf0] }
 0x7b6   :  { %v1550_v36 = vshrl.u32 %v1549_v17, 16 }
 0x7b8   :  { %v1557_v16 = vsel %vm7125_vm4, %v1550_v36, %v1556_v14  ;;  %2765 = vmatmul.bf16.vlgmr.msrb.gmra.mxu0 %v2283_v61  ;;  %v4592_v14 = vor.u32 %v5147_v2, %v4591_v5  ;;  %v4669_v2 = vld [vmem:[%s7473_s8 + $0x90] sm:$0xf] }
 0x7b9   :  { %1558 = vst [vmem:[#allocation2 + $0x1] sm:$0x1] %v1557_v16 }
 0x7ba   :  { %v1561_v18 = vld [vmem:[#allocation1 + $0x1] ss:$4 sm:$0xff] }
 0x7bb   :  { %v1565_v20 = vsel %vm7125_vm4, %v1561_v18, %v1564_v15  ;;  %1567 = vst [vmem:[#allocation1] sm:$0xff] %v1538_v10  ;;  %v4646_v15 = vor.u32 %v5161_v12, %v4645_v3  ;;  %v4637_v18 = vld [vmem:[%s7473_s8 + $0x50] sm:$0xf]  ;;  %v5164_v3 = vld [vmem:[%s7473_s8 + $0x84] sm:$0xf] }
 0x7bc   :  { %1566 = vst [vmem:[#allocation2 + $0x2] sm:$0x1] %v1565_v20  ;;  %v5159_v20 = vld [vmem:[%s7473_s8 + $0x54] sm:$0xf0] }
 0x7c2   :  { %v1569_v58 = vld [vmem:[#allocation1 + $0x1] ss:$4 sm:$0xff] }
 0x7c3   :  { %v1570_v22 = vshrl.u32 %v1569_v58, 16  ;;  %1579 = vst [vmem:[#allocation1] sm:$0xff] %v1538_v10 }
 0x7c5   :  { %v1577_v24 = vsel %vm7125_vm4, %v1570_v22, %v1576_v21 }
 0x7c6   :  { %1578 = vst [vmem:[#allocation2 + $0x3] sm:$0x1] %v1577_v24  ;;  %v4638_v24 = vor.u32 %v5159_v20, %v4637_v18 }
 0x7ca   :  { %v1581_v26 = vld [vmem:[#allocation1 + $0x2] ss:$4 sm:$0xff] }
 0x7cb   :  { %v1585_v53 = vsel %vm7125_vm4, %v1581_v26, %v1584_v25 }
 0x7cc   :  { %1586 = vst [vmem:[#allocation2 + $0x4] sm:$0x1] %v1585_v53 }
 0x81d   :  { %v2682_v29 = vpop.f32.mrf.mxu1 }
 0x81e   :  { %v2683_v34 = vadd.f32 %v2682_v29, %v2353_v31 }
 0x820   :  { %v2696_v30 = vpop.f32.mrf.mxu3 }
 0x821   :  { %v2697_v38 = vadd.f32 %v2696_v30, %v2683_v34  ;;  %v4629_v30 = vld [vmem:[%s7473_s8 + $0x40] sm:$0xf]  ;;  %v4631_v34 = vld [vmem:[%s7473_s8 + $0x48] sm:$0xf0] }
 0x825   :  { %v2684_v32 = vpop.f32.mrf.mxu1  ;;  %v2724_v33 = vpop.f32.mrf.mxu0 }
 0x826   :  { %v2685_v39 = vadd.f32 %v2684_v32, %v2353_v31  ;;  %v5157_v31 = vld [vmem:[%s7473_s8 + $0x44] sm:$0xf0]  ;;  %v5156_v32 = vld [vmem:[%s7473_s8 + $0x44] sm:$0xf] }
 0x828   :  { %v2698_v35 = vpop.f32.mrf.mxu3  ;;  %v2710_v37 = vpop.f32.mrf.mxu2 }
 0x829   :  { %v2711_v41 = vadd.f32 %v2710_v37, %v2697_v38  ;;  %v2699_v49 = vadd.f32 %v2698_v35, %v2685_v39  ;;  %v4634_v35 = vor.u32 %v5156_v32, %v4631_v34  ;;  %v4621_v37 = vld [vmem:[%s7473_s8 + $0x30] sm:$0xf]  ;;  %v5155_v38 = vld [vmem:[%s7473_s8 + $0x34] sm:$0xf0]  ;;  %v5154_v39 = vld [vmem:[%s7473_s8 + $0x34] sm:$0xf] }
 0x82a   :  { %v4622_v40 = vor.u32 %v5155_v38, %v4621_v37  ;;  %v4705_v32 = vld [vmem:[%s7474_s9 + $0x48] sm:$0xf] }
 0x82b   :  { %v2725_v55 = vadd.f32 %v2724_v33, %v2711_v41  ;;  %v4630_v33 = vor.u32 %v5157_v31, %v4629_v30  ;;  %3015 = vmatpush.bf16.msra.mxu0 %v4634_v35  ;;  %v4623_v41 = vld [vmem:[%s7473_s8 + $0x38] sm:$0xf0] }
 0x82d   :  { %v2726_v42 = vpop.f32.mrf.mxu0  ;;  %v2738_v43 = vpop.f32.mrf.mxu1  ;;  %v2785_v62 = vmax.f32 %v2725_v55, 0.0 }
 0x82e   :  { %v2739_v13 = vadd.f32 %v2738_v43, %v2354_v56  ;;  %v4613_v43 = vld [vmem:[%s7473_s8 + $0x20] sm:$0xf] }
 0x82f   :  { %v4614_v46 = vor.u32 %v5153_v44, %v4613_v43 }
 0x830   :  { %v2712_v50 = vpop.f32.mrf.mxu2  ;;  %v2752_v52 = vpop.f32.mrf.mxu3 }
 0x831   :  { %v2713_v51 = vadd.f32 %v2712_v50, %v2699_v49  ;;  %v2753_v9 = vadd.f32 %v2752_v52, %v2739_v13  ;;  %v4618_v49 = vor.u32 %v5152_v45, %v4615_v47  ;;  %v4605_v50 = vld [vmem:[%s7473_s8 + $0x10] sm:$0xf]  ;;  %v5151_v52 = vld [vmem:[%s7473_s8 + $0x14] sm:$0xf0]  ;;  %v4599_v13 = vld [vmem:[%s7473_s8 + $0x8] sm:$0xf0] }
 0x832   :  { %v4606_v55 = vor.u32 %v5151_v52, %v4605_v50  ;;  %v5172_v47 = vld [vmem:[%s7474_s9 + $0x20] sm:$0x30] }
 0x833   :  { %v2727_v0 = vadd.f32 %v2726_v42, %v2713_v51  ;;  %v4626_v42 = vor.u32 %v5154_v39, %v4623_v41  ;;  %v5176_v50 = vld [vmem:[%s7474_s9 + $0x40] sm:$0xff] }
 0x835   :  { %v2787_v63 = vmax.f32 %v2727_v0, 0.0  ;;  %v2740_v61 = vpop.f32.mrf.mxu1  ;;  %v2766_v11 = vpop.f32.mrf.mxu0  ;;  %3016 = vmatpush.bf16.msra.mxu0 %v4626_v42  ;;  %v5148_v0 = vld [vmem:[%s7473_s8 + $0x4] sm:$0xf] }
 0x836   :  { %v2741_v1 = vadd.f32 %v2740_v61, %v2354_v56  ;;  %v2767_v17 = vadd.f32 %v2766_v11, %v2753_v9  ;;  %v4607_v56 = vld [vmem:[%s7473_s8 + $0x18] sm:$0xf0]  ;;  %v2934_v61 = vunpack.c.h.b16 %v2871_v60  ;;  %v4602_v11 = vor.u32 %v5148_v0, %v4599_v13  ;;  %v4661_v9 = vld [vmem:[%s7473_s8 + $0x80] sm:$0xf]  ;;  %v5174_v0 = vld [vmem:[%s7474_s9 + $0x30] sm:$0xff] }
 0x837   :  { %v2789_v57 = vpack.c.bf16 %v2787_v63, %v2785_v62  ;;  %v4610_v51 = vor.u32 %v5150_v54, %v4607_v56  ;;  %v4598_v62 = vor.u32 %v5149_v59, %v4597_v19  ;;  %v2933_v63 = vunpack.c.l.b16 %v2871_v60  ;;  %v4757_v54 = vld [vmem:[%s7474_s9 + $0x70] sm:$0xf]  ;;  %v5175_v56 = vld [vmem:[%s7474_s9 + $0x38] sm:$0xff] }
 0x838   :  { %v2780_v6 = vpop.f32.mrf.mxu2  ;;  %v2754_v10 = vpop.f32.mrf.mxu3  ;;  %v2956_v23 = vpack.c.b16 %v2934_v61, %v2934_v61  ;;  %v5171_v19 = vld [vmem:[%s7474_s9 + $0x18] sm:$0xff]  ;;  %v5170_v60 = vld [vmem:[%s7474_s9 + $0x10] sm:$0xff] }
 0x839   :  { %v2802_v8 = vand.u32 %v2789_v57, %v6202_v48  ;;  %v2755_v36 = vadd.f32 %v2754_v10, %v2741_v1  ;;  %v2781_v58 = vadd.f32 %v2780_v6, %v2767_v17  ;;  %3017 = vmatpush.bf16.msra.mxu0 %v4618_v49  ;;  %v2955_v4 = vpack.c.b16 %v2933_v63, %v2933_v63  ;;  %v5167_v1 = vld [vmem:[%s7473_s8 + $0x94] sm:$0xf0]  ;;  %v5166_v6 = vld [vmem:[%s7473_s8 + $0x94] sm:$0xf]  ;;  %v5165_v10 = vld [vmem:[%s7473_s8 + $0x84] sm:$0xf0] }
 0x83a   :  { %v2984_v5 = vand.u32 %v2956_v23, %v6373_v28  ;;  %v4662_v12 = vor.u32 %v5165_v10, %v4661_v9  ;;  %v5187_v13 = vld [vmem:[%s7474_s9 + $0x98] sm:$0x30]  ;;  %v5181_v63 = vld [vmem:[%s7474_s9 + $0x68] sm:$0xff]  ;;  %v5178_v9 = vld [vmem:[%s7474_s9 + $0x50] sm:$0xff] }
 0x83b   :  { %2814 = vmatpush.bf16.msrb.mxu1 %v2802_v8  ;;  %v2786_v26 = vmax.f32 %v2781_v58, 0.0  ;;  %v2981_v57 = vand.u32 %v2955_v4, %v6373_v28  ;;  %v4671_v8 = vld [vmem:[%s7473_s8 + $0x98] sm:$0xf0]  ;;  %v5169_v23 = vld [vmem:[%s7474_s9 + $0x8] sm:$0xff] }
 0x83c   :  { %v4674_v28 = vor.u32 %v5166_v6, %v4671_v8  ;;  %v4819_v6 = vld [vmem:[%s7474_s9 + $0xc0] sm:$0xf]  ;;  %v5185_v8 = vld [vmem:[%s7474_s9 + $0x88] sm:$0xff] }
 0x83d   :  { %v2768_v16 = vpop.f32.mrf.mxu0  ;;  %3018 = vmatpush.bf16.msra.mxu0 %v4610_v51  ;;  %3004 = vmatpush.bf16.msrb.mxu2 %v2981_v57  ;;  %v5180_v57 = vld [vmem:[%s7474_s9 + $0x60] sm:$0xff] }
 0x83e   :  { %v2769_v21 = vadd.f32 %v2768_v16, %v2755_v36  ;;  %4593 = vmatmul.msk.bf16.vlgmr.msrb.gmra.mxu1 %vm7523_vm15, %v4592_v14 }
 0x83f   :  { %2986 = vmatpush.bf16.msra.mxu1 %v4654_v7  ;;  %v4670_v7 = vor.u32 %v5167_v1, %v4669_v2  ;;  %v5168_v2 = vld [vmem:[%s7474_s9] sm:$0xff]  ;;  %v5179_v1 = vld [vmem:[%s7474_s9 + $0x58] sm:$0xff] }
 0x840   :  { %v2782_v22 = vpop.f32.mrf.mxu2 }
 0x841   :  { %v2783_v25 = vadd.f32 %v2782_v22, %v2769_v21  ;;  %3019 = vmatpush.bf16.msra.mxu0 %v4602_v11  ;;  %3005 = vmatpush.bf16.msrb.mxu2 %v4670_v7  ;;  %v5173_v11 = vld [vmem:[%s7474_s9 + $0x28] sm:$0xff]  ;;  %v5192_v7 = vld [vmem:[%s7474_s9 + $0xc0] sm:$0x30] }
 0x843   :  { %2987 = vmatpush.bf16.msra.mxu1 %v4646_v15  ;;  %v2788_v53 = vmax.f32 %v2783_v25, 0.0 }
 0x845   :  { %v2790_v29 = vpack.c.bf16 %v2788_v53, %v2786_v26  ;;  %3006 = vmatpush.bf16.msrb.mxu2 %v4662_v12  ;;  %v5191_v12 = vld [vmem:[%s7474_s9 + $0xb8] sm:$0xff] }
 0x847   :  { %2988 = vmatpush.bf16.msra.mxu1 %v4638_v24  ;;  %v2805_v27 = vand.u32 %v2790_v29, %v6202_v48 }
 0x849   :  { %2828 = vmatpush.bf16.msra.mxu3 %v2805_v27 }
 0x84b   :  { %2989 = vmatpush.bf16.msra.mxu1 %v4630_v33  ;;  %v5177_v33 = vld [vmem:[%s7474_s9 + $0x48] sm:$0x30] }
 0x84c   :  { %4594 = vmatmul.msk.bf16.vlgmr.msra.gmra.mxu3 %vm7524_vm2, %v4592_v14  ;;  %v4663_v14 = vld [vmem:[%s7473_s8 + $0x88] sm:$0xf0]  ;;  %v4706_v34 = vor.u32 %v5177_v33, %v4705_v32 }
 0x84d   :  { %3030 = vmatpush.bf16.msrb.mxu3 %v2984_v5  ;;  %v4666_v36 = vor.u32 %v5164_v3, %v4663_v14  ;;  %v5186_v5 = vld [vmem:[%s7474_s9 + $0x90] sm:$0xff]  ;;  %v5184_v3 = vld [vmem:[%s7474_s9 + $0x80] sm:$0xff]  ;;  %v5183_v14 = vld [vmem:[%s7474_s9 + $0x78] sm:$0xff] }
 0x84e   :  { %v3149_v35 = vand.u32 %v4706_v34, %v6202_v48  ;;  %v3070_v34 = vld [vmem:[#allocation2 + $0x2] sm:$0x1] }
 0x84f   :  { %2990 = vmatpush.bf16.msra.mxu1 %v4622_v40 }
 0x850   :  { %3154 = vmatpush.bf16.msra.mxu2 %v3149_v35 }
 0x851   :  { %3031 = vmatpush.bf16.msrb.mxu3 %v4674_v28  ;;  %v4820_v28 = vor.u32 %v5192_v7, %v4819_v6  ;;  %v5203_v7 = vld [vmem:[%s7475_s10 + $0x50] sm:$0xff] }
 0x853   :  { %2991 = vmatpush.bf16.msra.mxu1 %v4614_v46  ;;  %v4726_v46 = vld [vmem:[%s7474_s9 + $0x20] sm:$0xf]  ;;  %v3376_v10 = vand.u32 %v4820_v28, %v6202_v48 }
 0x854   :  { %v4727_v49 = vor.u32 %v5172_v47, %v4726_v46  ;;  %3155 = vmatpush.bf16.msra.mxu2 %v5176_v50  ;;  %v5199_v50 = vld [vmem:[%s7475_s10 + $0x30] sm:$0xff]  ;;  %v5255_v28 = vld [vmem:[%s7476_s11] ss:$0 sm:$0xff] }
 0x855   :  { %3032 = vmatpush.bf16.msrb.mxu3 %v4666_v36 }
 0x856   :  { %v3197_v52 = vand.u32 %v4727_v49, %v6202_v48  ;;  %v5200_v49 = vld [vmem:[%s7475_s10 + $0x38] sm:$0xff] }
 0x857   :  { %2992 = vmatpush.bf16.msra.mxu1 %v4606_v55  ;;  %v5182_v55 = vld [vmem:[%s7474_s9 + $0x70] sm:$0x30] }
 0x858   :  { %v4758_v51 = vor.u32 %v5182_v55, %v4757_v54  ;;  %3156 = vmatpush.bf16.msra.mxu2 %v5175_v56  ;;  %v5197_v54 = vld [vmem:[%s7475_s10 + $0x20] sm:$0xff]  ;;  %v5196_v55 = vld [vmem:[%s7475_s10 + $0x18] sm:$0xff]  ;;  %v5195_v56 = vld [vmem:[%s7475_s10 + $0x10] sm:$0xff] }
 0x859   :  { %3202 = vmatpush.bf16.msra.mxu3 %v3197_v52  ;;  %v5198_v52 = vld [vmem:[%s7475_s10 + $0x28] sm:$0xff] }
 0x85a   :  { %v3256_v59 = vand.u32 %v4758_v51, %v6202_v48  ;;  %v5194_v51 = vld [vmem:[%s7475_s10 + $0x8] sm:$0xff] }
 0x85b   :  { %2993 = vmatpush.bf16.msra.mxu1 %v4598_v62  ;;  %v4788_v62 = vld [vmem:[%s7474_s9 + $0x98] sm:$0xf] }
 0x85c   :  { %3157 = vmatpush.bf16.msra.mxu2 %v5174_v0  ;;  %v4789_v61 = vor.u32 %v5187_v13, %v4788_v62  ;;  %v5208_v0 = vld [vmem:[%s7475_s10 + $0x78] sm:$0xff]  ;;  %v5207_v13 = vld [vmem:[%s7475_s10 + $0x70] sm:$0xff] }
 0x85d   :  { %3203 = vmatpush.bf16.msra.mxu3 %v5171_v19  ;;  %v5193_v19 = vld [vmem:[%s7475_s10] sm:$0xff] }
 0x85e   :  { %v3316_v4 = vand.u32 %v4789_v61, %v6202_v48  ;;  %v5190_v48 = vld [vmem:[%s7474_s9 + $0xb0] sm:$0xff]  ;;  %v5206_v61 = vld [vmem:[%s7475_s10 + $0x68] sm:$0xff] }
 0x85f   :  { %3261 = vmatpush.bf16.msrb.mxu1 %v3256_v59 }
 0x860   :  { %3158 = vmatpush.bf16.msra.mxu2 %v5173_v11  ;;  %3321 = vmatpush.bf16.msrb.mxu0 %v3316_v4 }
 0x861   :  { %3204 = vmatpush.bf16.msra.mxu3 %v5170_v60 }
 0x863   :  { %3262 = vmatpush.bf16.msrb.mxu1 %v5181_v63 }
 0x864   :  { %3322 = vmatpush.bf16.msrb.mxu0 %v5186_v5 }
 0x865   :  { %3205 = vmatpush.bf16.msra.mxu3 %v5169_v23 }
 0x867   :  { %3263 = vmatpush.bf16.msrb.mxu1 %v5180_v57  ;;  %v5205_v57 = vld [vmem:[%s7475_s10 + $0x60] sm:$0xff] }
 0x868   :  { %3323 = vmatpush.bf16.msrb.mxu0 %v5185_v8 }
 0x869   :  { %3206 = vmatpush.bf16.msra.mxu3 %v5168_v2  ;;  %v5204_v2 = vld [vmem:[%s7475_s10 + $0x58] sm:$0xff] }
 0x86b   :  { %3264 = vmatpush.bf16.msrb.mxu1 %v5179_v1 }
 0x86c   :  { %3324 = vmatpush.bf16.msrb.mxu0 %v5184_v3 }
 0x86f   :  { %3265 = vmatpush.bf16.msrb.mxu1 %v5178_v9 }
 0x870   :  { %3325 = vmatpush.bf16.msrb.mxu0 %v5183_v14 }
 0x8bb   :  { %v2816_v17 = vpop.f32.mrf.mxu1 }
 0x8bc   :  { %v2839_v15 = vrot.slane %v2816_v17, 5 }
 0x8c3   :  { %v2818_v16 = vpop.f32.mrf.mxu1 }
 0x8c4   :  { %v2840_v18 = vrot.slane %v2818_v16, 5  ;;  %v5189_v16 = vld [vmem:[%s7474_s9 + $0xa8] sm:$0xff] }
 0x8c6   :  { %v2841_v20 = vsel %vm501_vm13, %v2839_v15, %v2840_v18 }
 0x8c7   :  { %v2847_v21 = vmax.f32 %v2816_v17, %v2841_v20 }
 0x8c9   :  { %v2849_v58 = vpack.c.bf16 %v2847_v21, %v2847_v21  ;;  %v5188_v21 = vld [vmem:[%s7474_s9 + $0xa0] sm:$0xff] }
 0x8cb   :  { %2994 = vmatmul.bf16.vlgmr.msra.gmra.mxu1 %v2849_v58  ;;  %3020 = vmatmul.bf16.vlgmr.msra.gmra.mxu0 %v2849_v58 }
 0x8cc   :  { %3545 = vmatpush.bf16.msra.mxu1 %v5208_v0 }
 0x8cf   :  { %v2830_v22 = vpop.f32.mrf.mxu3 }
 0x8d0   :  { %v2842_v25 = vrot.slane %v2830_v22, 5  ;;  %3546 = vmatpush.bf16.msra.mxu1 %v5207_v13 }
 0x8d4   :  { %3547 = vmatpush.bf16.msra.mxu1 %v5206_v61 }
 0x8d7   :  { %v2832_v24 = vpop.f32.mrf.mxu3 }
 0x8d8   :  { %v2843_v26 = vrot.slane %v2832_v24, 5  ;;  %v3061_v24 = vld [vmem:[#allocation2 + $0x1] sm:$0x1]  ;;  %3548 = vmatpush.bf16.msra.mxu1 %v5205_v57 }
 0x8da   :  { %v2844_v53 = vsel %vm501_vm13, %v2842_v25, %v2843_v26 }
 0x8db   :  { %v2848_v29 = vmax.f32 %v2830_v22, %v2844_v53 }
 0x8dc   :  { %3549 = vmatpush.bf16.msra.mxu1 %v5204_v2 }
 0x8dd   :  { %v2850_v27 = vpack.c.bf16 %v2848_v29, %v2848_v29 }
 0x8df   :  { %4675 = vmatmul.msk.bf16.vlgmr.msrb.gmra.mxu2 %vm747_vm12, %v2850_v27  ;;  %4676 = vmatmul.msk.bf16.vlgmr.msrb.gmra.mxu3 %vm747_vm12, %v2850_v27  ;;  %vm3056_vm12 = vsmask.f32 7938  ;;  %v3058_v27 = vld [vmem:[#allocation2] sm:$0x1] }
 0x8e0   :  { %3381 = vmatpush.bf16.msrb.mxu2 %v3376_v10  ;;  %vm7385_vm13 = vmand %vm1539_vm10, %vm3056_vm12  ;;  %3463 = vmatpush.bf16.msrb.mxu3 %v5200_v49 }
 0x8e1   :  { %3550 = vmatpush.bf16.msra.mxu1 %v5203_v7 }
 0x8e4   :  { %3382 = vmatpush.bf16.msrb.mxu2 %v5191_v12  ;;  %3464 = vmatpush.bf16.msrb.mxu3 %v5199_v50 }
 0x8e8   :  { %3383 = vmatpush.bf16.msrb.mxu2 %v5190_v48  ;;  %3465 = vmatpush.bf16.msrb.mxu3 %v5198_v52 }
 0x8ec   :  { %3384 = vmatpush.bf16.msrb.mxu2 %v5189_v16  ;;  %3466 = vmatpush.bf16.msrb.mxu3 %v5197_v54 }
 0x8f0   :  { %3385 = vmatpush.bf16.msrb.mxu2 %v5188_v21  ;;  %3467 = vmatpush.bf16.msrb.mxu3 %v5196_v55 }
 0x8f4   :  { %3468 = vmatpush.bf16.msrb.mxu3 %v5195_v56 }
 0x8f8   :  { %3469 = vmatpush.bf16.msrb.mxu3 %v5194_v51 }
 0x8fc   :  { %3470 = vmatpush.bf16.msrb.mxu3 %v5193_v19 }
 0x948   :  { %v2995_v30 = vpop.f32.mrf.mxu1  ;;  %v3021_v31 = vpop.f32.mrf.mxu0 }
 0x950   :  { %v2997_v37 = vpop.f32.mrf.mxu1  ;;  %v3023_v38 = vpop.f32.mrf.mxu0 }
 0x951   :  { %v3077_v38 = vld [vmem:[#allocation2 + $0x3] sm:$0x1] }
 0x962   :  { %v3008_v39 = vpop.f32.mrf.mxu2  ;;  %v3034_v40 = vpop.f32.mrf.mxu3 }
 0x963   :  { %v7290_v41 = vadd.f32 %v3008_v39, %v2995_v30  ;;  %v3035_v42 = vadd.f32 %v3034_v40, %v3021_v31 }
 0x965   :  { %v5250_v43 = vpack.i.bf16 %v3035_v42, %v7290_v41 }
 0x967   :  { %5251 = vrot.lane.b32.xlu1 %v5250_v43, %s5288_s14 }
 0x96a   :  { %v3010_v44 = vpop.f32.mrf.mxu2  ;;  %v3036_v45 = vpop.f32.mrf.mxu3 }
 0x96b   :  { %v3086_v45 = vld [vmem:[#allocation2 + $0x4] sm:$0x1] }
 0x9d9   :  { %v5252_v17 = vpop.permute.xlu1 %5251 }
 0x9da   :  { %v5254_v36 = vunpack.i.h.bf16 %v5252_v17  ;;  %v5253_v15 = vunpack.i.l.bf16 %v5252_v17  ;;  %v5202_v17 = vld [vmem:[%s7475_s10 + $0x48] sm:$0xff] }
 0x9db   :  { %3551 = vmatpush.bf16.msra.mxu1 %v5202_v17 }
 0x9dc   :  { %v3044_v18 = vsel %vm1534_vm1, %v5253_v15, %v5254_v36  ;;  %v5201_v36 = vld [vmem:[%s7475_s10 + $0x40] sm:$0xff]  ;;  %s3566_s10 = sshll.u32 %s7477_s12, 4  ;;  %s3567_s10 = int_to_ptr.hbm [resolvable:$true] %s3566_s10 }
 0x9dd   :  { %v3046_v20 = vmax.f32 %v7290_v41, %v3044_v18  ;;  %v5256_v15 = vld [vmem:[%s7476_s11 + $0x1] ss:$0 sm:$0xff] }
 0x9df   :  { %v3047_v22 = vpack.c.bf16 %v3046_v20, %v3046_v20  ;;  %3552 = vmatpush.bf16.msra.mxu1 %v5201_v36 }
 0x9e1   :  { %v3049_v25 = vrot.slane %v3047_v22, 3  ;;  %v3062_v26 = vsel %vm7385_vm13, %v3047_v22, %v3061_v24  ;;  %3064 = vst [vmem:[#allocation1] sm:$0xff] %v3047_v22 }
 0x9e2   :  { %3063 = vst [vmem:[#allocation2 + $0x1] sm:$0x1] %v3062_v26 }
 0x9e3   :  { %v3052_v53 = vsel %vm7506_vm3, %v3047_v22, %v3049_v25 }
 0x9e4   :  { %v3053_v29 = vshll.u32 %v3052_v53, 16 }
 0x9e6   :  { %v3059_v30 = vsel %vm7385_vm13, %v3053_v29, %v3058_v27 }
 0x9e7   :  { %3060 = vst [vmem:[#allocation2] sm:$0x1] %v3059_v30 }
 0x9e8   :  { %v3066_v31 = vld [vmem:[#allocation1 + $0x1] ss:$4 sm:$0xff] }
 0x9e9   :  { %v3067_v32 = vshll.u32 %v3066_v31, 16  ;;  %3073 = vst [vmem:[#allocation1] sm:$0xff] %v3047_v22  ;;  %v3090_v33 = vld [vmem:[#allocation2 + $0x1] sm:$0x1] }
 0x9ea   :  { %4707 = vmatmul.msk.bf16.vlgmr.msra.gmra.mxu2 %vm3144_vm6, %v3090_v33 }
 0x9eb   :  { %v3071_v35 = vsel %vm7385_vm13, %v3067_v32, %v3070_v34 }
 0x9ec   :  { %3072 = vst [vmem:[#allocation2 + $0x2] sm:$0x1] %v3071_v35 }
 0x9ee   :  { %v3089_v37 = vld [vmem:[#allocation2] sm:$0x1] }
 0x9ef   :  { %4728 = vmatmul.msk.bf16.vlgmr.msra.gmra.mxu3 %vm3144_vm6, %v3089_v37 }
 0x9f0   :  { %v3075_v39 = vld [vmem:[#allocation1 + $0x1] ss:$4 sm:$0xff] }
 0x9f1   :  { %v3078_v40 = vsel %vm7385_vm13, %v3075_v39, %v3077_v38  ;;  %3080 = vst [vmem:[#allocation1] sm:$0xff] %v3047_v22  ;;  %v5257_v22 = vld [vmem:[%s7476_s11 + $0x2] ss:$0 sm:$0xff] }
 0x9f2   :  { %3079 = vst [vmem:[#allocation2 + $0x3] sm:$0x1] %v3078_v40 }
 0x9f3   :  { %v3091_v41 = vld [vmem:[#allocation2 + $0x2] sm:$0x1] }
 0x9f4   :  { %4759 = vmatmul.msk.bf16.vlgmr.msrb.gmra.mxu1 %vm3144_vm6, %v3091_v41 }
 0x9f8   :  { %v3082_v42 = vld [vmem:[#allocation1 + $0x2] ss:$4 sm:$0xff] }
 0x9f9   :  { %v3083_v43 = vshll.u32 %v3082_v42, 16  ;;  %v3092_v44 = vld [vmem:[#allocation2 + $0x3] sm:$0x1] }
 0x9fa   :  { %4790 = vmatmul.msk.bf16.vlgmr.msrb.gmra.mxu0 %vm3144_vm6, %v3092_v44 }
 0x9fb   :  { %v3087_v46 = vsel %vm7385_vm13, %v3083_v43, %v3086_v45 }
 0x9fc   :  { %3088 = vst [vmem:[#allocation2 + $0x4] sm:$0x1] %v3087_v46 }
 0xa03   :  { %v3093_v47 = vld [vmem:[#allocation2 + $0x4] sm:$0x1] }
 0xa04   :  { %4821 = vmatmul.msk.bf16.vlgmr.msrb.gmra.mxu2 %vm3144_vm6, %v3093_v47 }
 0xa6d   :  { %v3160_v59 = vpop.f32.mrf.mxu2 }
 0xa71   :  { %v3267_v60 = vpop.f32.mrf.mxu1 }
 0xa72   :  { %v3208_v62 = vpop.f32.mrf.mxu3 }
 0xa73   :  { %v3209_v5 = vadd.f32 %v3208_v62, %v3160_v59 }
 0xa75   :  { %v3162_v63 = vpop.f32.mrf.mxu2  ;;  %v3271_v6 = vadd.f32 %v3267_v60, %v3209_v5 }
 0xa77   :  { %v3327_v11 = vpop.f32.mrf.mxu0 }
 0xa78   :  { %v3331_v8 = vadd.f32 %v3327_v11, %v3271_v6 }
 0xa79   :  { %v3269_v4 = vpop.f32.mrf.mxu1 }
 0xa7a   :  { %v3210_v23 = vpop.f32.mrf.mxu3 }
 0xa7f   :  { %v3329_v1 = vpop.f32.mrf.mxu0 }
 0xa87   :  { %v3387_v9 = vpop.f32.mrf.mxu2 }
 0xa88   :  { %v3391_v10 = vadd.f32 %v3387_v9, %v3331_v8 }
 0xa8a   :  { %v3394_v3 = vadd.f32 %v5255_v28, %v3391_v10 }
 0xa8c   :  { %v3395_v12 = vmax.f32 %v3394_v3, 0.0 }
 0xa8e   :  { %v3396_v14 = vpack.c.bf16 %v3395_v12, %v3395_v12 }
 0xa8f   :  { %v3389_v48 = vpop.f32.mrf.mxu2 }
 0xa90   :  { %3471 = vmatmul.bf16.vlgmr.msrb.gmra.mxu3 %v3396_v14 }
 0xb13   :  { %v3472_v16 = vpop.f32.mrf.mxu3 }
 0xb14   :  { %v3473_v18 = vadd.f32 %v5256_v15, %v3472_v16 }
 0xb16   :  { %v3476_v20 = vmax.f32 %v3473_v18, 0.0 }
 0xb18   :  { %v3477_v21 = vpack.c.bf16 %v3476_v20, %v3476_v20 }
 0xb1a   :  { %3553 = vmatmul.bf16.vlgmr.msra.gmra.mxu1 %v3477_v21 }
 0xb1b   :  { %v3474_v58 = vpop.f32.mrf.mxu3 }
 0xb97   :  { %v3554_v24 = vpop.f32.mrf.mxu1 }
 0xb98   :  { %v3555_v25 = vadd.f32 %v5257_v22, %v3554_v24 }
 0xb9a   :  { %3558 = vst [vmem:[#allocation3] sm:$0x3] %v3555_v25 }
 0xb9b   :  { %3569 = dma.vmem_to_hbm [thread:$0]  %s3565_s30, 32, %s3567_s10, [#allocation4]  }
 0xb9f   :  { %v3556_v26 = vpop.f32.mrf.mxu1 }
 0xba0   :  { %5282 = dma.done.wait [#allocation4], 32  }
 0xba1   :  { %5283 = vsyncadd [#allocation4], 4294967264 }
 0xba2   :  { %3574 = vsyncpa [#allocation4], 1 }

</bundles_post_ra>
